<compile_context>
chip_gen: v5e
topology: v5e:2x2
jax: 0.10.0
libtpu: 0.0.40
codegen_flags: <defaults>
</compile_context>

<pallas_src>
import math
import functools

import jax
import jax.numpy as jnp
from jax.experimental import pallas as pl
from jax.experimental.pallas import tpu as pltpu

VMEM = pl.BlockSpec(memory_space=pltpu.MemorySpace.VMEM)
NEG_INF = -1e9
PAD = 128          # per-head lane-block width (keeps every head slice tile-aligned)


# --------------------------------------------------------------------------
# In-kernel helpers (trace-time, VMEM-resident values only)
# --------------------------------------------------------------------------

def _softmax_lastdim(s):
    s = s - jnp.max(s, axis=-1, keepdims=True)
    p = jnp.exp(s)
    return p * pl.reciprocal(jnp.sum(p, axis=-1, keepdims=True), approx=True)


def _layer_norm(x, g, b, eps=1e-5):
    mu = jnp.mean(x, axis=-1, keepdims=True)
    var = jnp.mean((x - mu) ** 2, axis=-1, keepdims=True)
    return (x - mu) * jax.lax.rsqrt(var + eps) * g + b


# --------------------------------------------------------------------------
# Single fused kernel: spatial GAT -> pool -> history shift -> temporal
# transformer -> actor/critic heads
# --------------------------------------------------------------------------

def _fused_kernel(*refs, n_gat, n_tf, n_heads, hidden, t_len, n_int):
    (seg_x_ref, adj_ref, pool_ref, hist_ref, pe_ref,
     iidc_ref, iidr_ref, blk_ref) = refs[:8]
    pos = 8
    gat_refs = refs[pos:pos + 4 * n_gat]; pos += 4 * n_gat
    tf_refs = refs[pos:pos + 12 * n_tf]; pos += 12 * n_tf
    hw1s_ref, hw1t_ref, hb1_ref, hw2_ref, hb2_ref = refs[pos:pos + 5]; pos += 5
    head_out_ref, new_hist_ref = refs[pos], refs[pos + 1]

    # ---------------- spatial encoder: GAT stack -------------------------
    x = seg_x_ref[...]                                         # [Nseg, F]
    # additive adjacency bias computed ONCE for all layers (adj[j,i]: edge i->j)
    adj_bias = jnp.where(adj_ref[...] > 0.0, 0.0, NEG_INF)     # [Nseg, Nseg]
    ones_blk = blk_ref[...]                                    # [heads*PAD, heads]
    inv_heads = 1.0 / n_heads

    for l in range(n_gat):
        w_ref, adst_ref, asrc_ref, b_ref = gat_refs[4 * l:4 * l + 4]
        # projection, every head in its own 128-lane block (padding lanes = 0)
        h = jnp.dot(x, w_ref[...], preferred_element_type=jnp.float32)   # [Nseg, heads*PAD]
        # per-destination / per-source attention terms for ALL heads via matmuls
        a_dst = jnp.dot(h * adst_ref[...], ones_blk,
                        preferred_element_type=jnp.float32)              # [Nseg, heads]
        a_srcT = jax.lax.dot_general(asrc_ref[...], h, (((1,), (1,)), ((), ())),
                                     preferred_element_type=jnp.float32)  # [heads, Nseg]
        acc = None
        for hd in range(n_heads):                              # static unroll
            e = a_dst[:, hd:hd + 1] + a_srcT[hd:hd + 1, :]     # e[j, i]  [Nseg, Nseg]
            e = jnp.where(e >= 0.0, e, 0.2 * e)                # LeakyReLU(0.2)
            p = _softmax_lastdim(e + adj_bias)                 # softmax over sources
            agg = jnp.dot(p, h[:, hd * PAD:(hd + 1) * PAD],    # aligned 128-lane slice
                          preferred_element_type=jnp.float32)  # [Nseg, PAD]
            acc = agg if acc is None else acc + agg
        # concat=False -> mean over heads (scaled sum), + bias, ReLU
        x = jnp.maximum(acc * inv_heads + b_ref[...], 0.0)     # [Nseg, PAD], lanes>=H are 0
        # TODO(synk): F.dropout(p=0.1) after each GAT layer is identity in eval mode.

    # per-intersection mean pooling; drop the zero padding lanes
    spat_pad = jnp.dot(pool_ref[...], x, preferred_element_type=jnp.float32)  # [Nint, PAD]
    spatial = spat_pad[:, :hidden]                                            # [Nint, H]

    # ---------------- history update (rolling buffer shift, in-kernel) ---
    hist = hist_ref[...]                                        # [T*Nint, H] t-major
    new_hist_ref[0:(t_len - 1) * n_int, :] = hist[n_int:, :]
    new_hist_ref[(t_len - 1) * n_int:, :] = spatial
    nh = new_hist_ref[...]                                      # [T*Nint, H]

    # ---------------- temporal encoder ----------------------------------
    xt = nh + pe_ref[...]                                       # PE add (hoisted buffer)
    # block-diagonal same-intersection mask, built from two tiny id vectors
    mask = jnp.where(iidc_ref[...] == iidr_ref[...], 0.0, NEG_INF)   # [rows, rows]

    dh = hidden // n_heads
    scale = 1.0 / math.sqrt(dh)
    for l in range(n_tf):
        (wqkv_ref, bqkv_ref, wo_ref, bo_ref, g1_ref, b1_ref,
         w1_ref, bf1_ref, w2_ref, bf2_ref, g2_ref, b2_ref) = tf_refs[12 * l:12 * l + 12]

        # fused QKV projection into per-head 128-lane blocks (padding lanes = 0)
        qkv = jnp.dot(xt, wqkv_ref[...], preferred_element_type=jnp.float32) + bqkv_ref[...]
        heads_out = []
        for hd in range(n_heads):                               # static unroll, aligned slices
            q = qkv[:, hd * PAD:(hd + 1) * PAD]
            k = qkv[:, (n_heads + hd) * PAD:(n_heads + hd + 1) * PAD]
            v = qkv[:, (2 * n_heads + hd) * PAD:(2 * n_heads + hd + 1) * PAD]
            s = jax.lax.dot_general(q, k, (((1,), (1,)), ((), ())),
                                    preferred_element_type=jnp.float32) * scale
            p = _softmax_lastdim(s + mask)
            heads_out.append(jnp.dot(p, v, preferred_element_type=jnp.float32))  # [rows, PAD]
        # head-concat (aligned lane concat) -> single output-projection matmul
        o_cat = jnp.concatenate(heads_out, axis=-1)                                # [rows, heads*PAD]
        attn = jnp.dot(o_cat, wo_ref[...], preferred_element_type=jnp.float32) + bo_ref[...]

        # post-LN encoder layer (PyTorch default), residual fused into LN
        y = _layer_norm(xt + attn, g1_ref[...], b1_ref[...])
        ff = jnp.maximum(jnp.dot(y, w1_ref[...], preferred_element_type=jnp.float32)
                         + bf1_ref[...], 0.0)
        ff = jnp.dot(ff, w2_ref[...], preferred_element_type=jnp.float32) + bf2_ref[...]
        xt = _layer_norm(y + ff, g2_ref[...], b2_ref[...])
        # TODO(synk): encoder-layer dropouts are identity in eval mode.

    # temporal_out[-1]: rows of the last time step (t-major row ordering)
    temporal = xt[(t_len - 1) * n_int:, :]                      # [Nint, H]

    # ---------------- actor / critic heads (packed, single [Nint,2]) -----
    h = (jnp.dot(spatial, hw1s_ref[...], preferred_element_type=jnp.float32)
         + jnp.dot(temporal, hw1t_ref[...], preferred_element_type=jnp.float32)
         + hb1_ref[...])
    h = jnp.maximum(h, 0.0)                                     # [Nint, 2H] = actor | critic
    head_out_ref[...] = (jnp.dot(h, hw2_ref[...], preferred_element_type=jnp.float32)
                         + hb2_ref[...])                        # col0=logits, col1=value


# --------------------------------------------------------------------------
# Forward pass (ONE pallas_call)
# --------------------------------------------------------------------------

@functools.partial(jax.jit, static_argnames=("n_heads",))
def forward(seg_x, adj, pool, history, params, *, n_heads):
    t_len, n_int, hidden = history.shape
    rows = t_len * n_int
    n_gat = len(params['gat'])
    n_tf = len(params['transformer'])

    hist_flat = history.reshape(rows, hidden)                   # t-major rows

    inputs = [seg_x, adj, pool, hist_flat, params['pe_rep'],
              params['iid_col'], params['iid_row'], params['ones_blk']]
    for gp in params['gat']:
        inputs += [gp['w_pad'], gp['adst_pad'], gp['asrc_rows'], gp['bias_pad']]
    for lp in params['transformer']:
        inputs += [lp['wqkv'], lp['bqkv'], lp['wo'], lp['bo'],
                   lp['ln1_g'], lp['ln1_b'], lp['w1'], lp['b1'],
                   lp['w2'], lp['b2'], lp['ln2_g'], lp['ln2_b']]
    inputs += [params['head_w1_sp'], params['head_w1_tp'], params['head_b1'],
               params['head_w2'], params['head_b2']]

    head_out, new_hist_flat = pl.pallas_call(
        functools.partial(_fused_kernel, n_gat=n_gat, n_tf=n_tf, n_heads=n_heads,
                          hidden=hidden, t_len=t_len, n_int=n_int),
        out_shape=(jax.ShapeDtypeStruct((n_int, 2), jnp.float32),
                   jax.ShapeDtypeStruct((rows, hidden), jnp.float32)),
        in_specs=[VMEM] * len(inputs),
        out_specs=(VMEM, VMEM),
    )(*inputs)

    logits = head_out[:, 0]
    value = head_out[:, 1]
    return logits, value, new_hist_flat.reshape(t_len, n_int, hidden)


# --------------------------------------------------------------------------
# Positional encoding + deterministic parameter init (pre-packed / padded)
# --------------------------------------------------------------------------

def positional_encoding(d_model, max_len=100):
    position = jnp.arange(max_len, dtype=jnp.float32)[:, None]
    div_term = jnp.exp(jnp.arange(0, d_model, 2, dtype=jnp.float32)
                       * (-math.log(10000.0) / d_model))
    pe = jnp.zeros((max_len, d_model), jnp.float32)
    pe = pe.at[:, 0::2].set(jnp.sin(position * div_term))
    pe = pe.at[:, 1::2].set(jnp.cos(position * div_term))
    return pe


def init_params(key, in_features, hidden, n_heads, n_tf_layers, n_gat_layers,
                history_length, n_int):
    keys = iter(jax.random.split(key, 256))

    def mat(shape, fan_in):
        s = 1.0 / math.sqrt(fan_in)
        return jax.random.uniform(next(keys), shape, jnp.float32, -s, s)

    params = {'gat': [], 'transformer': []}

    # ---- GAT layers: pad each head's columns into its own 128-lane block
    for i in range(n_gat_layers):
        din = in_features if i == 0 else hidden
        din_pad = din if i == 0 else PAD            # later layers consume padded activations
        w = mat((din, n_heads * hidden), din)
        att_src = mat((1, n_heads * hidden), hidden)
        att_dst = mat((1, n_heads * hidden), hidden)

        w_pad = jnp.zeros((din_pad, n_heads * PAD), jnp.float32)
        adst_pad = jnp.zeros((1, n_heads * PAD), jnp.float32)
        asrc_rows = jnp.zeros((n_heads, n_heads * PAD), jnp.float32)
        for k in range(n_heads):
            w_pad = w_pad.at[:din, k * PAD:k * PAD + hidden].set(
                w[:, k * hidden:(k + 1) * hidden])
            adst_pad = adst_pad.at[:, k * PAD:k * PAD + hidden].set(
                att_dst[:, k * hidden:(k + 1) * hidden])
            asrc_rows = asrc_rows.at[k, k * PAD:k * PAD + hidden].set(
                att_src[0, k * hidden:(k + 1) * hidden])
        bias_pad = jnp.zeros((1, PAD), jnp.float32)     # GATConv bias init is zeros
        params['gat'].append({'w_pad': w_pad, 'adst_pad': adst_pad,
                              'asrc_rows': asrc_rows, 'bias_pad': bias_pad})

    # block-ones matrix selecting each head's lane block (shared by all GAT layers)
    ones_blk = jnp.zeros((n_heads * PAD, n_heads), jnp.float32)
    for k in range(n_heads):
        ones_blk = ones_blk.at[k * PAD:k * PAD + hidden, k].set(1.0)
    params['ones_blk'] = ones_blk

    # ---- transformer layers: padded per-head QKV blocks + padded Wo rows
    dh = hidden // n_heads
    for _ in range(n_tf_layers):
        wq = mat((hidden, hidden), hidden)
        wk = mat((hidden, hidden), hidden)
        wv = mat((hidden, hidden), hidden)
        wo = mat((hidden, hidden), hidden)
        wqkv_pad = jnp.zeros((hidden, 3 * n_heads * PAD), jnp.float32)
        wo_pad = jnp.zeros((n_heads * PAD, hidden), jnp.float32)
        for k in range(n_heads):
            wqkv_pad = wqkv_pad.at[:, k * PAD:k * PAD + dh].set(wq[:, k * dh:(k + 1) * dh])
            wqkv_pad = wqkv_pad.at[:, (n_heads + k) * PAD:(n_heads + k) * PAD + dh].set(
                wk[:, k * dh:(k + 1) * dh])
            wqkv_pad = wqkv_pad.at[:, (2 * n_heads + k) * PAD:(2 * n_heads + k) * PAD + dh].set(
                wv[:, k * dh:(k + 1) * dh])
            wo_pad = wo_pad.at[k * PAD:k * PAD + dh, :].set(wo[k * dh:(k + 1) * dh, :])
        params['transformer'].append({
            'wqkv': wqkv_pad,
            'bqkv': jnp.zeros((1, 3 * n_heads * PAD), jnp.float32),
            'wo': wo_pad,
            'bo': jnp.zeros((1, hidden), jnp.float32),
            'ln1_g': jnp.ones((1, hidden), jnp.float32),
            'ln1_b': jnp.zeros((1, hidden), jnp.float32),
            'w1': mat((hidden, 4 * hidden), hidden),
            'b1': jnp.zeros((1, 4 * hidden), jnp.float32),
            'w2': mat((4 * hidden, hidden), 4 * hidden),
            'b2': jnp.zeros((1, hidden), jnp.float32),
            'ln2_g': jnp.ones((1, hidden), jnp.float32),
            'ln2_b': jnp.zeros((1, hidden), jnp.float32),
        })

    # ---- actor / critic heads packed for the fused heads section
    wa1 = mat((2 * hidden, hidden), 2 * hidden)
    wc1 = mat((2 * hidden, hidden), 2 * hidden)
    wa2 = mat((hidden, 1), hidden)
    wc2 = mat((hidden, 1), hidden)
    w1cat = jnp.concatenate([wa1, wc1], axis=1)                 # [2H, 2H]: actor | critic cols
    params['head_w1_sp'] = w1cat[:hidden, :]                    # rows hit by `spatial`
    params['head_w1_tp'] = w1cat[hidden:, :]                    # rows hit by `temporal`
    params['head_b1'] = jnp.zeros((1, 2 * hidden), jnp.float32)
    w2blk = jnp.zeros((2 * hidden, 2), jnp.float32)
    w2blk = w2blk.at[:hidden, 0].set(wa2[:, 0]).at[hidden:, 1].set(wc2[:, 0])
    params['head_w2'] = w2blk
    params['head_b2'] = jnp.zeros((1, 2), jnp.float32)

    # ---- constant buffers hoisted out of the per-step forward
    rows = history_length * n_int
    pe = positional_encoding(hidden, max_len=100)
    params['pe_rep'] = jnp.repeat(pe[:history_length], n_int, axis=0)   # [rows, H]
    iid = jnp.arange(rows, dtype=jnp.float32) % n_int                   # intersection id per row
    params['iid_col'] = iid[:, None]                                    # [rows, 1]
    params['iid_row'] = iid[None, :]                                    # [1, rows]
    return params


# --------------------------------------------------------------------------

if __name__ == "__main__":
    IN_FEATURES = 8
    HIDDEN = 32
    N_HEADS = 4
    TF_LAYERS = 2
    HISTORY = 5
    GAT_LAYERS = 2
    N_SEG = 16
    N_INT = 4

    key = jax.random.PRNGKey(0)
    k_x, k_adj, k_hist = jax.random.split(key, 3)

    # segment node features [N_seg, in_features]
    seg_x = jax.random.normal(k_x, (N_SEG, IN_FEATURES), jnp.float32)

    # random directed segment->segment edges; adj[dst, src] = 1; + self loops
    adj = jax.random.bernoulli(k_adj, 0.2, (N_SEG, N_SEG)).astype(jnp.float32)
    adj = jnp.maximum(adj, jnp.eye(N_SEG, dtype=jnp.float32))

    # each intersection averages a disjoint group of 4 segments
    pool = jnp.zeros((N_INT, N_SEG), jnp.float32)
    for t in range(N_INT):
        pool = pool.at[t, t * 4:(t + 1) * 4].set(0.25)

    # pre-filled rolling history of spatial encodings [T, N_int, H]
    # TODO(synk): reference returns zeros until the buffer fills; we assume a full buffer.
    history = jax.random.normal(k_hist, (HISTORY, N_INT, HIDDEN), jnp.float32)

    params = init_params(jax.random.PRNGKey(1), IN_FEATURES, HIDDEN, N_HEADS,
                         TF_LAYERS, GAT_LAYERS, HISTORY, N_INT)

    logits, value, new_hist = forward(seg_x, adj, pool, history, params,
                                      n_heads=N_HEADS)
    jax.block_until_ready((logits, value, new_hist))
    assert logits.shape == (N_INT,) and value.shape == (N_INT,)
    assert new_hist.shape == (HISTORY, N_INT, HIDDEN)
    print("KERNEL_OK")
</pallas_src>

<mosaic_0001>
module attributes {stable_mosaic.version = 11 : i64} {
  func.func @_fused_kernel(%arg0: memref<16x8xf32, #tpu.memory_space<vmem>>, %arg1: memref<16x16xf32, #tpu.memory_space<vmem>>, %arg2: memref<4x16xf32, #tpu.memory_space<vmem>>, %arg3: memref<20x32xf32, #tpu.memory_space<vmem>>, %arg4: memref<20x32xf32, #tpu.memory_space<vmem>>, %arg5: memref<20x1xf32, #tpu.memory_space<vmem>>, %arg6: memref<1x20xf32, #tpu.memory_space<vmem>>, %arg7: memref<512x4xf32, #tpu.memory_space<vmem>>, %arg8: memref<8x512xf32, #tpu.memory_space<vmem>>, %arg9: memref<1x512xf32, #tpu.memory_space<vmem>>, %arg10: memref<4x512xf32, #tpu.memory_space<vmem>>, %arg11: memref<1x128xf32, #tpu.memory_space<vmem>>, %arg12: memref<128x512xf32, #tpu.memory_space<vmem>>, %arg13: memref<1x512xf32, #tpu.memory_space<vmem>>, %arg14: memref<4x512xf32, #tpu.memory_space<vmem>>, %arg15: memref<1x128xf32, #tpu.memory_space<vmem>>, %arg16: memref<32x1536xf32, #tpu.memory_space<vmem>>, %arg17: memref<1x1536xf32, #tpu.memory_space<vmem>>, %arg18: memref<512x32xf32, #tpu.memory_space<vmem>>, %arg19: memref<1x32xf32, #tpu.memory_space<vmem>>, %arg20: memref<1x32xf32, #tpu.memory_space<vmem>>, %arg21: memref<1x32xf32, #tpu.memory_space<vmem>>, %arg22: memref<32x128xf32, #tpu.memory_space<vmem>>, %arg23: memref<1x128xf32, #tpu.memory_space<vmem>>, %arg24: memref<128x32xf32, #tpu.memory_space<vmem>>, %arg25: memref<1x32xf32, #tpu.memory_space<vmem>>, %arg26: memref<1x32xf32, #tpu.memory_space<vmem>>, %arg27: memref<1x32xf32, #tpu.memory_space<vmem>>, %arg28: memref<32x1536xf32, #tpu.memory_space<vmem>>, %arg29: memref<1x1536xf32, #tpu.memory_space<vmem>>, %arg30: memref<512x32xf32, #tpu.memory_space<vmem>>, %arg31: memref<1x32xf32, #tpu.memory_space<vmem>>, %arg32: memref<1x32xf32, #tpu.memory_space<vmem>>, %arg33: memref<1x32xf32, #tpu.memory_space<vmem>>, %arg34: memref<32x128xf32, #tpu.memory_space<vmem>>, %arg35: memref<1x128xf32, #tpu.memory_space<vmem>>, %arg36: memref<128x32xf32, #tpu.memory_space<vmem>>, %arg37: memref<1x32xf32, #tpu.memory_space<vmem>>, %arg38: memref<1x32xf32, #tpu.memory_space<vmem>>, %arg39: memref<1x32xf32, #tpu.memory_space<vmem>>, %arg40: memref<32x64xf32, #tpu.memory_space<vmem>>, %arg41: memref<32x64xf32, #tpu.memory_space<vmem>>, %arg42: memref<1x64xf32, #tpu.memory_space<vmem>>, %arg43: memref<64x2xf32, #tpu.memory_space<vmem>>, %arg44: memref<1x2xf32, #tpu.memory_space<vmem>>, %arg45: memref<4x2xf32, #tpu.memory_space<vmem>>, %arg46: memref<20x32xf32, #tpu.memory_space<vmem>>) attributes {dimension_semantics = [], scalar_prefetch = 0 : i64, scratch_operands = 0 : i64, tpu.core_type = #tpu.core_type<tc>} {
    %c0 = arith.constant 0 : index
    %c0_0 = arith.constant 0 : index
    %0 = vector.load %arg0[%c0, %c0_0] : memref<16x8xf32, #tpu.memory_space<vmem>>, vector<16x8xf32>
    %c0_1 = arith.constant 0 : index
    %c0_2 = arith.constant 0 : index
    %1 = vector.load %arg1[%c0_1, %c0_2] : memref<16x16xf32, #tpu.memory_space<vmem>>, vector<16x16xf32>
    %cst = arith.constant 0.000000e+00 : f32
    %2 = vector.broadcast %cst : f32 to vector<16x16xf32>
    %3 = arith.cmpf ogt, %1, %2 : vector<16x16xf32>
    %cst_3 = arith.constant 0.000000e+00 : f32
    %cst_4 = arith.constant -1.000000e+09 : f32
    %4 = vector.broadcast %cst_3 : f32 to vector<16x16xf32>
    %5 = vector.broadcast %cst_4 : f32 to vector<16x16xf32>
    %6 = arith.select %3, %4, %5 : vector<16x16xi1>, vector<16x16xf32>
    %c0_5 = arith.constant 0 : index
    %c0_6 = arith.constant 0 : index
    %7 = vector.load %arg7[%c0_5, %c0_6] : memref<512x4xf32, #tpu.memory_space<vmem>>, vector<512x4xf32>
    %c0_7 = arith.constant 0 : index
    %c0_8 = arith.constant 0 : index
    %8 = vector.load %arg8[%c0_7, %c0_8] : memref<8x512xf32, #tpu.memory_space<vmem>>, vector<8x512xf32>
    %cst_9 = arith.constant dense<0.000000e+00> : vector<16x512xf32>
    %9 = tpu.matmul %0, %8, %cst_9 {dimension_numbers = #tpu.dot_dimension_numbers<[1], [0], [0], [1], [0, 0, 1, 1], [], []>} : vector<16x8xf32>, vector<8x512xf32>, vector<16x512xf32> -> vector<16x512xf32>
    %c0_10 = arith.constant 0 : index
    %c0_11 = arith.constant 0 : index
    %10 = vector.load %arg9[%c0_10, %c0_11] : memref<1x512xf32, #tpu.memory_space<vmem>>, vector<1x512xf32>
    %11 = vector.broadcast %10 : vector<1x512xf32> to vector<16x512xf32>
    %12 = arith.mulf %9, %11 : vector<16x512xf32>
    %cst_12 = arith.constant dense<0.000000e+00> : vector<16x4xf32>
    %13 = tpu.matmul %12, %7, %cst_12 {dimension_numbers = #tpu.dot_dimension_numbers<[1], [0], [0], [1], [0, 0, 1, 1], [], []>} : vector<16x512xf32>, vector<512x4xf32>, vector<16x4xf32> -> vector<16x4xf32>
    %c0_13 = arith.constant 0 : index
    %c0_14 = arith.constant 0 : index
    %14 = vector.load %arg10[%c0_13, %c0_14] : memref<4x512xf32, #tpu.memory_space<vmem>>, vector<4x512xf32>
    %cst_15 = arith.constant dense<0.000000e+00> : vector<4x16xf32>
    %15 = tpu.matmul %14, %9, %cst_15 {dimension_numbers = #tpu.dot_dimension_numbers<[1], [1], [0], [0], [0, 0, 1, 0], [], []>} : vector<4x512xf32>, vector<16x512xf32>, vector<4x16xf32> -> vector<4x16xf32>
    %16 = vector.extract_strided_slice %13 {offsets = [0, 0], sizes = [16, 1], strides = [1, 1]} : vector<16x4xf32> to vector<16x1xf32>
    %17 = vector.extract_strided_slice %15 {offsets = [0, 0], sizes = [1, 16], strides = [1, 1]} : vector<4x16xf32> to vector<1x16xf32>
    %18 = vector.broadcast %16 : vector<16x1xf32> to vector<16x16xf32>
    %19 = vector.broadcast %17 : vector<1x16xf32> to vector<16x16xf32>
    %20 = arith.addf %18, %19 : vector<16x16xf32>
    %cst_16 = arith.constant 0.000000e+00 : f32
    %21 = vector.broadcast %cst_16 : f32 to vector<16x16xf32>
    %22 = arith.cmpf oge, %20, %21 : vector<16x16xf32>
    %cst_17 = arith.constant 2.000000e-01 : f32
    %23 = vector.broadcast %cst_17 : f32 to vector<16x16xf32>
    %24 = arith.mulf %23, %20 : vector<16x16xf32>
    %25 = arith.select %22, %20, %24 : vector<16x16xi1>, vector<16x16xf32>
    %26 = arith.addf %25, %6 : vector<16x16xf32>
    %cst_18 = arith.constant dense<0xFF800000> : vector<16xf32>
    %27 = vector.multi_reduction <maximumf>, %26, %cst_18 [1] : vector<16x16xf32> to vector<16xf32>
    %28 = vector.shape_cast %27 : vector<16xf32> to vector<16x1xf32>
    %29 = vector.broadcast %28 : vector<16x1xf32> to vector<16x16xf32>
    %30 = arith.subf %26, %29 : vector<16x16xf32>
    %31 = math.exp %30 : vector<16x16xf32>
    %cst_19 = arith.constant dense<0.000000e+00> : vector<16xf32>
    %32 = vector.multi_reduction <add>, %31, %cst_19 [1] : vector<16x16xf32> to vector<16xf32>
    %33 = vector.shape_cast %32 : vector<16xf32> to vector<16x1xf32>
    %34 = tpu.reciprocal %33 {approx = true} : vector<16x1xf32> -> vector<16x1xf32>
    %35 = vector.broadcast %34 : vector<16x1xf32> to vector<16x16xf32>
    %36 = arith.mulf %31, %35 : vector<16x16xf32>
    %37 = vector.extract_strided_slice %9 {offsets = [0, 0], sizes = [16, 128], strides = [1, 1]} : vector<16x512xf32> to vector<16x128xf32>
    %cst_20 = arith.constant dense<0.000000e+00> : vector<16x128xf32>
    %38 = tpu.matmul %36, %37, %cst_20 {dimension_numbers = #tpu.dot_dimension_numbers<[1], [0], [0], [1], [0, 0, 1, 1], [], []>} : vector<16x16xf32>, vector<16x128xf32>, vector<16x128xf32> -> vector<16x128xf32>
    %39 = vector.extract_strided_slice %13 {offsets = [0, 1], sizes = [16, 1], strides = [1, 1]} : vector<16x4xf32> to vector<16x1xf32>
    %40 = vector.extract_strided_slice %15 {offsets = [1, 0], sizes = [1, 16], strides = [1, 1]} : vector<4x16xf32> to vector<1x16xf32>
    %41 = vector.broadcast %39 : vector<16x1xf32> to vector<16x16xf32>
    %42 = vector.broadcast %40 : vector<1x16xf32> to vector<16x16xf32>
    %43 = arith.addf %41, %42 : vector<16x16xf32>
    %cst_21 = arith.constant 0.000000e+00 : f32
    %44 = vector.broadcast %cst_21 : f32 to vector<16x16xf32>
    %45 = arith.cmpf oge, %43, %44 : vector<16x16xf32>
    %cst_22 = arith.constant 2.000000e-01 : f32
    %46 = vector.broadcast %cst_22 : f32 to vector<16x16xf32>
    %47 = arith.mulf %46, %43 : vector<16x16xf32>
    %48 = arith.select %45, %43, %47 : vector<16x16xi1>, vector<16x16xf32>
    %49 = arith.addf %48, %6 : vector<16x16xf32>
    %cst_23 = arith.constant dense<0xFF800000> : vector<16xf32>
    %50 = vector.multi_reduction <maximumf>, %49, %cst_23 [1] : vector<16x16xf32> to vector<16xf32>
    %51 = vector.shape_cast %50 : vector<16xf32> to vector<16x1xf32>
    %52 = vector.broadcast %51 : vector<16x1xf32> to vector<16x16xf32>
    %53 = arith.subf %49, %52 : vector<16x16xf32>
    %54 = math.exp %53 : vector<16x16xf32>
    %cst_24 = arith.constant dense<0.000000e+00> : vector<16xf32>
    %55 = vector.multi_reduction <add>, %54, %cst_24 [1] : vector<16x16xf32> to vector<16xf32>
    %56 = vector.shape_cast %55 : vector<16xf32> to vector<16x1xf32>
    %57 = tpu.reciprocal %56 {approx = true} : vector<16x1xf32> -> vector<16x1xf32>
    %58 = vector.broadcast %57 : vector<16x1xf32> to vector<16x16xf32>
    %59 = arith.mulf %54, %58 : vector<16x16xf32>
    %60 = vector.extract_strided_slice %9 {offsets = [0, 128], sizes = [16, 128], strides = [1, 1]} : vector<16x512xf32> to vector<16x128xf32>
    %cst_25 = arith.constant dense<0.000000e+00> : vector<16x128xf32>
    %61 = tpu.matmul %59, %60, %cst_25 {dimension_numbers = #tpu.dot_dimension_numbers<[1], [0], [0], [1], [0, 0, 1, 1], [], []>} : vector<16x16xf32>, vector<16x128xf32>, vector<16x128xf32> -> vector<16x128xf32>
    %62 = arith.addf %38, %61 : vector<16x128xf32>
    %63 = vector.extract_strided_slice %13 {offsets = [0, 2], sizes = [16, 1], strides = [1, 1]} : vector<16x4xf32> to vector<16x1xf32>
    %64 = vector.extract_strided_slice %15 {offsets = [2, 0], sizes = [1, 16], strides = [1, 1]} : vector<4x16xf32> to vector<1x16xf32>
    %65 = vector.broadcast %63 : vector<16x1xf32> to vector<16x16xf32>
    %66 = vector.broadcast %64 : vector<1x16xf32> to vector<16x16xf32>
    %67 = arith.addf %65, %66 : vector<16x16xf32>
    %cst_26 = arith.constant 0.000000e+00 : f32
    %68 = vector.broadcast %cst_26 : f32 to vector<16x16xf32>
    %69 = arith.cmpf oge, %67, %68 : vector<16x16xf32>
    %cst_27 = arith.constant 2.000000e-01 : f32
    %70 = vector.broadcast %cst_27 : f32 to vector<16x16xf32>
    %71 = arith.mulf %70, %67 : vector<16x16xf32>
    %72 = arith.select %69, %67, %71 : vector<16x16xi1>, vector<16x16xf32>
    %73 = arith.addf %72, %6 : vector<16x16xf32>
    %cst_28 = arith.constant dense<0xFF800000> : vector<16xf32>
    %74 = vector.multi_reduction <maximumf>, %73, %cst_28 [1] : vector<16x16xf32> to vector<16xf32>
    %75 = vector.shape_cast %74 : vector<16xf32> to vector<16x1xf32>
    %76 = vector.broadcast %75 : vector<16x1xf32> to vector<16x16xf32>
    %77 = arith.subf %73, %76 : vector<16x16xf32>
    %78 = math.exp %77 : vector<16x16xf32>
    %cst_29 = arith.constant dense<0.000000e+00> : vector<16xf32>
    %79 = vector.multi_reduction <add>, %78, %cst_29 [1] : vector<16x16xf32> to vector<16xf32>
    %80 = vector.shape_cast %79 : vector<16xf32> to vector<16x1xf32>
    %81 = tpu.reciprocal %80 {approx = true} : vector<16x1xf32> -> vector<16x1xf32>
    %82 = vector.broadcast %81 : vector<16x1xf32> to vector<16x16xf32>
    %83 = arith.mulf %78, %82 : vector<16x16xf32>
    %84 = vector.extract_strided_slice %9 {offsets = [0, 256], sizes = [16, 128], strides = [1, 1]} : vector<16x512xf32> to vector<16x128xf32>
    %cst_30 = arith.constant dense<0.000000e+00> : vector<16x128xf32>
    %85 = tpu.matmul %83, %84, %cst_30 {dimension_numbers = #tpu.dot_dimension_numbers<[1], [0], [0], [1], [0, 0, 1, 1], [], []>} : vector<16x16xf32>, vector<16x128xf32>, vector<16x128xf32> -> vector<16x128xf32>
    %86 = arith.addf %62, %85 : vector<16x128xf32>
    %87 = vector.extract_strided_slice %13 {offsets = [0, 3], sizes = [16, 1], strides = [1, 1]} : vector<16x4xf32> to vector<16x1xf32>
    %88 = vector.extract_strided_slice %15 {offsets = [3, 0], sizes = [1, 16], strides = [1, 1]} : vector<4x16xf32> to vector<1x16xf32>
    %89 = vector.broadcast %87 : vector<16x1xf32> to vector<16x16xf32>
    %90 = vector.broadcast %88 : vector<1x16xf32> to vector<16x16xf32>
    %91 = arith.addf %89, %90 : vector<16x16xf32>
    %cst_31 = arith.constant 0.000000e+00 : f32
    %92 = vector.broadcast %cst_31 : f32 to vector<16x16xf32>
    %93 = arith.cmpf oge, %91, %92 : vector<16x16xf32>
    %cst_32 = arith.constant 2.000000e-01 : f32
    %94 = vector.broadcast %cst_32 : f32 to vector<16x16xf32>
    %95 = arith.mulf %94, %91 : vector<16x16xf32>
    %96 = arith.select %93, %91, %95 : vector<16x16xi1>, vector<16x16xf32>
    %97 = arith.addf %96, %6 : vector<16x16xf32>
    %cst_33 = arith.constant dense<0xFF800000> : vector<16xf32>
    %98 = vector.multi_reduction <maximumf>, %97, %cst_33 [1] : vector<16x16xf32> to vector<16xf32>
    %99 = vector.shape_cast %98 : vector<16xf32> to vector<16x1xf32>
    %100 = vector.broadcast %99 : vector<16x1xf32> to vector<16x16xf32>
    %101 = arith.subf %97, %100 : vector<16x16xf32>
    %102 = math.exp %101 : vector<16x16xf32>
    %cst_34 = arith.constant dense<0.000000e+00> : vector<16xf32>
    %103 = vector.multi_reduction <add>, %102, %cst_34 [1] : vector<16x16xf32> to vector<16xf32>
    %104 = vector.shape_cast %103 : vector<16xf32> to vector<16x1xf32>
    %105 = tpu.reciprocal %104 {approx = true} : vector<16x1xf32> -> vector<16x1xf32>
    %106 = vector.broadcast %105 : vector<16x1xf32> to vector<16x16xf32>
    %107 = arith.mulf %102, %106 : vector<16x16xf32>
    %108 = vector.extract_strided_slice %9 {offsets = [0, 384], sizes = [16, 128], strides = [1, 1]} : vector<16x512xf32> to vector<16x128xf32>
    %cst_35 = arith.constant dense<0.000000e+00> : vector<16x128xf32>
    %109 = tpu.matmul %107, %108, %cst_35 {dimension_numbers = #tpu.dot_dimension_numbers<[1], [0], [0], [1], [0, 0, 1, 1], [], []>} : vector<16x16xf32>, vector<16x128xf32>, vector<16x128xf32> -> vector<16x128xf32>
    %110 = arith.addf %86, %109 : vector<16x128xf32>
    %cst_36 = arith.constant 2.500000e-01 : f32
    %111 = vector.broadcast %cst_36 : f32 to vector<16x128xf32>
    %112 = arith.mulf %110, %111 : vector<16x128xf32>
    %c0_37 = arith.constant 0 : index
    %c0_38 = arith.constant 0 : index
    %113 = vector.load %arg11[%c0_37, %c0_38] : memref<1x128xf32, #tpu.memory_space<vmem>>, vector<1x128xf32>
    %114 = vector.broadcast %113 : vector<1x128xf32> to vector<16x128xf32>
    %115 = arith.addf %112, %114 : vector<16x128xf32>
    %cst_39 = arith.constant 0.000000e+00 : f32
    %116 = vector.broadcast %cst_39 : f32 to vector<16x128xf32>
    %117 = arith.maximumf %115, %116 : vector<16x128xf32>
    %c0_40 = arith.constant 0 : index
    %c0_41 = arith.constant 0 : index
    %118 = vector.load %arg12[%c0_40, %c0_41] : memref<128x512xf32, #tpu.memory_space<vmem>>, vector<128x512xf32>
    %cst_42 = arith.constant dense<0.000000e+00> : vector<16x512xf32>
    %119 = tpu.matmul %117, %118, %cst_42 {dimension_numbers = #tpu.dot_dimension_numbers<[1], [0], [0], [1], [0, 0, 1, 1], [], []>} : vector<16x128xf32>, vector<128x512xf32>, vector<16x512xf32> -> vector<16x512xf32>
    %c0_43 = arith.constant 0 : index
    %c0_44 = arith.constant 0 : index
    %120 = vector.load %arg13[%c0_43, %c0_44] : memref<1x512xf32, #tpu.memory_space<vmem>>, vector<1x512xf32>
    %121 = vector.broadcast %120 : vector<1x512xf32> to vector<16x512xf32>
    %122 = arith.mulf %119, %121 : vector<16x512xf32>
    %cst_45 = arith.constant dense<0.000000e+00> : vector<16x4xf32>
    %123 = tpu.matmul %122, %7, %cst_45 {dimension_numbers = #tpu.dot_dimension_numbers<[1], [0], [0], [1], [0, 0, 1, 1], [], []>} : vector<16x512xf32>, vector<512x4xf32>, vector<16x4xf32> -> vector<16x4xf32>
    %c0_46 = arith.constant 0 : index
    %c0_47 = arith.constant 0 : index
    %124 = vector.load %arg14[%c0_46, %c0_47] : memref<4x512xf32, #tpu.memory_space<vmem>>, vector<4x512xf32>
    %cst_48 = arith.constant dense<0.000000e+00> : vector<4x16xf32>
    %125 = tpu.matmul %124, %119, %cst_48 {dimension_numbers = #tpu.dot_dimension_numbers<[1], [1], [0], [0], [0, 0, 1, 0], [], []>} : vector<4x512xf32>, vector<16x512xf32>, vector<4x16xf32> -> vector<4x16xf32>
    %126 = vector.extract_strided_slice %123 {offsets = [0, 0], sizes = [16, 1], strides = [1, 1]} : vector<16x4xf32> to vector<16x1xf32>
    %127 = vector.extract_strided_slice %125 {offsets = [0, 0], sizes = [1, 16], strides = [1, 1]} : vector<4x16xf32> to vector<1x16xf32>
    %128 = vector.broadcast %126 : vector<16x1xf32> to vector<16x16xf32>
    %129 = vector.broadcast %127 : vector<1x16xf32> to vector<16x16xf32>
    %130 = arith.addf %128, %129 : vector<16x16xf32>
    %cst_49 = arith.constant 0.000000e+00 : f32
    %131 = vector.broadcast %cst_49 : f32 to vector<16x16xf32>
    %132 = arith.cmpf oge, %130, %131 : vector<16x16xf32>
    %cst_50 = arith.constant 2.000000e-01 : f32
    %133 = vector.broadcast %cst_50 : f32 to vector<16x16xf32>
    %134 = arith.mulf %133, %130 : vector<16x16xf32>
    %135 = arith.select %132, %130, %134 : vector<16x16xi1>, vector<16x16xf32>
    %136 = arith.addf %135, %6 : vector<16x16xf32>
    %cst_51 = arith.constant dense<0xFF800000> : vector<16xf32>
    %137 = vector.multi_reduction <maximumf>, %136, %cst_51 [1] : vector<16x16xf32> to vector<16xf32>
    %138 = vector.shape_cast %137 : vector<16xf32> to vector<16x1xf32>
    %139 = vector.broadcast %138 : vector<16x1xf32> to vector<16x16xf32>
    %140 = arith.subf %136, %139 : vector<16x16xf32>
    %141 = math.exp %140 : vector<16x16xf32>
    %cst_52 = arith.constant dense<0.000000e+00> : vector<16xf32>
    %142 = vector.multi_reduction <add>, %141, %cst_52 [1] : vector<16x16xf32> to vector<16xf32>
    %143 = vector.shape_cast %142 : vector<16xf32> to vector<16x1xf32>
    %144 = tpu.reciprocal %143 {approx = true} : vector<16x1xf32> -> vector<16x1xf32>
    %145 = vector.broadcast %144 : vector<16x1xf32> to vector<16x16xf32>
    %146 = arith.mulf %141, %145 : vector<16x16xf32>
    %147 = vector.extract_strided_slice %119 {offsets = [0, 0], sizes = [16, 128], strides = [1, 1]} : vector<16x512xf32> to vector<16x128xf32>
    %cst_53 = arith.constant dense<0.000000e+00> : vector<16x128xf32>
    %148 = tpu.matmul %146, %147, %cst_53 {dimension_numbers = #tpu.dot_dimension_numbers<[1], [0], [0], [1], [0, 0, 1, 1], [], []>} : vector<16x16xf32>, vector<16x128xf32>, vector<16x128xf32> -> vector<16x128xf32>
    %149 = vector.extract_strided_slice %123 {offsets = [0, 1], sizes = [16, 1], strides = [1, 1]} : vector<16x4xf32> to vector<16x1xf32>
    %150 = vector.extract_strided_slice %125 {offsets = [1, 0], sizes = [1, 16], strides = [1, 1]} : vector<4x16xf32> to vector<1x16xf32>
    %151 = vector.broadcast %149 : vector<16x1xf32> to vector<16x16xf32>
    %152 = vector.broadcast %150 : vector<1x16xf32> to vector<16x16xf32>
    %153 = arith.addf %151, %152 : vector<16x16xf32>
    %cst_54 = arith.constant 0.000000e+00 : f32
    %154 = vector.broadcast %cst_54 : f32 to vector<16x16xf32>
    %155 = arith.cmpf oge, %153, %154 : vector<16x16xf32>
    %cst_55 = arith.constant 2.000000e-01 : f32
    %156 = vector.broadcast %cst_55 : f32 to vector<16x16xf32>
    %157 = arith.mulf %156, %153 : vector<16x16xf32>
    %158 = arith.select %155, %153, %157 : vector<16x16xi1>, vector<16x16xf32>
    %159 = arith.addf %158, %6 : vector<16x16xf32>
    %cst_56 = arith.constant dense<0xFF800000> : vector<16xf32>
    %160 = vector.multi_reduction <maximumf>, %159, %cst_56 [1] : vector<16x16xf32> to vector<16xf32>
    %161 = vector.shape_cast %160 : vector<16xf32> to vector<16x1xf32>
    %162 = vector.broadcast %161 : vector<16x1xf32> to vector<16x16xf32>
    %163 = arith.subf %159, %162 : vector<16x16xf32>
    %164 = math.exp %163 : vector<16x16xf32>
    %cst_57 = arith.constant dense<0.000000e+00> : vector<16xf32>
    %165 = vector.multi_reduction <add>, %164, %cst_57 [1] : vector<16x16xf32> to vector<16xf32>
    %166 = vector.shape_cast %165 : vector<16xf32> to vector<16x1xf32>
    %167 = tpu.reciprocal %166 {approx = true} : vector<16x1xf32> -> vector<16x1xf32>
    %168 = vector.broadcast %167 : vector<16x1xf32> to vector<16x16xf32>
    %169 = arith.mulf %164, %168 : vector<16x16xf32>
    %170 = vector.extract_strided_slice %119 {offsets = [0, 128], sizes = [16, 128], strides = [1, 1]} : vector<16x512xf32> to vector<16x128xf32>
    %cst_58 = arith.constant dense<0.000000e+00> : vector<16x128xf32>
    %171 = tpu.matmul %169, %170, %cst_58 {dimension_numbers = #tpu.dot_dimension_numbers<[1], [0], [0], [1], [0, 0, 1, 1], [], []>} : vector<16x16xf32>, vector<16x128xf32>, vector<16x128xf32> -> vector<16x128xf32>
    %172 = arith.addf %148, %171 : vector<16x128xf32>
    %173 = vector.extract_strided_slice %123 {offsets = [0, 2], sizes = [16, 1], strides = [1, 1]} : vector<16x4xf32> to vector<16x1xf32>
    %174 = vector.extract_strided_slice %125 {offsets = [2, 0], sizes = [1, 16], strides = [1, 1]} : vector<4x16xf32> to vector<1x16xf32>
    %175 = vector.broadcast %173 : vector<16x1xf32> to vector<16x16xf32>
    %176 = vector.broadcast %174 : vector<1x16xf32> to vector<16x16xf32>
    %177 = arith.addf %175, %176 : vector<16x16xf32>
    %cst_59 = arith.constant 0.000000e+00 : f32
    %178 = vector.broadcast %cst_59 : f32 to vector<16x16xf32>
    %179 = arith.cmpf oge, %177, %178 : vector<16x16xf32>
    %cst_60 = arith.constant 2.000000e-01 : f32
    %180 = vector.broadcast %cst_60 : f32 to vector<16x16xf32>
    %181 = arith.mulf %180, %177 : vector<16x16xf32>
    %182 = arith.select %179, %177, %181 : vector<16x16xi1>, vector<16x16xf32>
    %183 = arith.addf %182, %6 : vector<16x16xf32>
    %cst_61 = arith.constant dense<0xFF800000> : vector<16xf32>
    %184 = vector.multi_reduction <maximumf>, %183, %cst_61 [1] : vector<16x16xf32> to vector<16xf32>
    %185 = vector.shape_cast %184 : vector<16xf32> to vector<16x1xf32>
    %186 = vector.broadcast %185 : vector<16x1xf32> to vector<16x16xf32>
    %187 = arith.subf %183, %186 : vector<16x16xf32>
    %188 = math.exp %187 : vector<16x16xf32>
    %cst_62 = arith.constant dense<0.000000e+00> : vector<16xf32>
    %189 = vector.multi_reduction <add>, %188, %cst_62 [1] : vector<16x16xf32> to vector<16xf32>
    %190 = vector.shape_cast %189 : vector<16xf32> to vector<16x1xf32>
    %191 = tpu.reciprocal %190 {approx = true} : vector<16x1xf32> -> vector<16x1xf32>
    %192 = vector.broadcast %191 : vector<16x1xf32> to vector<16x16xf32>
    %193 = arith.mulf %188, %192 : vector<16x16xf32>
    %194 = vector.extract_strided_slice %119 {offsets = [0, 256], sizes = [16, 128], strides = [1, 1]} : vector<16x512xf32> to vector<16x128xf32>
    %cst_63 = arith.constant dense<0.000000e+00> : vector<16x128xf32>
    %195 = tpu.matmul %193, %194, %cst_63 {dimension_numbers = #tpu.dot_dimension_numbers<[1], [0], [0], [1], [0, 0, 1, 1], [], []>} : vector<16x16xf32>, vector<16x128xf32>, vector<16x128xf32> -> vector<16x128xf32>
    %196 = arith.addf %172, %195 : vector<16x128xf32>
    %197 = vector.extract_strided_slice %123 {offsets = [0, 3], sizes = [16, 1], strides = [1, 1]} : vector<16x4xf32> to vector<16x1xf32>
    %198 = vector.extract_strided_slice %125 {offsets = [3, 0], sizes = [1, 16], strides = [1, 1]} : vector<4x16xf32> to vector<1x16xf32>
    %199 = vector.broadcast %197 : vector<16x1xf32> to vector<16x16xf32>
    %200 = vector.broadcast %198 : vector<1x16xf32> to vector<16x16xf32>
    %201 = arith.addf %199, %200 : vector<16x16xf32>
    %cst_64 = arith.constant 0.000000e+00 : f32
    %202 = vector.broadcast %cst_64 : f32 to vector<16x16xf32>
    %203 = arith.cmpf oge, %201, %202 : vector<16x16xf32>
    %cst_65 = arith.constant 2.000000e-01 : f32
    %204 = vector.broadcast %cst_65 : f32 to vector<16x16xf32>
    %205 = arith.mulf %204, %201 : vector<16x16xf32>
    %206 = arith.select %203, %201, %205 : vector<16x16xi1>, vector<16x16xf32>
    %207 = arith.addf %206, %6 : vector<16x16xf32>
    %cst_66 = arith.constant dense<0xFF800000> : vector<16xf32>
    %208 = vector.multi_reduction <maximumf>, %207, %cst_66 [1] : vector<16x16xf32> to vector<16xf32>
    %209 = vector.shape_cast %208 : vector<16xf32> to vector<16x1xf32>
    %210 = vector.broadcast %209 : vector<16x1xf32> to vector<16x16xf32>
    %211 = arith.subf %207, %210 : vector<16x16xf32>
    %212 = math.exp %211 : vector<16x16xf32>
    %cst_67 = arith.constant dense<0.000000e+00> : vector<16xf32>
    %213 = vector.multi_reduction <add>, %212, %cst_67 [1] : vector<16x16xf32> to vector<16xf32>
    %214 = vector.shape_cast %213 : vector<16xf32> to vector<16x1xf32>
    %215 = tpu.reciprocal %214 {approx = true} : vector<16x1xf32> -> vector<16x1xf32>
    %216 = vector.broadcast %215 : vector<16x1xf32> to vector<16x16xf32>
    %217 = arith.mulf %212, %216 : vector<16x16xf32>
    %218 = vector.extract_strided_slice %119 {offsets = [0, 384], sizes = [16, 128], strides = [1, 1]} : vector<16x512xf32> to vector<16x128xf32>
    %cst_68 = arith.constant dense<0.000000e+00> : vector<16x128xf32>
    %219 = tpu.matmul %217, %218, %cst_68 {dimension_numbers = #tpu.dot_dimension_numbers<[1], [0], [0], [1], [0, 0, 1, 1], [], []>} : vector<16x16xf32>, vector<16x128xf32>, vector<16x128xf32> -> vector<16x128xf32>
    %220 = arith.addf %196, %219 : vector<16x128xf32>
    %cst_69 = arith.constant 2.500000e-01 : f32
    %221 = vector.broadcast %cst_69 : f32 to vector<16x128xf32>
    %222 = arith.mulf %220, %221 : vector<16x128xf32>
    %c0_70 = arith.constant 0 : index
    %c0_71 = arith.constant 0 : index
    %223 = vector.load %arg15[%c0_70, %c0_71] : memref<1x128xf32, #tpu.memory_space<vmem>>, vector<1x128xf32>
    %224 = vector.broadcast %223 : vector<1x128xf32> to vector<16x128xf32>
    %225 = arith.addf %222, %224 : vector<16x128xf32>
    %cst_72 = arith.constant 0.000000e+00 : f32
    %226 = vector.broadcast %cst_72 : f32 to vector<16x128xf32>
    %227 = arith.maximumf %225, %226 : vector<16x128xf32>
    %c0_73 = arith.constant 0 : index
    %c0_74 = arith.constant 0 : index
    %228 = vector.load %arg2[%c0_73, %c0_74] : memref<4x16xf32, #tpu.memory_space<vmem>>, vector<4x16xf32>
    %cst_75 = arith.constant dense<0.000000e+00> : vector<4x128xf32>
    %229 = tpu.matmul %228, %227, %cst_75 {dimension_numbers = #tpu.dot_dimension_numbers<[1], [0], [0], [1], [0, 0, 1, 1], [], []>} : vector<4x16xf32>, vector<16x128xf32>, vector<4x128xf32> -> vector<4x128xf32>
    %230 = vector.extract_strided_slice %229 {offsets = [0, 0], sizes = [4, 32], strides = [1, 1]} : vector<4x128xf32> to vector<4x32xf32>
    %c0_76 = arith.constant 0 : index
    %c0_77 = arith.constant 0 : index
    %231 = vector.load %arg3[%c0_76, %c0_77] : memref<20x32xf32, #tpu.memory_space<vmem>>, vector<20x32xf32>
    %232 = vector.extract_strided_slice %231 {offsets = [4, 0], sizes = [16, 32], strides = [1, 1]} : vector<20x32xf32> to vector<16x32xf32>
    %c0_78 = arith.constant 0 : index
    %c0_79 = arith.constant 0 : index
    %233 = vector.load %arg46[%c0_78, %c0_79] : memref<20x32xf32, #tpu.memory_space<vmem>>, vector<16x32xf32>
    tpu.vector_store %arg46[%c0_78, %c0_79], %232 {strides = array<i32>} : memref<20x32xf32, #tpu.memory_space<vmem>>, vector<16x32xf32>,
    %c16 = arith.constant 16 : index
    %c0_80 = arith.constant 0 : index
    %234 = vector.load %arg46[%c16, %c0_80] : memref<20x32xf32, #tpu.memory_space<vmem>>, vector<4x32xf32>
    tpu.vector_store %arg46[%c16, %c0_80], %230 {strides = array<i32>} : memref<20x32xf32, #tpu.memory_space<vmem>>, vector<4x32xf32>,
    %c0_81 = arith.constant 0 : index
    %c0_82 = arith.constant 0 : index
    %235 = vector.load %arg46[%c0_81, %c0_82] : memref<20x32xf32, #tpu.memory_space<vmem>>, vector<20x32xf32>
    %c0_83 = arith.constant 0 : index
    %c0_84 = arith.constant 0 : index
    %236 = vector.load %arg4[%c0_83, %c0_84] : memref<20x32xf32, #tpu.memory_space<vmem>>, vector<20x32xf32>
    %237 = arith.addf %235, %236 : vector<20x32xf32>
    %c0_85 = arith.constant 0 : index
    %c0_86 = arith.constant 0 : index
    %238 = vector.load %arg5[%c0_85, %c0_86] : memref<20x1xf32, #tpu.memory_space<vmem>>, vector<20x1xf32>
    %c0_87 = arith.constant 0 : index
    %c0_88 = arith.constant 0 : index
    %239 = vector.load %arg6[%c0_87, %c0_88] : memref<1x20xf32, #tpu.memory_space<vmem>>, vector<1x20xf32>
    %240 = vector.broadcast %238 : vector<20x1xf32> to vector<20x20xf32>
    %241 = vector.broadcast %239 : vector<1x20xf32> to vector<20x20xf32>
    %242 = arith.cmpf oeq, %240, %241 : vector<20x20xf32>
    %cst_89 = arith.constant 0.000000e+00 : f32
    %cst_90 = arith.constant -1.000000e+09 : f32
    %243 = vector.broadcast %cst_89 : f32 to vector<20x20xf32>
    %244 = vector.broadcast %cst_90 : f32 to vector<20x20xf32>
    %245 = arith.select %242, %243, %244 : vector<20x20xi1>, vector<20x20xf32>
    %c0_91 = arith.constant 0 : index
    %c0_92 = arith.constant 0 : index
    %246 = vector.load %arg16[%c0_91, %c0_92] : memref<32x1536xf32, #tpu.memory_space<vmem>>, vector<32x1536xf32>
    %cst_93 = arith.constant dense<0.000000e+00> : vector<20x1536xf32>
    %247 = tpu.matmul %237, %246, %cst_93 {dimension_numbers = #tpu.dot_dimension_numbers<[1], [0], [0], [1], [0, 0, 1, 1], [], []>} : vector<20x32xf32>, vector<32x1536xf32>, vector<20x1536xf32> -> vector<20x1536xf32>
    %c0_94 = arith.constant 0 : index
    %c0_95 = arith.constant 0 : index
    %248 = vector.load %arg17[%c0_94, %c0_95] : memref<1x1536xf32, #tpu.memory_space<vmem>>, vector<1x1536xf32>
    %249 = vector.broadcast %248 : vector<1x1536xf32> to vector<20x1536xf32>
    %250 = arith.addf %247, %249 : vector<20x1536xf32>
    %251 = vector.extract_strided_slice %250 {offsets = [0, 0], sizes = [20, 128], strides = [1, 1]} : vector<20x1536xf32> to vector<20x128xf32>
    %252 = vector.extract_strided_slice %250 {offsets = [0, 512], sizes = [20, 128], strides = [1, 1]} : vector<20x1536xf32> to vector<20x128xf32>
    %253 = vector.extract_strided_slice %250 {offsets = [0, 1024], sizes = [20, 128], strides = [1, 1]} : vector<20x1536xf32> to vector<20x128xf32>
    %cst_96 = arith.constant dense<0.000000e+00> : vector<20x20xf32>
    %254 = tpu.matmul %251, %252, %cst_96 {dimension_numbers = #tpu.dot_dimension_numbers<[1], [1], [0], [0], [0, 0, 1, 0], [], []>} : vector<20x128xf32>, vector<20x128xf32>, vector<20x20xf32> -> vector<20x20xf32>
    %cst_97 = arith.constant 0.353553385 : f32
    %255 = vector.broadcast %cst_97 : f32 to vector<20x20xf32>
    %256 = arith.mulf %254, %255 : vector<20x20xf32>
    %257 = arith.addf %256, %245 : vector<20x20xf32>
    %cst_98 = arith.constant dense<0xFF800000> : vector<20xf32>
    %258 = vector.multi_reduction <maximumf>, %257, %cst_98 [1] : vector<20x20xf32> to vector<20xf32>
    %259 = vector.shape_cast %258 : vector<20xf32> to vector<20x1xf32>
    %260 = vector.broadcast %259 : vector<20x1xf32> to vector<20x20xf32>
    %261 = arith.subf %257, %260 : vector<20x20xf32>
    %262 = math.exp %261 : vector<20x20xf32>
    %cst_99 = arith.constant dense<0.000000e+00> : vector<20xf32>
    %263 = vector.multi_reduction <add>, %262, %cst_99 [1] : vector<20x20xf32> to vector<20xf32>
    %264 = vector.shape_cast %263 : vector<20xf32> to vector<20x1xf32>
    %265 = tpu.reciprocal %264 {approx = true} : vector<20x1xf32> -> vector<20x1xf32>
    %266 = vector.broadcast %265 : vector<20x1xf32> to vector<20x20xf32>
    %267 = arith.mulf %262, %266 : vector<20x20xf32>
    %cst_100 = arith.constant dense<0.000000e+00> : vector<20x128xf32>
    %268 = tpu.matmul %267, %253, %cst_100 {dimension_numbers = #tpu.dot_dimension_numbers<[1], [0], [0], [1], [0, 0, 1, 1], [], []>} : vector<20x20xf32>, vector<20x128xf32>, vector<20x128xf32> -> vector<20x128xf32>
    %269 = vector.extract_strided_slice %250 {offsets = [0, 128], sizes = [20, 128], strides = [1, 1]} : vector<20x1536xf32> to vector<20x128xf32>
    %270 = vector.extract_strided_slice %250 {offsets = [0, 640], sizes = [20, 128], strides = [1, 1]} : vector<20x1536xf32> to vector<20x128xf32>
    %271 = vector.extract_strided_slice %250 {offsets = [0, 1152], sizes = [20, 128], strides = [1, 1]} : vector<20x1536xf32> to vector<20x128xf32>
    %cst_101 = arith.constant dense<0.000000e+00> : vector<20x20xf32>
    %272 = tpu.matmul %269, %270, %cst_101 {dimension_numbers = #tpu.dot_dimension_numbers<[1], [1], [0], [0], [0, 0, 1, 0], [], []>} : vector<20x128xf32>, vector<20x128xf32>, vector<20x20xf32> -> vector<20x20xf32>
    %cst_102 = arith.constant 0.353553385 : f32
    %273 = vector.broadcast %cst_102 : f32 to vector<20x20xf32>
    %274 = arith.mulf %272, %273 : vector<20x20xf32>
    %275 = arith.addf %274, %245 : vector<20x20xf32>
    %cst_103 = arith.constant dense<0xFF800000> : vector<20xf32>
    %276 = vector.multi_reduction <maximumf>, %275, %cst_103 [1] : vector<20x20xf32> to vector<20xf32>
    %277 = vector.shape_cast %276 : vector<20xf32> to vector<20x1xf32>
    %278 = vector.broadcast %277 : vector<20x1xf32> to vector<20x20xf32>
    %279 = arith.subf %275, %278 : vector<20x20xf32>
    %280 = math.exp %279 : vector<20x20xf32>
    %cst_104 = arith.constant dense<0.000000e+00> : vector<20xf32>
    %281 = vector.multi_reduction <add>, %280, %cst_104 [1] : vector<20x20xf32> to vector<20xf32>
    %282 = vector.shape_cast %281 : vector<20xf32> to vector<20x1xf32>
    %283 = tpu.reciprocal %282 {approx = true} : vector<20x1xf32> -> vector<20x1xf32>
    %284 = vector.broadcast %283 : vector<20x1xf32> to vector<20x20xf32>
    %285 = arith.mulf %280, %284 : vector<20x20xf32>
    %cst_105 = arith.constant dense<0.000000e+00> : vector<20x128xf32>
    %286 = tpu.matmul %285, %271, %cst_105 {dimension_numbers = #tpu.dot_dimension_numbers<[1], [0], [0], [1], [0, 0, 1, 1], [], []>} : vector<20x20xf32>, vector<20x128xf32>, vector<20x128xf32> -> vector<20x128xf32>
    %287 = vector.extract_strided_slice %250 {offsets = [0, 256], sizes = [20, 128], strides = [1, 1]} : vector<20x1536xf32> to vector<20x128xf32>
    %288 = vector.extract_strided_slice %250 {offsets = [0, 768], sizes = [20, 128], strides = [1, 1]} : vector<20x1536xf32> to vector<20x128xf32>
    %289 = vector.extract_strided_slice %250 {offsets = [0, 1280], sizes = [20, 128], strides = [1, 1]} : vector<20x1536xf32> to vector<20x128xf32>
    %cst_106 = arith.constant dense<0.000000e+00> : vector<20x20xf32>
    %290 = tpu.matmul %287, %288, %cst_106 {dimension_numbers = #tpu.dot_dimension_numbers<[1], [1], [0], [0], [0, 0, 1, 0], [], []>} : vector<20x128xf32>, vector<20x128xf32>, vector<20x20xf32> -> vector<20x20xf32>
    %cst_107 = arith.constant 0.353553385 : f32
    %291 = vector.broadcast %cst_107 : f32 to vector<20x20xf32>
    %292 = arith.mulf %290, %291 : vector<20x20xf32>
    %293 = arith.addf %292, %245 : vector<20x20xf32>
    %cst_108 = arith.constant dense<0xFF800000> : vector<20xf32>
    %294 = vector.multi_reduction <maximumf>, %293, %cst_108 [1] : vector<20x20xf32> to vector<20xf32>
    %295 = vector.shape_cast %294 : vector<20xf32> to vector<20x1xf32>
    %296 = vector.broadcast %295 : vector<20x1xf32> to vector<20x20xf32>
    %297 = arith.subf %293, %296 : vector<20x20xf32>
    %298 = math.exp %297 : vector<20x20xf32>
    %cst_109 = arith.constant dense<0.000000e+00> : vector<20xf32>
    %299 = vector.multi_reduction <add>, %298, %cst_109 [1] : vector<20x20xf32> to vector<20xf32>
    %300 = vector.shape_cast %299 : vector<20xf32> to vector<20x1xf32>
    %301 = tpu.reciprocal %300 {approx = true} : vector<20x1xf32> -> vector<20x1xf32>
    %302 = vector.broadcast %301 : vector<20x1xf32> to vector<20x20xf32>
    %303 = arith.mulf %298, %302 : vector<20x20xf32>
    %cst_110 = arith.constant dense<0.000000e+00> : vector<20x128xf32>
    %304 = tpu.matmul %303, %289, %cst_110 {dimension_numbers = #tpu.dot_dimension_numbers<[1], [0], [0], [1], [0, 0, 1, 1], [], []>} : vector<20x20xf32>, vector<20x128xf32>, vector<20x128xf32> -> vector<20x128xf32>
    %305 = vector.extract_strided_slice %250 {offsets = [0, 384], sizes = [20, 128], strides = [1, 1]} : vector<20x1536xf32> to vector<20x128xf32>
    %306 = vector.extract_strided_slice %250 {offsets = [0, 896], sizes = [20, 128], strides = [1, 1]} : vector<20x1536xf32> to vector<20x128xf32>
    %307 = vector.extract_strided_slice %250 {offsets = [0, 1408], sizes = [20, 128], strides = [1, 1]} : vector<20x1536xf32> to vector<20x128xf32>
    %cst_111 = arith.constant dense<0.000000e+00> : vector<20x20xf32>
    %308 = tpu.matmul %305, %306, %cst_111 {dimension_numbers = #tpu.dot_dimension_numbers<[1], [1], [0], [0], [0, 0, 1, 0], [], []>} : vector<20x128xf32>, vector<20x128xf32>, vector<20x20xf32> -> vector<20x20xf32>
    %cst_112 = arith.constant 0.353553385 : f32
    %309 = vector.broadcast %cst_112 : f32 to vector<20x20xf32>
    %310 = arith.mulf %308, %309 : vector<20x20xf32>
    %311 = arith.addf %310, %245 : vector<20x20xf32>
    %cst_113 = arith.constant dense<0xFF800000> : vector<20xf32>
    %312 = vector.multi_reduction <maximumf>, %311, %cst_113 [1] : vector<20x20xf32> to vector<20xf32>
    %313 = vector.shape_cast %312 : vector<20xf32> to vector<20x1xf32>
    %314 = vector.broadcast %313 : vector<20x1xf32> to vector<20x20xf32>
    %315 = arith.subf %311, %314 : vector<20x20xf32>
    %316 = math.exp %315 : vector<20x20xf32>
    %cst_114 = arith.constant dense<0.000000e+00> : vector<20xf32>
    %317 = vector.multi_reduction <add>, %316, %cst_114 [1] : vector<20x20xf32> to vector<20xf32>
    %318 = vector.shape_cast %317 : vector<20xf32> to vector<20x1xf32>
    %319 = tpu.reciprocal %318 {approx = true} : vector<20x1xf32> -> vector<20x1xf32>
    %320 = vector.broadcast %319 : vector<20x1xf32> to vector<20x20xf32>
    %321 = arith.mulf %316, %320 : vector<20x20xf32>
    %cst_115 = arith.constant dense<0.000000e+00> : vector<20x128xf32>
    %322 = tpu.matmul %321, %307, %cst_115 {dimension_numbers = #tpu.dot_dimension_numbers<[1], [0], [0], [1], [0, 0, 1, 1], [], []>} : vector<20x20xf32>, vector<20x128xf32>, vector<20x128xf32> -> vector<20x128xf32>
    %323 = tpu.concatenate %268, %286, %304, %322 in 1 : vector<20x128xf32>, vector<20x128xf32>, vector<20x128xf32>, vector<20x128xf32> -> vector<20x512xf32>
    %c0_116 = arith.constant 0 : index
    %c0_117 = arith.constant 0 : index
    %324 = vector.load %arg18[%c0_116, %c0_117] : memref<512x32xf32, #tpu.memory_space<vmem>>, vector<512x32xf32>
    %cst_118 = arith.constant dense<0.000000e+00> : vector<20x32xf32>
    %325 = tpu.matmul %323, %324, %cst_118 {dimension_numbers = #tpu.dot_dimension_numbers<[1], [0], [0], [1], [0, 0, 1, 1], [], []>} : vector<20x512xf32>, vector<512x32xf32>, vector<20x32xf32> -> vector<20x32xf32>
    %c0_119 = arith.constant 0 : index
    %c0_120 = arith.constant 0 : index
    %326 = vector.load %arg19[%c0_119, %c0_120] : memref<1x32xf32, #tpu.memory_space<vmem>>, vector<1x32xf32>
    %327 = vector.broadcast %326 : vector<1x32xf32> to vector<20x32xf32>
    %328 = arith.addf %325, %327 : vector<20x32xf32>
    %329 = arith.addf %237, %328 : vector<20x32xf32>
    %c0_121 = arith.constant 0 : index
    %c0_122 = arith.constant 0 : index
    %330 = vector.load %arg20[%c0_121, %c0_122] : memref<1x32xf32, #tpu.memory_space<vmem>>, vector<1x32xf32>
    %c0_123 = arith.constant 0 : index
    %c0_124 = arith.constant 0 : index
    %331 = vector.load %arg21[%c0_123, %c0_124] : memref<1x32xf32, #tpu.memory_space<vmem>>, vector<1x32xf32>
    %cst_125 = arith.constant dense<0.000000e+00> : vector<20xf32>
    %332 = vector.multi_reduction <add>, %329, %cst_125 [1] : vector<20x32xf32> to vector<20xf32>
    %333 = vector.shape_cast %332 : vector<20xf32> to vector<20x1xf32>
    %cst_126 = arith.constant 3.200000e+01 : f32
    %334 = vector.broadcast %cst_126 : f32 to vector<20x1xf32>
    %335 = arith.divf %333, %334 : vector<20x1xf32>
    %336 = vector.broadcast %335 : vector<20x1xf32> to vector<20x32xf32>
    %337 = arith.subf %329, %336 : vector<20x32xf32>
    %338 = arith.mulf %337, %337 : vector<20x32xf32>
    %cst_127 = arith.constant dense<0.000000e+00> : vector<20xf32>
    %339 = vector.multi_reduction <add>, %338, %cst_127 [1] : vector<20x32xf32> to vector<20xf32>
    %340 = vector.shape_cast %339 : vector<20xf32> to vector<20x1xf32>
    %cst_128 = arith.constant 3.200000e+01 : f32
    %341 = vector.broadcast %cst_128 : f32 to vector<20x1xf32>
    %342 = arith.divf %340, %341 : vector<20x1xf32>
    %343 = vector.broadcast %335 : vector<20x1xf32> to vector<20x32xf32>
    %344 = arith.subf %329, %343 : vector<20x32xf32>
    %cst_129 = arith.constant 9.99999974E-6 : f32
    %345 = vector.broadcast %cst_129 : f32 to vector<20x1xf32>
    %346 = arith.addf %342, %345 : vector<20x1xf32>
    %347 = math.rsqrt %346 : vector<20x1xf32>
    %348 = vector.broadcast %347 : vector<20x1xf32> to vector<20x32xf32>
    %349 = arith.mulf %344, %348 : vector<20x32xf32>
    %350 = vector.broadcast %330 : vector<1x32xf32> to vector<20x32xf32>
    %351 = arith.mulf %349, %350 : vector<20x32xf32>
    %352 = vector.broadcast %331 : vector<1x32xf32> to vector<20x32xf32>
    %353 = arith.addf %351, %352 : vector<20x32xf32>
    %c0_130 = arith.constant 0 : index
    %c0_131 = arith.constant 0 : index
    %354 = vector.load %arg22[%c0_130, %c0_131] : memref<32x128xf32, #tpu.memory_space<vmem>>, vector<32x128xf32>
    %cst_132 = arith.constant dense<0.000000e+00> : vector<20x128xf32>
    %355 = tpu.matmul %353, %354, %cst_132 {dimension_numbers = #tpu.dot_dimension_numbers<[1], [0], [0], [1], [0, 0, 1, 1], [], []>} : vector<20x32xf32>, vector<32x128xf32>, vector<20x128xf32> -> vector<20x128xf32>
    %c0_133 = arith.constant 0 : index
    %c0_134 = arith.constant 0 : index
    %356 = vector.load %arg23[%c0_133, %c0_134] : memref<1x128xf32, #tpu.memory_space<vmem>>, vector<1x128xf32>
    %357 = vector.broadcast %356 : vector<1x128xf32> to vector<20x128xf32>
    %358 = arith.addf %355, %357 : vector<20x128xf32>
    %cst_135 = arith.constant 0.000000e+00 : f32
    %359 = vector.broadcast %cst_135 : f32 to vector<20x128xf32>
    %360 = arith.maximumf %358, %359 : vector<20x128xf32>
    %c0_136 = arith.constant 0 : index
    %c0_137 = arith.constant 0 : index
    %361 = vector.load %arg24[%c0_136, %c0_137] : memref<128x32xf32, #tpu.memory_space<vmem>>, vector<128x32xf32>
    %cst_138 = arith.constant dense<0.000000e+00> : vector<20x32xf32>
    %362 = tpu.matmul %360, %361, %cst_138 {dimension_numbers = #tpu.dot_dimension_numbers<[1], [0], [0], [1], [0, 0, 1, 1], [], []>} : vector<20x128xf32>, vector<128x32xf32>, vector<20x32xf32> -> vector<20x32xf32>
    %c0_139 = arith.constant 0 : index
    %c0_140 = arith.constant 0 : index
    %363 = vector.load %arg25[%c0_139, %c0_140] : memref<1x32xf32, #tpu.memory_space<vmem>>, vector<1x32xf32>
    %364 = vector.broadcast %363 : vector<1x32xf32> to vector<20x32xf32>
    %365 = arith.addf %362, %364 : vector<20x32xf32>
    %366 = arith.addf %353, %365 : vector<20x32xf32>
    %c0_141 = arith.constant 0 : index
    %c0_142 = arith.constant 0 : index
    %367 = vector.load %arg26[%c0_141, %c0_142] : memref<1x32xf32, #tpu.memory_space<vmem>>, vector<1x32xf32>
    %c0_143 = arith.constant 0 : index
    %c0_144 = arith.constant 0 : index
    %368 = vector.load %arg27[%c0_143, %c0_144] : memref<1x32xf32, #tpu.memory_space<vmem>>, vector<1x32xf32>
    %cst_145 = arith.constant dense<0.000000e+00> : vector<20xf32>
    %369 = vector.multi_reduction <add>, %366, %cst_145 [1] : vector<20x32xf32> to vector<20xf32>
    %370 = vector.shape_cast %369 : vector<20xf32> to vector<20x1xf32>
    %cst_146 = arith.constant 3.200000e+01 : f32
    %371 = vector.broadcast %cst_146 : f32 to vector<20x1xf32>
    %372 = arith.divf %370, %371 : vector<20x1xf32>
    %373 = vector.broadcast %372 : vector<20x1xf32> to vector<20x32xf32>
    %374 = arith.subf %366, %373 : vector<20x32xf32>
    %375 = arith.mulf %374, %374 : vector<20x32xf32>
    %cst_147 = arith.constant dense<0.000000e+00> : vector<20xf32>
    %376 = vector.multi_reduction <add>, %375, %cst_147 [1] : vector<20x32xf32> to vector<20xf32>
    %377 = vector.shape_cast %376 : vector<20xf32> to vector<20x1xf32>
    %cst_148 = arith.constant 3.200000e+01 : f32
    %378 = vector.broadcast %cst_148 : f32 to vector<20x1xf32>
    %379 = arith.divf %377, %378 : vector<20x1xf32>
    %380 = vector.broadcast %372 : vector<20x1xf32> to vector<20x32xf32>
    %381 = arith.subf %366, %380 : vector<20x32xf32>
    %cst_149 = arith.constant 9.99999974E-6 : f32
    %382 = vector.broadcast %cst_149 : f32 to vector<20x1xf32>
    %383 = arith.addf %379, %382 : vector<20x1xf32>
    %384 = math.rsqrt %383 : vector<20x1xf32>
    %385 = vector.broadcast %384 : vector<20x1xf32> to vector<20x32xf32>
    %386 = arith.mulf %381, %385 : vector<20x32xf32>
    %387 = vector.broadcast %367 : vector<1x32xf32> to vector<20x32xf32>
    %388 = arith.mulf %386, %387 : vector<20x32xf32>
    %389 = vector.broadcast %368 : vector<1x32xf32> to vector<20x32xf32>
    %390 = arith.addf %388, %389 : vector<20x32xf32>
    %c0_150 = arith.constant 0 : index
    %c0_151 = arith.constant 0 : index
    %391 = vector.load %arg28[%c0_150, %c0_151] : memref<32x1536xf32, #tpu.memory_space<vmem>>, vector<32x1536xf32>
    %cst_152 = arith.constant dense<0.000000e+00> : vector<20x1536xf32>
    %392 = tpu.matmul %390, %391, %cst_152 {dimension_numbers = #tpu.dot_dimension_numbers<[1], [0], [0], [1], [0, 0, 1, 1], [], []>} : vector<20x32xf32>, vector<32x1536xf32>, vector<20x1536xf32> -> vector<20x1536xf32>
    %c0_153 = arith.constant 0 : index
    %c0_154 = arith.constant 0 : index
    %393 = vector.load %arg29[%c0_153, %c0_154] : memref<1x1536xf32, #tpu.memory_space<vmem>>, vector<1x1536xf32>
    %394 = vector.broadcast %393 : vector<1x1536xf32> to vector<20x1536xf32>
    %395 = arith.addf %392, %394 : vector<20x1536xf32>
    %396 = vector.extract_strided_slice %395 {offsets = [0, 0], sizes = [20, 128], strides = [1, 1]} : vector<20x1536xf32> to vector<20x128xf32>
    %397 = vector.extract_strided_slice %395 {offsets = [0, 512], sizes = [20, 128], strides = [1, 1]} : vector<20x1536xf32> to vector<20x128xf32>
    %398 = vector.extract_strided_slice %395 {offsets = [0, 1024], sizes = [20, 128], strides = [1, 1]} : vector<20x1536xf32> to vector<20x128xf32>
    %cst_155 = arith.constant dense<0.000000e+00> : vector<20x20xf32>
    %399 = tpu.matmul %396, %397, %cst_155 {dimension_numbers = #tpu.dot_dimension_numbers<[1], [1], [0], [0], [0, 0, 1, 0], [], []>} : vector<20x128xf32>, vector<20x128xf32>, vector<20x20xf32> -> vector<20x20xf32>
    %cst_156 = arith.constant 0.353553385 : f32
    %400 = vector.broadcast %cst_156 : f32 to vector<20x20xf32>
    %401 = arith.mulf %399, %400 : vector<20x20xf32>
    %402 = arith.addf %401, %245 : vector<20x20xf32>
    %cst_157 = arith.constant dense<0xFF800000> : vector<20xf32>
    %403 = vector.multi_reduction <maximumf>, %402, %cst_157 [1] : vector<20x20xf32> to vector<20xf32>
    %404 = vector.shape_cast %403 : vector<20xf32> to vector<20x1xf32>
    %405 = vector.broadcast %404 : vector<20x1xf32> to vector<20x20xf32>
    %406 = arith.subf %402, %405 : vector<20x20xf32>
    %407 = math.exp %406 : vector<20x20xf32>
    %cst_158 = arith.constant dense<0.000000e+00> : vector<20xf32>
    %408 = vector.multi_reduction <add>, %407, %cst_158 [1] : vector<20x20xf32> to vector<20xf32>
    %409 = vector.shape_cast %408 : vector<20xf32> to vector<20x1xf32>
    %410 = tpu.reciprocal %409 {approx = true} : vector<20x1xf32> -> vector<20x1xf32>
    %411 = vector.broadcast %410 : vector<20x1xf32> to vector<20x20xf32>
    %412 = arith.mulf %407, %411 : vector<20x20xf32>
    %cst_159 = arith.constant dense<0.000000e+00> : vector<20x128xf32>
    %413 = tpu.matmul %412, %398, %cst_159 {dimension_numbers = #tpu.dot_dimension_numbers<[1], [0], [0], [1], [0, 0, 1, 1], [], []>} : vector<20x20xf32>, vector<20x128xf32>, vector<20x128xf32> -> vector<20x128xf32>
    %414 = vector.extract_strided_slice %395 {offsets = [0, 128], sizes = [20, 128], strides = [1, 1]} : vector<20x1536xf32> to vector<20x128xf32>
    %415 = vector.extract_strided_slice %395 {offsets = [0, 640], sizes = [20, 128], strides = [1, 1]} : vector<20x1536xf32> to vector<20x128xf32>
    %416 = vector.extract_strided_slice %395 {offsets = [0, 1152], sizes = [20, 128], strides = [1, 1]} : vector<20x1536xf32> to vector<20x128xf32>
    %cst_160 = arith.constant dense<0.000000e+00> : vector<20x20xf32>
    %417 = tpu.matmul %414, %415, %cst_160 {dimension_numbers = #tpu.dot_dimension_numbers<[1], [1], [0], [0], [0, 0, 1, 0], [], []>} : vector<20x128xf32>, vector<20x128xf32>, vector<20x20xf32> -> vector<20x20xf32>
    %cst_161 = arith.constant 0.353553385 : f32
    %418 = vector.broadcast %cst_161 : f32 to vector<20x20xf32>
    %419 = arith.mulf %417, %418 : vector<20x20xf32>
    %420 = arith.addf %419, %245 : vector<20x20xf32>
    %cst_162 = arith.constant dense<0xFF800000> : vector<20xf32>
    %421 = vector.multi_reduction <maximumf>, %420, %cst_162 [1] : vector<20x20xf32> to vector<20xf32>
    %422 = vector.shape_cast %421 : vector<20xf32> to vector<20x1xf32>
    %423 = vector.broadcast %422 : vector<20x1xf32> to vector<20x20xf32>
    %424 = arith.subf %420, %423 : vector<20x20xf32>
    %425 = math.exp %424 : vector<20x20xf32>
    %cst_163 = arith.constant dense<0.000000e+00> : vector<20xf32>
    %426 = vector.multi_reduction <add>, %425, %cst_163 [1] : vector<20x20xf32> to vector<20xf32>
    %427 = vector.shape_cast %426 : vector<20xf32> to vector<20x1xf32>
    %428 = tpu.reciprocal %427 {approx = true} : vector<20x1xf32> -> vector<20x1xf32>
    %429 = vector.broadcast %428 : vector<20x1xf32> to vector<20x20xf32>
    %430 = arith.mulf %425, %429 : vector<20x20xf32>
    %cst_164 = arith.constant dense<0.000000e+00> : vector<20x128xf32>
    %431 = tpu.matmul %430, %416, %cst_164 {dimension_numbers = #tpu.dot_dimension_numbers<[1], [0], [0], [1], [0, 0, 1, 1], [], []>} : vector<20x20xf32>, vector<20x128xf32>, vector<20x128xf32> -> vector<20x128xf32>
    %432 = vector.extract_strided_slice %395 {offsets = [0, 256], sizes = [20, 128], strides = [1, 1]} : vector<20x1536xf32> to vector<20x128xf32>
    %433 = vector.extract_strided_slice %395 {offsets = [0, 768], sizes = [20, 128], strides = [1, 1]} : vector<20x1536xf32> to vector<20x128xf32>
    %434 = vector.extract_strided_slice %395 {offsets = [0, 1280], sizes = [20, 128], strides = [1, 1]} : vector<20x1536xf32> to vector<20x128xf32>
    %cst_165 = arith.constant dense<0.000000e+00> : vector<20x20xf32>
    %435 = tpu.matmul %432, %433, %cst_165 {dimension_numbers = #tpu.dot_dimension_numbers<[1], [1], [0], [0], [0, 0, 1, 0], [], []>} : vector<20x128xf32>, vector<20x128xf32>, vector<20x20xf32> -> vector<20x20xf32>
    %cst_166 = arith.constant 0.353553385 : f32
    %436 = vector.broadcast %cst_166 : f32 to vector<20x20xf32>
    %437 = arith.mulf %435, %436 : vector<20x20xf32>
    %438 = arith.addf %437, %245 : vector<20x20xf32>
    %cst_167 = arith.constant dense<0xFF800000> : vector<20xf32>
    %439 = vector.multi_reduction <maximumf>, %438, %cst_167 [1] : vector<20x20xf32> to vector<20xf32>
    %440 = vector.shape_cast %439 : vector<20xf32> to vector<20x1xf32>
    %441 = vector.broadcast %440 : vector<20x1xf32> to vector<20x20xf32>
    %442 = arith.subf %438, %441 : vector<20x20xf32>
    %443 = math.exp %442 : vector<20x20xf32>
    %cst_168 = arith.constant dense<0.000000e+00> : vector<20xf32>
    %444 = vector.multi_reduction <add>, %443, %cst_168 [1] : vector<20x20xf32> to vector<20xf32>
    %445 = vector.shape_cast %444 : vector<20xf32> to vector<20x1xf32>
    %446 = tpu.reciprocal %445 {approx = true} : vector<20x1xf32> -> vector<20x1xf32>
    %447 = vector.broadcast %446 : vector<20x1xf32> to vector<20x20xf32>
    %448 = arith.mulf %443, %447 : vector<20x20xf32>
    %cst_169 = arith.constant dense<0.000000e+00> : vector<20x128xf32>
    %449 = tpu.matmul %448, %434, %cst_169 {dimension_numbers = #tpu.dot_dimension_numbers<[1], [0], [0], [1], [0, 0, 1, 1], [], []>} : vector<20x20xf32>, vector<20x128xf32>, vector<20x128xf32> -> vector<20x128xf32>
    %450 = vector.extract_strided_slice %395 {offsets = [0, 384], sizes = [20, 128], strides = [1, 1]} : vector<20x1536xf32> to vector<20x128xf32>
    %451 = vector.extract_strided_slice %395 {offsets = [0, 896], sizes = [20, 128], strides = [1, 1]} : vector<20x1536xf32> to vector<20x128xf32>
    %452 = vector.extract_strided_slice %395 {offsets = [0, 1408], sizes = [20, 128], strides = [1, 1]} : vector<20x1536xf32> to vector<20x128xf32>
    %cst_170 = arith.constant dense<0.000000e+00> : vector<20x20xf32>
    %453 = tpu.matmul %450, %451, %cst_170 {dimension_numbers = #tpu.dot_dimension_numbers<[1], [1], [0], [0], [0, 0, 1, 0], [], []>} : vector<20x128xf32>, vector<20x128xf32>, vector<20x20xf32> -> vector<20x20xf32>
    %cst_171 = arith.constant 0.353553385 : f32
    %454 = vector.broadcast %cst_171 : f32 to vector<20x20xf32>
    %455 = arith.mulf %453, %454 : vector<20x20xf32>
    %456 = arith.addf %455, %245 : vector<20x20xf32>
    %cst_172 = arith.constant dense<0xFF800000> : vector<20xf32>
    %457 = vector.multi_reduction <maximumf>, %456, %cst_172 [1] : vector<20x20xf32> to vector<20xf32>
    %458 = vector.shape_cast %457 : vector<20xf32> to vector<20x1xf32>
    %459 = vector.broadcast %458 : vector<20x1xf32> to vector<20x20xf32>
    %460 = arith.subf %456, %459 : vector<20x20xf32>
    %461 = math.exp %460 : vector<20x20xf32>
    %cst_173 = arith.constant dense<0.000000e+00> : vector<20xf32>
    %462 = vector.multi_reduction <add>, %461, %cst_173 [1] : vector<20x20xf32> to vector<20xf32>
    %463 = vector.shape_cast %462 : vector<20xf32> to vector<20x1xf32>
    %464 = tpu.reciprocal %463 {approx = true} : vector<20x1xf32> -> vector<20x1xf32>
    %465 = vector.broadcast %464 : vector<20x1xf32> to vector<20x20xf32>
    %466 = arith.mulf %461, %465 : vector<20x20xf32>
    %cst_174 = arith.constant dense<0.000000e+00> : vector<20x128xf32>
    %467 = tpu.matmul %466, %452, %cst_174 {dimension_numbers = #tpu.dot_dimension_numbers<[1], [0], [0], [1], [0, 0, 1, 1], [], []>} : vector<20x20xf32>, vector<20x128xf32>, vector<20x128xf32> -> vector<20x128xf32>
    %468 = tpu.concatenate %413, %431, %449, %467 in 1 : vector<20x128xf32>, vector<20x128xf32>, vector<20x128xf32>, vector<20x128xf32> -> vector<20x512xf32>
    %c0_175 = arith.constant 0 : index
    %c0_176 = arith.constant 0 : index
    %469 = vector.load %arg30[%c0_175, %c0_176] : memref<512x32xf32, #tpu.memory_space<vmem>>, vector<512x32xf32>
    %cst_177 = arith.constant dense<0.000000e+00> : vector<20x32xf32>
    %470 = tpu.matmul %468, %469, %cst_177 {dimension_numbers = #tpu.dot_dimension_numbers<[1], [0], [0], [1], [0, 0, 1, 1], [], []>} : vector<20x512xf32>, vector<512x32xf32>, vector<20x32xf32> -> vector<20x32xf32>
    %c0_178 = arith.constant 0 : index
    %c0_179 = arith.constant 0 : index
    %471 = vector.load %arg31[%c0_178, %c0_179] : memref<1x32xf32, #tpu.memory_space<vmem>>, vector<1x32xf32>
    %472 = vector.broadcast %471 : vector<1x32xf32> to vector<20x32xf32>
    %473 = arith.addf %470, %472 : vector<20x32xf32>
    %474 = arith.addf %390, %473 : vector<20x32xf32>
    %c0_180 = arith.constant 0 : index
    %c0_181 = arith.constant 0 : index
    %475 = vector.load %arg32[%c0_180, %c0_181] : memref<1x32xf32, #tpu.memory_space<vmem>>, vector<1x32xf32>
    %c0_182 = arith.constant 0 : index
    %c0_183 = arith.constant 0 : index
    %476 = vector.load %arg33[%c0_182, %c0_183] : memref<1x32xf32, #tpu.memory_space<vmem>>, vector<1x32xf32>
    %cst_184 = arith.constant dense<0.000000e+00> : vector<20xf32>
    %477 = vector.multi_reduction <add>, %474, %cst_184 [1] : vector<20x32xf32> to vector<20xf32>
    %478 = vector.shape_cast %477 : vector<20xf32> to vector<20x1xf32>
    %cst_185 = arith.constant 3.200000e+01 : f32
    %479 = vector.broadcast %cst_185 : f32 to vector<20x1xf32>
    %480 = arith.divf %478, %479 : vector<20x1xf32>
    %481 = vector.broadcast %480 : vector<20x1xf32> to vector<20x32xf32>
    %482 = arith.subf %474, %481 : vector<20x32xf32>
    %483 = arith.mulf %482, %482 : vector<20x32xf32>
    %cst_186 = arith.constant dense<0.000000e+00> : vector<20xf32>
    %484 = vector.multi_reduction <add>, %483, %cst_186 [1] : vector<20x32xf32> to vector<20xf32>
    %485 = vector.shape_cast %484 : vector<20xf32> to vector<20x1xf32>
    %cst_187 = arith.constant 3.200000e+01 : f32
    %486 = vector.broadcast %cst_187 : f32 to vector<20x1xf32>
    %487 = arith.divf %485, %486 : vector<20x1xf32>
    %488 = vector.broadcast %480 : vector<20x1xf32> to vector<20x32xf32>
    %489 = arith.subf %474, %488 : vector<20x32xf32>
    %cst_188 = arith.constant 9.99999974E-6 : f32
    %490 = vector.broadcast %cst_188 : f32 to vector<20x1xf32>
    %491 = arith.addf %487, %490 : vector<20x1xf32>
    %492 = math.rsqrt %491 : vector<20x1xf32>
    %493 = vector.broadcast %492 : vector<20x1xf32> to vector<20x32xf32>
    %494 = arith.mulf %489, %493 : vector<20x32xf32>
    %495 = vector.broadcast %475 : vector<1x32xf32> to vector<20x32xf32>
    %496 = arith.mulf %494, %495 : vector<20x32xf32>
    %497 = vector.broadcast %476 : vector<1x32xf32> to vector<20x32xf32>
    %498 = arith.addf %496, %497 : vector<20x32xf32>
    %c0_189 = arith.constant 0 : index
    %c0_190 = arith.constant 0 : index
    %499 = vector.load %arg34[%c0_189, %c0_190] : memref<32x128xf32, #tpu.memory_space<vmem>>, vector<32x128xf32>
    %cst_191 = arith.constant dense<0.000000e+00> : vector<20x128xf32>
    %500 = tpu.matmul %498, %499, %cst_191 {dimension_numbers = #tpu.dot_dimension_numbers<[1], [0], [0], [1], [0, 0, 1, 1], [], []>} : vector<20x32xf32>, vector<32x128xf32>, vector<20x128xf32> -> vector<20x128xf32>
    %c0_192 = arith.constant 0 : index
    %c0_193 = arith.constant 0 : index
    %501 = vector.load %arg35[%c0_192, %c0_193] : memref<1x128xf32, #tpu.memory_space<vmem>>, vector<1x128xf32>
    %502 = vector.broadcast %501 : vector<1x128xf32> to vector<20x128xf32>
    %503 = arith.addf %500, %502 : vector<20x128xf32>
    %cst_194 = arith.constant 0.000000e+00 : f32
    %504 = vector.broadcast %cst_194 : f32 to vector<20x128xf32>
    %505 = arith.maximumf %503, %504 : vector<20x128xf32>
    %c0_195 = arith.constant 0 : index
    %c0_196 = arith.constant 0 : index
    %506 = vector.load %arg36[%c0_195, %c0_196] : memref<128x32xf32, #tpu.memory_space<vmem>>, vector<128x32xf32>
    %cst_197 = arith.constant dense<0.000000e+00> : vector<20x32xf32>
    %507 = tpu.matmul %505, %506, %cst_197 {dimension_numbers = #tpu.dot_dimension_numbers<[1], [0], [0], [1], [0, 0, 1, 1], [], []>} : vector<20x128xf32>, vector<128x32xf32>, vector<20x32xf32> -> vector<20x32xf32>
    %c0_198 = arith.constant 0 : index
    %c0_199 = arith.constant 0 : index
    %508 = vector.load %arg37[%c0_198, %c0_199] : memref<1x32xf32, #tpu.memory_space<vmem>>, vector<1x32xf32>
    %509 = vector.broadcast %508 : vector<1x32xf32> to vector<20x32xf32>
    %510 = arith.addf %507, %509 : vector<20x32xf32>
    %511 = arith.addf %498, %510 : vector<20x32xf32>
    %c0_200 = arith.constant 0 : index
    %c0_201 = arith.constant 0 : index
    %512 = vector.load %arg38[%c0_200, %c0_201] : memref<1x32xf32, #tpu.memory_space<vmem>>, vector<1x32xf32>
    %c0_202 = arith.constant 0 : index
    %c0_203 = arith.constant 0 : index
    %513 = vector.load %arg39[%c0_202, %c0_203] : memref<1x32xf32, #tpu.memory_space<vmem>>, vector<1x32xf32>
    %cst_204 = arith.constant dense<0.000000e+00> : vector<20xf32>
    %514 = vector.multi_reduction <add>, %511, %cst_204 [1] : vector<20x32xf32> to vector<20xf32>
    %515 = vector.shape_cast %514 : vector<20xf32> to vector<20x1xf32>
    %cst_205 = arith.constant 3.200000e+01 : f32
    %516 = vector.broadcast %cst_205 : f32 to vector<20x1xf32>
    %517 = arith.divf %515, %516 : vector<20x1xf32>
    %518 = vector.broadcast %517 : vector<20x1xf32> to vector<20x32xf32>
    %519 = arith.subf %511, %518 : vector<20x32xf32>
    %520 = arith.mulf %519, %519 : vector<20x32xf32>
    %cst_206 = arith.constant dense<0.000000e+00> : vector<20xf32>
    %521 = vector.multi_reduction <add>, %520, %cst_206 [1] : vector<20x32xf32> to vector<20xf32>
    %522 = vector.shape_cast %521 : vector<20xf32> to vector<20x1xf32>
    %cst_207 = arith.constant 3.200000e+01 : f32
    %523 = vector.broadcast %cst_207 : f32 to vector<20x1xf32>
    %524 = arith.divf %522, %523 : vector<20x1xf32>
    %525 = vector.broadcast %517 : vector<20x1xf32> to vector<20x32xf32>
    %526 = arith.subf %511, %525 : vector<20x32xf32>
    %cst_208 = arith.constant 9.99999974E-6 : f32
    %527 = vector.broadcast %cst_208 : f32 to vector<20x1xf32>
    %528 = arith.addf %524, %527 : vector<20x1xf32>
    %529 = math.rsqrt %528 : vector<20x1xf32>
    %530 = vector.broadcast %529 : vector<20x1xf32> to vector<20x32xf32>
    %531 = arith.mulf %526, %530 : vector<20x32xf32>
    %532 = vector.broadcast %512 : vector<1x32xf32> to vector<20x32xf32>
    %533 = arith.mulf %531, %532 : vector<20x32xf32>
    %534 = vector.broadcast %513 : vector<1x32xf32> to vector<20x32xf32>
    %535 = arith.addf %533, %534 : vector<20x32xf32>
    %536 = vector.extract_strided_slice %535 {offsets = [16, 0], sizes = [4, 32], strides = [1, 1]} : vector<20x32xf32> to vector<4x32xf32>
    %c0_209 = arith.constant 0 : index
    %c0_210 = arith.constant 0 : index
    %537 = vector.load %arg40[%c0_209, %c0_210] : memref<32x64xf32, #tpu.memory_space<vmem>>, vector<32x64xf32>
    %cst_211 = arith.constant dense<0.000000e+00> : vector<4x64xf32>
    %538 = tpu.matmul %230, %537, %cst_211 {dimension_numbers = #tpu.dot_dimension_numbers<[1], [0], [0], [1], [0, 0, 1, 1], [], []>} : vector<4x32xf32>, vector<32x64xf32>, vector<4x64xf32> -> vector<4x64xf32>
    %c0_212 = arith.constant 0 : index
    %c0_213 = arith.constant 0 : index
    %539 = vector.load %arg41[%c0_212, %c0_213] : memref<32x64xf32, #tpu.memory_space<vmem>>, vector<32x64xf32>
    %cst_214 = arith.constant dense<0.000000e+00> : vector<4x64xf32>
    %540 = tpu.matmul %536, %539, %cst_214 {dimension_numbers = #tpu.dot_dimension_numbers<[1], [0], [0], [1], [0, 0, 1, 1], [], []>} : vector<4x32xf32>, vector<32x64xf32>, vector<4x64xf32> -> vector<4x64xf32>
    %541 = arith.addf %538, %540 : vector<4x64xf32>
    %c0_215 = arith.constant 0 : index
    %c0_216 = arith.constant 0 : index
    %542 = vector.load %arg42[%c0_215, %c0_216] : memref<1x64xf32, #tpu.memory_space<vmem>>, vector<1x64xf32>
    %543 = vector.broadcast %542 : vector<1x64xf32> to vector<4x64xf32>
    %544 = arith.addf %541, %543 : vector<4x64xf32>
    %cst_217 = arith.constant 0.000000e+00 : f32
    %545 = vector.broadcast %cst_217 : f32 to vector<4x64xf32>
    %546 = arith.maximumf %544, %545 : vector<4x64xf32>
    %c0_218 = arith.constant 0 : index
    %c0_219 = arith.constant 0 : index
    %547 = vector.load %arg43[%c0_218, %c0_219] : memref<64x2xf32, #tpu.memory_space<vmem>>, vector<64x2xf32>
    %cst_220 = arith.constant dense<0.000000e+00> : vector<4x2xf32>
    %548 = tpu.matmul %546, %547, %cst_220 {dimension_numbers = #tpu.dot_dimension_numbers<[1], [0], [0], [1], [0, 0, 1, 1], [], []>} : vector<4x64xf32>, vector<64x2xf32>, vector<4x2xf32> -> vector<4x2xf32>
    %c0_221 = arith.constant 0 : index
    %c0_222 = arith.constant 0 : index
    %549 = vector.load %arg44[%c0_221, %c0_222] : memref<1x2xf32, #tpu.memory_space<vmem>>, vector<1x2xf32>
    %550 = vector.broadcast %549 : vector<1x2xf32> to vector<4x2xf32>
    %551 = arith.addf %548, %550 : vector<4x2xf32>
    %c0_223 = arith.constant 0 : index
    %c0_224 = arith.constant 0 : index
    %552 = vector.load %arg45[%c0_223, %c0_224] : memref<4x2xf32, #tpu.memory_space<vmem>>, vector<4x2xf32>
    tpu.vector_store %arg45[%c0_223, %c0_224], %551 {strides = array<i32>} : memref<4x2xf32, #tpu.memory_space<vmem>>, vector<4x2xf32>,
    return
  }
}

</mosaic_0001>

<bundles_post_ra>
// kernel: forward.1
= control target key start
LH: loop header
LB: loop body
LE: loop exit
PB: predicated region body
PF: predicated region fallthrough
CT: control target
= control target key end

     0   :  { %s4670_s6 = smov 1   ;;  %s4671_s10 = smov 2   ;;  %s6325_s0 = inlined_call_operand.smem [shape: u32[47], index: -1, kind: input, shape index: {}] }
   0x1   :  { %s4731_s5 = sld [smem:[%s6325_s0]]   ;;  %s4672_s14 = smov 3  }
   0x2   :  { %s4736_s9 = sld [smem:[%s6325_s0 + %s4670_s6]]   ;;  %s4673_s18 = smov 4  }
   0x3   :  { %s4741_s13 = sld [smem:[%s6325_s0 + %s4671_s10]]   ;;  %s4674_s22 = smov 5  }
   0x4   :  { %s4746_s17 = sld [smem:[%s6325_s0 + %s4672_s14]]   ;;  %s4675_s26 = smov 6  }
   0x5   :  { %s4751_s21 = sld [smem:[%s6325_s0 + %s4673_s18]]   ;;  %s4676_s30 = smov 7  }
   0x6   :  { %s4756_s25 = sld [smem:[%s6325_s0 + %s4674_s22]]   ;;  %s4677_s4 = smov 8  }
   0x7   :  { %s4761_s29 = sld [smem:[%s6325_s0 + %s4675_s26]]   ;;  %s4678_s10 = smov 9  }
   0x8   :  { %s4766_s3 = sld [smem:[%s6325_s0 + %s4676_s30]]   ;;  %s4679_s15 = smov 10  }
   0x9   :  { %6337 = sst [smem:[#allocation5_spill]] %s4741_s13  ;;  %s4680_s20 = smov 11  }
   0xa   :  { %s4771_s8 = sld [smem:[%s6325_s0 + %s4677_s4]]   ;;  %s4681_s26 = smov 12  }
   0xb   :  { %s4776_s14 = sld [smem:[%s6325_s0 + %s4678_s10]]   ;;  %s4682_s1 = smov 13  }
   0xc   :  { %s4781_s19 = sld [smem:[%s6325_s0 + %s4679_s15]]   ;;  %s4683_s7 = smov 14  }
   0xd   :  { %6338 = sst [smem:[#allocation6_spill]] %s4761_s29  ;;  %s4684_s15 = smov 15  }
   0xe   :  { %s4786_s24 = sld [smem:[%s6325_s0 + %s4680_s20]]   ;;  %s4685_s22 = smov 16  }
   0xf   :  { %s4791_s30 = sld [smem:[%s6325_s0 + %s4681_s26]]   ;;  %s4686_s28 = smov 17  }
  0x10   :  { %s4796_s6 = sld [smem:[%s6325_s0 + %s4682_s1]]   ;;  %s4714_s1 = smov 45  }
  0x11   :  { %s4801_s12 = sld [smem:[%s6325_s0 + %s4683_s7]]   ;;  %s4687_s7 = smov 18  }
  0x12   :  { %s4806_s20 = sld [smem:[%s6325_s0 + %s4684_s15]]   ;;  %s4688_s15 = smov 19  }
  0x13   :  { %s4811_s27 = sld [smem:[%s6325_s0 + %s4685_s22]]   ;;  %s4689_s22 = smov 20  }
  0x14   :  { %s4816_s4 = sld [smem:[%s6325_s0 + %s4686_s28]]   ;;  %s4690_s28 = smov 21  }
  0x15   :  { %s4821_s29 = sld [smem:[%s6325_s0 + %s4687_s7]]   ;;  %s4691_s7 = smov 22  }
  0x16   :  { %s4826_s13 = sld [smem:[%s6325_s0 + %s4688_s15]]   ;;  %s4692_s15 = smov 23  }
  0x17   :  { %s4715_s10 = smov 46  }
  0x18   :  { %6339 = sst [smem:[#allocation7_spill]] %s4806_s20 }
  0x19   :  { %s4831_s20 = sld [smem:[%s6325_s0 + %s4689_s22]]   ;;  %s4693_s22 = smov 24  }
  0x1a   :  { %6340 = sst [smem:[#allocation8_spill]] %s4816_s4 }
  0x1b   :  { %6341 = sst [smem:[#allocation9_spill]] %s4821_s29 }
  0x1c   :  { %6342 = sst [smem:[#allocation10_spill]] %s4826_s13 }
  0x1d   :  { %s4836_s4 = sld [smem:[%s6325_s0 + %s4690_s28]]   ;;  %s4694_s28 = smov 25  }
  0x1e   :  { %s4841_s29 = sld [smem:[%s6325_s0 + %s4691_s7]]   ;;  %s4695_s7 = smov 26  }
  0x1f   :  { %6343 = sst [smem:[#allocation11_spill]] %s4831_s20 }
  0x20   :  { %s4846_s13 = sld [smem:[%s6325_s0 + %s4692_s15]]   ;;  %s4696_s15 = smov 27  }
  0x21   :  { %s4851_s20 = sld [smem:[%s6325_s0 + %s4693_s22]]   ;;  %s4697_s22 = smov 28  }
  0x23   :  { %6344 = sst [smem:[#allocation12_spill]] %s4836_s4 }
  0x24   :  { %6345 = sst [smem:[#allocation13_spill]] %s4841_s29 }
  0x25   :  { %s4856_s4 = sld [smem:[%s6325_s0 + %s4694_s28]]   ;;  %s4698_s28 = smov 29  }
  0x26   :  { %6346 = sst [smem:[#allocation14_spill]] %s4846_s13 }
  0x27   :  { %6347 = sst [smem:[#allocation15_spill]] %s4851_s20 }
  0x28   :  { %s4861_s29 = sld [smem:[%s6325_s0 + %s4695_s7]]   ;;  %s4699_s7 = smov 30  }
  0x29   :  { %s4866_s13 = sld [smem:[%s6325_s0 + %s4696_s15]]   ;;  %s4700_s15 = smov 31  }
  0x2a   :  { %s4871_s20 = sld [smem:[%s6325_s0 + %s4697_s22]]   ;;  %s4701_s22 = smov 32  }
  0x2b   :  { %6348 = sst [smem:[#allocation16_spill]] %s4856_s4 }
  0x2c   :  { %s4876_s4 = sld [smem:[%s6325_s0 + %s4698_s28]]   ;;  %s4702_s28 = smov 33  }
  0x2e   :  { %6349 = sst [smem:[#allocation17_spill]] %s4861_s29 }
  0x2f   :  { %6350 = sst [smem:[#allocation18_spill]] %s4866_s13 }
  0x30   :  { %6351 = sst [smem:[#allocation19_spill]] %s4871_s20 }
  0x31   :  { %s4881_s29 = sld [smem:[%s6325_s0 + %s4699_s7]]   ;;  %s4703_s7 = smov 34  }
  0x32   :  { %6352 = sst [smem:[#allocation20_spill]] %s4876_s4 }
  0x33   :  { %s4886_s13 = sld [smem:[%s6325_s0 + %s4700_s15]]   ;;  %s4704_s15 = smov 35  }
  0x34   :  { %s4891_s20 = sld [smem:[%s6325_s0 + %s4701_s22]]   ;;  %s4705_s22 = smov 36  }
  0x35   :  { %s4896_s4 = sld [smem:[%s6325_s0 + %s4702_s28]]   ;;  %s4706_s28 = smov 37  }
  0x37   :  { %6353 = sst [smem:[#allocation21_spill]] %s4881_s29 }
  0x38   :  { %s4901_s29 = sld [smem:[%s6325_s0 + %s4703_s7]]   ;;  %s4707_s7 = smov 38  }
  0x39   :  { %6354 = sst [smem:[#allocation22_spill]] %s4886_s13 }
  0x3a   :  { %6355 = sst [smem:[#allocation23_spill]] %s4891_s20 }
  0x3b   :  { %6356 = sst [smem:[#allocation24_spill]] %s4896_s4 }
  0x3c   :  { %s4906_s13 = sld [smem:[%s6325_s0 + %s4704_s15]]   ;;  %s4708_s15 = smov 39  }
  0x3d   :  { %s4911_s20 = sld [smem:[%s6325_s0 + %s4705_s22]]   ;;  %s4709_s22 = smov 40  }
  0x3e   :  { %6357 = sst [smem:[#allocation25_spill]] %s4901_s29 }
  0x3f   :  { %s4916_s4 = sld [smem:[%s6325_s0 + %s4706_s28]]   ;;  %s4710_s28 = smov 41  }
  0x40   :  { %s4921_s29 = sld [smem:[%s6325_s0 + %s4707_s7]]   ;;  %s4711_s7 = smov 42  }
  0x42   :  { %6358 = sst [smem:[#allocation26_spill]] %s4906_s13 }
  0x43   :  { %6359 = sst [smem:[#allocation27_spill]] %s4911_s20 }
  0x44   :  { %s4926_s13 = sld [smem:[%s6325_s0 + %s4708_s15]]   ;;  %s4712_s15 = smov 43  }
  0x45   :  { %6360 = sst [smem:[#allocation28_spill]] %s4916_s4 }
  0x46   :  { %6361 = sst [smem:[#allocation29_spill]] %s4921_s29 }
  0x47   :  { %s4931_s20 = sld [smem:[%s6325_s0 + %s4709_s22]]   ;;  %s4713_s22 = smov 44  }
  0x48   :  { %s4936_s4 = sld [smem:[%s6325_s0 + %s4710_s28]]  }
  0x49   :  { %s4941_s29 = sld [smem:[%s6325_s0 + %s4711_s7]]  }
  0x4a   :  { %6362 = sst [smem:[#allocation30_spill]] %s4926_s13 }
  0x4b   :  { %s4946_s13 = sld [smem:[%s6325_s0 + %s4712_s15]]  }
  0x4d   :  { %6363 = sst [smem:[#allocation31_spill]] %s4931_s20 }
  0x4e   :  { %6364 = sst [smem:[#allocation32_spill]] %s4936_s4 }
  0x4f   :  { %6365 = sst [smem:[#allocation33_spill]] %s4941_s29 }
  0x50   :  { %s4194_s20 = sld [smem:[%s6325_s0 + %s4713_s22]]  }
  0x51   :  { %s4954_s4 = sld [smem:[%s6325_s0 + %s4714_s1]]  }
  0x52   :  { %s4959_s29 = sld [smem:[%s6325_s0 + %s4715_s10]]  }
  0x53   :  { %99 = vsyncpa [#allocation3], 0  ;;  %s4716_s16 = smov [#allocation2]  }
  0x54   :  { %s195_s18 = sshll.u32 %s4716_s16, 4  ;;  %s196_s18 = int_to_ptr.vmem [resolvable:$true] %s195_s18 }
  0x56   :  { %s193_s15 = sshll.u32 %s4194_s20, 4  ;;  %s4648_s26 = scalar_lea.hbm %s4194_s20, 1  ;;  %s194_s15 = int_to_ptr.hbm [resolvable:$true] %s193_s15 }
  0x57   :  { %s4644_s23 = sshra.s32 %s194_s15, 4  ;;  %s4645_s23 = int_to_ptr.hbm [resolvable:$true] %s4644_s23 }
  0x58   :  { %s4646_s22 = scalar_lea.hbm %s4645_s23, 1  ;;  %p4649_p1 = scmp.lt.s32.totalorder %s4645_s23, %s4194_s20 }
  0x59   :  { %p4647_p0 = scmp.ne.s32.totalorder %s4645_s23, %s4646_s22  ;;  %p4650_p2 = scmp.lt.s32.totalorder %s4648_s26, %s4646_s22 }
  0x5b   :  { %p4651_p3 = por %p4650_p2, %p4649_p1 }
  0x5d   :  { %p4652_p4 = pnand %p4651_p3, %p4647_p0 }
  0x5f   :  { %4655 = shalt.err (!%p4652_p4)
}
  0x60   :  { %198 = dma.hbm_to_vmem [thread:$0]  %s194_s15, 16, %s196_s18, [#allocation3]  }
  0x61   :  { %4668 = dma.done.wait [#allocation3], 16  }
  0x62   :  { %4669 = vsyncadd [#allocation3], 4294967280  ;;  %v275_v0 = vld [vmem:[%s4771_s8] sm:$0xff]  ;;  %v276_v1 = vld [vmem:[%s4771_s8 + $0x8] sm:$0xff]  ;;  %vm279_vm0 = vcmask 64512   ;;  %vm604_vm4 = vcmask 130048  }
  0x63   :  { %v277_v2 = vld [vmem:[%s4771_s8 + $0x10] sm:$0xff]  ;;  %301 = vmatpush.msra.mxu0 %v275_v0  ;;  %324 = vmatpush.msra.mxu1 %v276_v1  ;;  %v278_v3 = vld [vmem:[%s4771_s8 + $0x18] sm:$0xff]  ;;  %v203_v4 = vld [vmem:[%s4731_s5] sm:$0xff]  ;;  %s6366_s0 = sld [smem:[#allocation7_spill]] }
  0x64   :  { %347 = vmatpush.msra.mxu2 %v277_v2  ;;  %370 = vmatpush.msra.mxu3 %v278_v3  ;;  %v226_v5 = vld [vmem:[%s4766_s3 + $0x78] sm:$0xff]  ;;  %v225_v8 = vld [vmem:[%s4766_s3 + $0x70] sm:$0xff]  ;;  %v224_v13 = vld [vmem:[%s4766_s3 + $0x68] sm:$0xff]  ;;  %s6374_s8 = sld [smem:[#allocation11_spill]] }
  0x65   :  { %v242_v6 = vld [vmem:[%s4766_s3 + $0xf8] sm:$0xff]  ;;  %4197 = vmatmul.msk.f32.vlgmr.msra.gmra.mxu0 %vm279_vm0, %v203_v4  ;;  %4199 = vmatmul.msk.f32.vlgmr.msra.gmra.mxu1 %vm279_vm0, %v203_v4  ;;  %v241_v9 = vld [vmem:[%s4766_s3 + $0xf0] sm:$0xff]  ;;  %v240_v14 = vld [vmem:[%s4766_s3 + $0xe8] sm:$0xff]  ;;  %s6381_s20 = sld [smem:[#allocation20_spill]] }
  0x66   :  { %v258_v7 = vld [vmem:[%s4766_s3 + $0x178] sm:$0xff]  ;;  %4201 = vmatmul.msk.f32.vlgmr.msra.gmra.mxu2 %vm279_vm0, %v203_v4  ;;  %4203 = vmatmul.msk.f32.vlgmr.msra.gmra.mxu3 %vm279_vm0, %v203_v4  ;;  %v257_v11 = vld [vmem:[%s4766_s3 + $0x170] sm:$0xff]  ;;  %v256_v15 = vld [vmem:[%s4766_s3 + $0x168] sm:$0xff]  ;;  %s6383_s1 = sld [smem:[#allocation31_spill]] }
  0x67   :  { %v274_v10 = vld [vmem:[%s4766_s3 + $0x1f8] sm:$0xff]  ;;  %396 = vmatpush.msrb.mxu0 %v226_v5  ;;  %419 = vmatpush.msrb.mxu1 %v242_v6  ;;  %v273_v12 = vld [vmem:[%s4766_s3 + $0x1f0] sm:$0xff]  ;;  %v272_v16 = vld [vmem:[%s4766_s3 + $0x1e8] sm:$0xff]  ;;  %s6384_s28 = sld [smem:[#allocation22_spill]] }
  0x68   :  { %442 = vmatpush.msrb.mxu2 %v258_v7  ;;  %465 = vmatpush.msrb.mxu3 %v274_v10  ;;  %v204_v17 = vld [vmem:[%s4731_s5 + $0x8] sm:$0xff]  ;;  %v223_v18 = vld [vmem:[%s4766_s3 + $0x60] sm:$0xff]  ;;  %v222_v22 = vld [vmem:[%s4766_s3 + $0x58] sm:$0xff]  ;;  %s6367_s5 = sld [smem:[#allocation5_spill]] }
  0x69   :  { %397 = vmatpush.msrb.mxu0 %v225_v8  ;;  %420 = vmatpush.msrb.mxu1 %v241_v9  ;;  %v239_v19 = vld [vmem:[%s4766_s3 + $0xe0] sm:$0xff]  ;;  %v238_v23 = vld [vmem:[%s4766_s3 + $0xd8] sm:$0xff]  ;;  %v221_v25 = vld [vmem:[%s4766_s3 + $0x50] sm:$0xff]  ;;  %s6385_s2 = sld [smem:[#allocation25_spill]] }
  0x6a   :  { %443 = vmatpush.msrb.mxu2 %v257_v11  ;;  %466 = vmatpush.msrb.mxu3 %v273_v12  ;;  %v255_v20 = vld [vmem:[%s4766_s3 + $0x160] sm:$0xff]  ;;  %v254_v24 = vld [vmem:[%s4766_s3 + $0x158] sm:$0xff]  ;;  %v237_v27 = vld [vmem:[%s4766_s3 + $0xd0] sm:$0xff]  ;;  %s6386_s10 = sld [smem:[#allocation27_spill]] }
  0x6b   :  { %398 = vmatpush.msrb.mxu0 %v224_v13  ;;  %421 = vmatpush.msrb.mxu1 %v240_v14  ;;  %v271_v21 = vld [vmem:[%s4766_s3 + $0x1e0] sm:$0xff]  ;;  %v270_v26 = vld [vmem:[%s4766_s3 + $0x1d8] sm:$0xff]  ;;  %v253_v28 = vld [vmem:[%s4766_s3 + $0x150] sm:$0xff]  ;;  %s6387_s7 = sld [smem:[#allocation23_spill]] }
  0x6c   :  { %444 = vmatpush.msrb.mxu2 %v256_v15  ;;  %467 = vmatpush.msrb.mxu3 %v272_v16  ;;  %v220_v29 = vld [vmem:[%s4766_s3 + $0x48] sm:$0xff]  ;;  %v269_v32 = vld [vmem:[%s4766_s3 + $0x1d0] sm:$0xff]  ;;  %v219_v33 = vld [vmem:[%s4766_s3 + $0x40] sm:$0xff]  ;;  %s6388_s11 = sld [smem:[#allocation24_spill]] }
  0x6d   :  { %4198 = vmatmul.msk.f32.gmra.mxu0 %vm279_vm0, %v204_v17  ;;  %4200 = vmatmul.msk.f32.gmra.mxu1 %vm279_vm0, %v204_v17  ;;  %v236_v30 = vld [vmem:[%s4766_s3 + $0xc8] sm:$0xff]  ;;  %v235_v34 = vld [vmem:[%s4766_s3 + $0xc0] sm:$0xff]  ;;  %v218_v38 = vld [vmem:[%s4766_s3 + $0x38] sm:$0xff]  ;;  %s6389_s15 = sld [smem:[#allocation26_spill]] }
  0x6e   :  { %4202 = vmatmul.msk.f32.gmra.mxu2 %vm279_vm0, %v204_v17  ;;  %4204 = vmatmul.msk.f32.gmra.mxu3 %vm279_vm0, %v204_v17  ;;  %v252_v31 = vld [vmem:[%s4766_s3 + $0x148] sm:$0xff]  ;;  %v251_v36 = vld [vmem:[%s4766_s3 + $0x140] sm:$0xff]  ;;  %v234_v39 = vld [vmem:[%s4766_s3 + $0xb8] sm:$0xff]  ;;  %s6390_s16 = sld [smem:[#allocation28_spill]] }
  0x6f   :  { %399 = vmatpush.msrb.mxu0 %v223_v18  ;;  %422 = vmatpush.msrb.mxu1 %v239_v19  ;;  %v268_v35 = vld [vmem:[%s4766_s3 + $0x1c8] sm:$0xff]  ;;  %v267_v37 = vld [vmem:[%s4766_s3 + $0x1c0] sm:$0xff]  ;;  %v250_v40 = vld [vmem:[%s4766_s3 + $0x138] sm:$0xff]  ;;  %s6391_s18 = sld [smem:[#allocation32_spill]] }
  0x70   :  { %445 = vmatpush.msrb.mxu2 %v255_v20  ;;  %468 = vmatpush.msrb.mxu3 %v271_v21  ;;  %v266_v41 = vld [vmem:[%s4766_s3 + $0x1b8] sm:$0xff]  ;;  %v217_v42 = vld [vmem:[%s4766_s3 + $0x30] sm:$0xff]  ;;  %v5022_v46 = vld [vmem:[%s4766_s3 + $0x28] sm:$0xff]  ;;  %s6392_s23 = sld [smem:[#allocation29_spill]] }
  0x71   :  { %400 = vmatpush.msrb.mxu0 %v222_v22  ;;  %423 = vmatpush.msrb.mxu1 %v238_v23  ;;  %v5013_v43 = vld [vmem:[%s4766_s3 + $0xb0] sm:$0xff]  ;;  %v5025_v47 = vld [vmem:[%s4766_s3 + $0xa8] sm:$0xff]  ;;  %v5037_v49 = vld [vmem:[%s4766_s3 + $0x20] sm:$0xff]  ;;  %s6393_s22 = sld [smem:[#allocation30_spill]] }
  0x72   :  { %446 = vmatpush.msrb.mxu2 %v254_v24  ;;  %469 = vmatpush.msrb.mxu3 %v270_v26  ;;  %v5016_v44 = vld [vmem:[%s4766_s3 + $0x130] sm:$0xff]  ;;  %v5029_v48 = vld [vmem:[%s4766_s3 + $0x128] sm:$0xff]  ;;  %v5040_v50 = vld [vmem:[%s4766_s3 + $0xa0] sm:$0xff]  ;;  %s6394_s26 = sld [smem:[#allocation33_spill]] }
  0x73   :  { %401 = vmatpush.msrb.mxu0 %v221_v25  ;;  %424 = vmatpush.msrb.mxu1 %v237_v27  ;;  %v5019_v45 = vld [vmem:[%s4766_s3 + $0x1b0] sm:$0xff]  ;;  %v5043_v51 = vld [vmem:[%s4766_s3 + $0x120] sm:$0xff]  ;;  %v5048_v52 = vld [vmem:[%s4766_s3 + $0x1a8] sm:$0xff] }
  0x74   :  { %447 = vmatpush.msrb.mxu2 %v253_v28  ;;  %470 = vmatpush.msrb.mxu3 %v269_v32  ;;  %v5051_v53 = vld [vmem:[%s4766_s3 + $0x18] sm:$0xff]  ;;  %v5062_v56 = vld [vmem:[%s4766_s3 + $0x1a0] sm:$0xff]  ;;  %v5065_v57 = vld [vmem:[%s4766_s3 + $0x10] sm:$0xff] }
  0x75   :  { %402 = vmatpush.msrb.mxu0 %v220_v29  ;;  %425 = vmatpush.msrb.mxu1 %v236_v30  ;;  %v5054_v54 = vld [vmem:[%s4766_s3 + $0x98] sm:$0xff]  ;;  %v5070_v58 = vld [vmem:[%s4766_s3 + $0x90] sm:$0xff]  ;;  %v5085_v61 = vld [vmem:[%s4766_s3 + $0x8] sm:$0xff] }
  0x76   :  { %448 = vmatpush.msrb.mxu2 %v252_v31  ;;  %471 = vmatpush.msrb.mxu3 %v268_v35  ;;  %v5059_v55 = vld [vmem:[%s4766_s3 + $0x118] sm:$0xff]  ;;  %v5073_v59 = vld [vmem:[%s4766_s3 + $0x110] sm:$0xff]  ;;  %v5088_v62 = vld [vmem:[%s4766_s3 + $0x88] sm:$0xff]  ;;  %v4717_v35 = vmov 2  }
  0x77   :  { %403 = vmatpush.msrb.mxu0 %v219_v33  ;;  %426 = vmatpush.msrb.mxu1 %v235_v34  ;;  %v5076_v60 = vld [vmem:[%s4766_s3 + $0x198] sm:$0xff]  ;;  %v5091_v63 = vld [vmem:[%s4766_s3 + $0x108] sm:$0xff]  ;;  %v5096_v0 = vld [vmem:[%s4766_s3 + $0x190] sm:$0xff] }
  0x78   :  { %449 = vmatpush.msrb.mxu2 %v251_v36  ;;  %472 = vmatpush.msrb.mxu3 %v267_v37  ;;  %v5101_v1 = vld [vmem:[%s4766_s3] sm:$0xff]  ;;  %v5112_v4 = vld [vmem:[%s4766_s3 + $0x188] sm:$0xff]  ;;  %v4718_v36 = vmov 0  }
  0x79   :  { %404 = vmatpush.msrb.mxu0 %v218_v38  ;;  %427 = vmatpush.msrb.mxu1 %v234_v39  ;;  %v5104_v2 = vld [vmem:[%s4766_s3 + $0x80] sm:$0xff]  ;;  %v489_v6 = vld [vmem:[%s4781_s19 + $0x8] sm:$0xff] }
  0x7a   :  { %450 = vmatpush.msrb.mxu2 %v250_v40  ;;  %473 = vmatpush.msrb.mxu3 %v266_v41  ;;  %v5107_v3 = vld [vmem:[%s4766_s3 + $0x100] sm:$0xff]  ;;  %494 = vst [vmem:[#allocation1 + $0x10] ss:$2 sm:$0xff] %v489_v6  ;;  %v1147_v11 = vld [vmem:[%s4801_s12 + $0x8] sm:$0xff] }
  0x7b   :  { %405 = vmatpush.msrb.mxu0 %v217_v42  ;;  %428 = vmatpush.msrb.mxu1 %v5013_v43  ;;  %v5117_v5 = vld [vmem:[%s4766_s3 + $0x180] sm:$0xff] }
  0x7c   :  { %451 = vmatpush.msrb.mxu2 %v5016_v44  ;;  %474 = vmatpush.msrb.mxu3 %v5019_v45  ;;  %v488_v7 = vld [vmem:[%s4781_s19] sm:$0xff]  ;;  %s6376_s19 = sld [smem:[#allocation14_spill]] }
  0x7d   :  { %406 = vmatpush.msrb.mxu0 %v5022_v46  ;;  %429 = vmatpush.msrb.mxu1 %v5025_v47  ;;  %492 = vst [vmem:[#allocation1] ss:$2 sm:$0xff] %v488_v7  ;;  %v378_v8 = vld [vmem:[%s4776_s14] sm:$0xf]  ;;  %s6375_s14 = sld [smem:[#allocation12_spill]] }
  0x7e   :  { %452 = vmatpush.msrb.mxu2 %v5029_v48  ;;  %475 = vmatpush.msrb.mxu3 %v5048_v52  ;;  %v380_v9 = vperm.slane %v378_v8, 0  ;;  %v381_v10 = vperm.slane %v378_v8, 1  ;;  %v1146_v16 = vld [vmem:[%s4801_s12] sm:$0xff]  ;;  %v382_v21 = vperm.slane %v378_v8, 2  ;;  %v383_v22 = vperm.slane %v378_v8, 3  ;;  %s6380_s12 = sld [smem:[#allocation18_spill]] }
  0x7f   :  { %407 = vmatpush.msrb.mxu0 %v5037_v49  ;;  %430 = vmatpush.msrb.mxu1 %v5040_v50 }
  0x80   :  { %453 = vmatpush.msrb.mxu2 %v5043_v51  ;;  %476 = vmatpush.msrb.mxu3 %v5062_v56 }
  0x81   :  { %408 = vmatpush.msrb.mxu0 %v5051_v53  ;;  %431 = vmatpush.msrb.mxu1 %v5054_v54  ;;  %v497_v12 = vld.sshfl [vmem:[#allocation1 + $0x10] sm:$0xff pattern:$0x75316420]  ;;  %v498_v13 = vld.sshfl [vmem:[#allocation1 + $0x18] sm:$0xff pattern:$0x75316420] }
  0x82   :  { %454 = vmatpush.msrb.mxu2 %v5059_v55  ;;  %477 = vmatpush.msrb.mxu3 %v5076_v60  ;;  %1152 = vst [vmem:[#allocation1 + $0x10] ss:$2 sm:$0xff] %v1147_v11 }
  0x83   :  { %409 = vmatpush.msrb.mxu0 %v5065_v57  ;;  %432 = vmatpush.msrb.mxu1 %v5070_v58 }
  0x84   :  { %455 = vmatpush.msrb.mxu2 %v5073_v59  ;;  %478 = vmatpush.msrb.mxu3 %v5096_v0  ;;  %v495_v19 = vld.sshfl [vmem:[#allocation1] sm:$0xff pattern:$0x75316420]  ;;  %v496_v20 = vld.sshfl [vmem:[#allocation1 + $0x8] sm:$0xff pattern:$0x75316420] }
  0x85   :  { %410 = vmatpush.msrb.mxu0 %v5085_v61  ;;  %433 = vmatpush.msrb.mxu1 %v5088_v62  ;;  %1150 = vst [vmem:[#allocation1] ss:$2 sm:$0xff] %v1146_v16 }
  0x86   :  { %456 = vmatpush.msrb.mxu2 %v5091_v63  ;;  %479 = vmatpush.msrb.mxu3 %v5112_v4 }
  0x87   :  { %411 = vmatpush.msrb.mxu0 %v5101_v1  ;;  %434 = vmatpush.msrb.mxu1 %v5104_v2 }
  0x88   :  { %457 = vmatpush.msrb.mxu2 %v5107_v3  ;;  %480 = vmatpush.msrb.mxu3 %v5117_v5 }
  0x89   :  { %4388 = vset.pattern.permute.xlu0 %v4717_v35  ;;  %4390 = vset.pattern.permute.xlu1 %v4718_v36 }
  0x8a   :  { %4392 = vset.pattern.permute.xlu2 %v4717_v35 }
  0xe2   :  { %v303_v14 = vpop.f32.mrf.mxu0  ;;  %v326_v15 = vpop.f32.mrf.mxu1 }
  0xe3   :  { %v388_v17 = vmul.f32 %v380_v9, %v303_v14  ;;  %v389_v18 = vmul.f32 %v381_v10, %v326_v15 }
  0xe5   :  { %412 = vmatmul.f32.vlgmr.msrb.gmra.mxu0 %v388_v17  ;;  %435 = vmatmul.f32.vlgmr.msrb.gmra.mxu1 %v389_v18 }
  0xe9   :  { %v349_v23 = vpop.f32.mrf.mxu2  ;;  %v372_v24 = vpop.f32.mrf.mxu3 }
  0xea   :  { %v306_v25 = vpop.f32.mrf.mxu0  ;;  %v329_v26 = vpop.f32.mrf.mxu1  ;;  %v390_v27 = vmul.f32 %v382_v21, %v349_v23  ;;  %v391_v28 = vmul.f32 %v383_v22, %v372_v24 }
  0xeb   :  { %517 = vmatpush.xpose.msra.mxu0 %v306_v25  ;;  %537 = vmatpush.xpose.msra.mxu1 %v329_v26  ;;  %v392_v29 = vmul.f32 %v380_v9, %v306_v25  ;;  %v393_v30 = vmul.f32 %v381_v10, %v329_v26 }
  0xec   :  { %458 = vmatmul.f32.vlgmr.msrb.gmra.mxu2 %v390_v27  ;;  %481 = vmatmul.f32.vlgmr.msrb.gmra.mxu3 %v391_v28 }
  0xed   :  { %415 = vmatmul.f32.gmra.mxu0 %v392_v29  ;;  %438 = vmatmul.f32.gmra.mxu1 %v393_v30 }
  0xef   :  { %518 = vmatpush.xpose.msra.mxu0 %v303_v14  ;;  %538 = vmatpush.xpose.msra.mxu1 %v326_v15 }
  0xf1   :  { %v352_v31 = vpop.f32.mrf.mxu2  ;;  %v375_v32 = vpop.f32.mrf.mxu3 }
  0xf2   :  { %557 = vmatpush.xpose.msra.mxu2 %v352_v31  ;;  %577 = vmatpush.xpose.msra.mxu3 %v375_v32  ;;  %v394_v33 = vmul.f32 %v382_v21, %v352_v31  ;;  %v395_v34 = vmul.f32 %v383_v22, %v375_v32 }
  0xf3   :  { %688 = vmatpush.msrb.mxu0 %v329_v26  ;;  %717 = vmatpush.msrb.mxu1 %v306_v25  ;;  %v205_v25 = vld [vmem:[%s4736_s9] sm:$0xff] }
  0xf4   :  { %461 = vmatmul.f32.gmra.mxu2 %v394_v33  ;;  %484 = vmatmul.f32.gmra.mxu3 %v395_v34  ;;  %vm207_vm1 = vcmp.gt.f32.partialorder %v205_v25, 0.0  ;;  %v4721_v33 = vmov -1e+09  }
  0xf5   :  { %689 = vmatpush.msrb.mxu0 %v326_v15  ;;  %718 = vmatpush.msrb.mxu1 %v303_v14  ;;  %v4719_v14 = vmov 1   ;;  %v4720_v15 = vmov 3   ;;  %v5142_v34 = vsel %vm207_vm1, 0.0, %v4721_v33 }
  0xf6   :  { %519 = vmatmul.f32.vlgmr.msra.gmra.mxu0 %v495_v19  ;;  %539 = vmatmul.f32.vlgmr.msra.gmra.mxu1 %v496_v20 }
  0xf7   :  { %558 = vmatpush.xpose.msra.mxu2 %v349_v23  ;;  %578 = vmatpush.xpose.msra.mxu3 %v372_v24 }
  0xfb   :  { %787 = vmatpush.msrb.mxu2 %v352_v31  ;;  %859 = vmatpush.msrb.mxu3 %v375_v32 }
  0xfc   :  { %559 = vmatmul.f32.vlgmr.msra.gmra.mxu2 %v497_v12  ;;  %579 = vmatmul.f32.vlgmr.msra.gmra.mxu3 %v498_v13 }
  0xfd   :  { %788 = vmatpush.msrb.mxu2 %v349_v23  ;;  %860 = vmatpush.msrb.mxu3 %v372_v24 }
 0x162   :  { %v413_v37 = vpop.f32.mrf.mxu0  ;;  %v436_v38 = vpop.f32.mrf.mxu1 }
 0x163   :  { %v437_v39 = vadd.f32 %v436_v38, %v413_v37  ;;  %v206_v37 = vld [vmem:[%s4736_s9 + $0x8] sm:$0xff]  ;;  %s6368_s9 = sld [smem:[#allocation8_spill]] }
 0x164   :  { %vm208_vm5 = vcmp.gt.f32.partialorder %v206_v37, 0.0 }
 0x16a   :  { %v416_v6 = vpop.f32.mrf.mxu0  ;;  %v439_v7 = vpop.f32.mrf.mxu1 }
 0x16b   :  { %v440_v9 = vadd.f32 %v439_v7, %v416_v6 }
 0x16f   :  { %v459_v40 = vpop.f32.mrf.mxu2  ;;  %v482_v41 = vpop.f32.mrf.mxu3 }
 0x170   :  { %v460_v42 = vadd.f32 %v459_v40, %v437_v39 }
 0x172   :  { %v483_v8 = vadd.f32 %v482_v41, %v460_v42 }
 0x173   :  { %v520_v16 = vpop.f32.mrf.mxu0  ;;  %v540_v17 = vpop.f32.mrf.mxu1 }
 0x174   :  { %585 = vperm.xlu1 %4390, %v483_v8   ;;  %727 = vperm.xlu0 %4388, %v483_v8   ;;  %v541_v18 = vadd.f32 %v540_v17, %v520_v16  ;;  %v5152_v17 = vsel %vm208_vm5, 0.0, %v4721_v33  ;;  %vm1564_vm5 = vcmask 261124  }
 0x177   :  { %v462_v10 = vpop.f32.mrf.mxu2  ;;  %v485_v11 = vpop.f32.mrf.mxu3 }
 0x178   :  { %v463_v12 = vadd.f32 %v462_v10, %v440_v9 }
 0x17a   :  { %v486_v13 = vadd.f32 %v485_v11, %v463_v12 }
 0x17c   :  { %4391 = vset.pattern.permute.xlu1 %v4719_v14  ;;  %4389 = vset.pattern.permute.xlu0 %v4720_v15 }
 0x17d   :  { %731 = vperm.xlu2 %4392, %v486_v13   ;;  %628 = vperm.xlu1 %4391, %v483_v8  }
 0x17e   :  { %799 = vperm.xlu0 %4389, %v483_v8  }
 0x17f   :  { %v560_v20 = vpop.f32.mrf.mxu2  ;;  %v580_v22 = vpop.f32.mrf.mxu3 }
 0x180   :  { %v561_v21 = vadd.f32 %v560_v20, %v541_v18 }
 0x182   :  { %v5136_v23 = vadd.f32 %v580_v22, %v561_v21 }
 0x184   :  { %v593_v26 = vperm.slane %v5136_v23, 0  ;;  %v734_v27 = vperm.slane %v5136_v23, 2  ;;  %v635_v40 = vperm.slane %v5136_v23, 1  ;;  %v806_v10 = vperm.slane %v5136_v23, 3 }
 0x185   :  { %4393 = vset.pattern.permute.xlu2 %v4720_v15  ;;  %4394 = vset.pattern.permute.xlu1 %v4718_v36 }
 0x186   :  { %803 = vperm.xlu2 %4393, %v486_v13   ;;  %590 = vperm.xlu1 %4394, %v486_v13  }
 0x187   :  { %4396 = vset.pattern.permute.xlu0 %v4717_v35 }
 0x18e   :  { %4395 = vset.pattern.permute.xlu2 %v4719_v14  ;;  %4397 = vset.pattern.permute.xlu1 %v4720_v15 }
 0x18f   :  { %632 = vperm.xlu2 %4395, %v486_v13  }
 0x197   :  { %4398 = vset.pattern.permute.xlu2 %v4718_v36 }
 0x1d7   :  { %v732_v19 = vpop.permute.xlu2 %731 }
 0x1d8   :  { %v736_v32 = vadd.f32 %v734_v27, %v732_v19 }
 0x1da   :  { %v740_v6 = vmul.f32 0.2, %v736_v32  ;;  %vm738_vm6 = vcmp.ge.f32.partialorder %v736_v32, 0.0 }
 0x1dc   :  { %v742_v18 = vsel %vm738_vm6, %v736_v32, %v740_v6  ;;  %vm1566_vm6 = vcmask 261120  }
 0x1dd   :  { %v744_v23 = vadd.f32 %v742_v18, %v5152_v17 }
 0x1e0   :  { %v804_v24 = vpop.permute.xlu2 %803 }
 0x1e1   :  { %v808_v22 = vadd.f32 %v806_v10, %v804_v24 }
 0x1e3   :  { %v812_v37 = vmul.f32 0.2, %v808_v22  ;;  %vm810_vm10 = vcmp.ge.f32.partialorder %v808_v22, 0.0 }
 0x1e5   :  { %v814_v6 = vsel %vm810_vm10, %v808_v22, %v812_v37 }
 0x1e6   :  { %v586_v28 = vpop.permute.xlu1 %585  ;;  %v728_v29 = vpop.permute.xlu0 %727 }
 0x1e7   :  { %v594_v30 = vadd.f32 %v593_v26, %v586_v28  ;;  %v735_v31 = vadd.f32 %v734_v27, %v728_v29 }
 0x1e9   :  { %vm596_vm2 = vcmp.ge.f32.partialorder %v594_v30, 0.0  ;;  %v598_v38 = vmul.f32 0.2, %v594_v30  ;;  %vm737_vm3 = vcmp.ge.f32.partialorder %v735_v31, 0.0  ;;  %v739_v39 = vmul.f32 0.2, %v735_v31  ;;  %v633_v7 = vpop.permute.xlu2 %632 }
 0x1ea   :  { %v637_v13 = vadd.f32 %v635_v40, %v633_v7 }
 0x1eb   :  { %v741_v41 = vsel %vm737_vm3, %v735_v31, %v739_v39  ;;  %v600_v42 = vsel %vm596_vm2, %v594_v30, %v598_v38  ;;  %v748_v38 = vsel %vm604_vm4, %v744_v23, -inf }
 0x1ec   :  { %v743_v8 = vadd.f32 %v741_v41, %v5142_v34  ;;  %v602_v9 = vadd.f32 %v600_v42, %v5142_v34  ;;  %v641_v27 = vmul.f32 0.2, %v637_v13  ;;  %vm639_vm9 = vcmp.ge.f32.partialorder %v637_v13, 0.0 }
 0x1ee   :  { %v745_v11 = vsel %vm604_vm4, %v743_v8, -inf  ;;  %v605_v12 = vsel %vm604_vm4, %v602_v9, -inf  ;;  %v643_v39 = vsel %vm639_vm9, %v637_v13, %v641_v27  ;;  %vm2037_vm9 = vcmask 162816  }
 0x1ef   :  { %v629_v16 = vpop.permute.xlu1 %628  ;;  %746 = vmax.xlane.f32.xlu0 %v745_v11  ;;  %606 = vmax.xlane.f32.xlu2 %v605_v12  ;;  %v645_v7 = vadd.f32 %v643_v39, %v5152_v17  ;;  %v816_v11 = vadd.f32 %v814_v6, %v5152_v17 }
 0x1f0   :  { %v636_v19 = vadd.f32 %v635_v40, %v629_v16  ;;  %v800_v20 = vpop.permute.xlu0 %799 }
 0x1f1   :  { %v807_v21 = vadd.f32 %v806_v10, %v800_v20  ;;  %v649_v16 = vsel %vm604_vm4, %v645_v7, -inf  ;;  %v820_v13 = vsel %vm604_vm4, %v816_v11, -inf }
 0x1f2   :  { %vm638_vm7 = vcmp.ge.f32.partialorder %v636_v19, 0.0  ;;  %v640_v25 = vmul.f32 0.2, %v636_v19 }
 0x1f3   :  { %vm809_vm8 = vcmp.ge.f32.partialorder %v807_v21, 0.0  ;;  %v811_v28 = vmul.f32 0.2, %v807_v21 }
 0x1f4   :  { %v642_v29 = vsel %vm638_vm7, %v636_v19, %v640_v25  ;;  %vm1568_vm7 = vcmask 257024  }
 0x1f5   :  { %v813_v30 = vsel %vm809_vm8, %v807_v21, %v811_v28  ;;  %v644_v31 = vadd.f32 %v642_v29, %v5142_v34 }
 0x1f6   :  { %v815_v32 = vadd.f32 %v813_v30, %v5142_v34 }
 0x1f7   :  { %749 = vmax.xlane.f32.xlu0 %v748_v38  ;;  %v646_v24 = vsel %vm604_vm4, %v644_v31, -inf }
 0x1f8   :  { %v817_v40 = vsel %vm604_vm4, %v815_v32, -inf  ;;  %v591_v41 = vpop.permute.xlu1 %590  ;;  %647 = vmax.xlane.f32.xlu2 %v646_v24 }
 0x1f9   :  { %818 = vmax.xlane.f32.xlu1 %v817_v40  ;;  %v595_v42 = vadd.f32 %v593_v26, %v591_v41 }
 0x1fb   :  { %vm597_vm11 = vcmp.ge.f32.partialorder %v595_v42, 0.0  ;;  %v599_v10 = vmul.f32 0.2, %v595_v42 }
 0x1fd   :  { %v601_v12 = vsel %vm597_vm11, %v595_v42, %v599_v10 }
 0x1fe   :  { %v603_v18 = vadd.f32 %v601_v12, %v5152_v17 }
 0x1ff   :  { %650 = vmax.xlane.f32.xlu0 %v649_v16 }
 0x200   :  { %v608_v19 = vsel %vm604_vm4, %v603_v18, -inf }
 0x201   :  { %821 = vmax.xlane.f32.xlu1 %v820_v13  ;;  %609 = vmax.xlane.f32.xlu2 %v608_v19 }
 0x262   :  { %v747_v26 = vpop.xlane.xlu0 %746  ;;  %v607_v20 = vpop.xlane.xlu2 %606 }
 0x263   :  { %v751_v21 = vsub.f32 %v743_v8, %v747_v26  ;;  %v611_v22 = vsub.f32 %v602_v9, %v607_v20 }
 0x265   :  { %v753_v25 = vmul.f32 1.442695, %v751_v21  ;;  %v613_v27 = vmul.f32 1.442695, %v611_v22 }
 0x267   :  { %4425 = vpow2.f32 %v753_v25 }
 0x268   :  { %4427 = vpow2.f32 %v613_v27 }
 0x26a   :  { %v750_v28 = vpop.xlane.xlu0 %749 }
 0x26b   :  { %v648_v29 = vpop.xlane.xlu2 %647  ;;  %v752_v40 = vsub.f32 %v744_v23, %v750_v28 }
 0x26c   :  { %v819_v30 = vpop.xlane.xlu1 %818  ;;  %v652_v37 = vsub.f32 %v644_v31, %v648_v29 }
 0x26d   :  { %v5166_v38 = vpop.eup %4425  ;;  %v823_v24 = vsub.f32 %v815_v32, %v819_v30  ;;  %v755_v6 = vmul.f32 1.442695, %v752_v40 }
 0x26e   :  { %v5168_v39 = vpop.eup %4427  ;;  %v654_v41 = vmul.f32 1.442695, %v652_v37  ;;  %v757_v42 = vsel %vm604_vm4, %v5166_v38, 0.0 }
 0x26f   :  { %v825_v8 = vmul.f32 1.442695, %v823_v24  ;;  %758 = vadd.xlane.f32.xlu1 %v757_v42  ;;  %v617_v9 = vsel %vm604_vm4, %v5168_v39, 0.0  ;;  %v941_v42 = vld [vmem:[%s4791_s30 + $0x1e8] sm:$0xff] }
 0x270   :  { %4429 = vpow2.f32 %v654_v41  ;;  %618 = vadd.xlane.f32.xlu0 %v617_v9  ;;  %v940_v41 = vld [vmem:[%s4791_s30 + $0x1e0] sm:$0xff]  ;;  %967 = vmatpush.msra.mxu1 %v941_v42  ;;  %v943_v9 = vld [vmem:[%s4791_s30 + $0x1f8] sm:$0xff] }
 0x271   :  { %4431 = vpow2.f32 %v825_v8  ;;  %v942_v8 = vld [vmem:[%s4791_s30 + $0x1f0] sm:$0xff]  ;;  %944 = vmatpush.msra.mxu0 %v940_v41  ;;  %1013 = vmatpush.msra.mxu3 %v943_v9 }
 0x272   :  { %v651_v31 = vpop.xlane.xlu0 %650  ;;  %4433 = vpow2.f32 %v755_v6  ;;  %v936_v6 = vld [vmem:[%s4791_s30 + $0x1c0] sm:$0xff]  ;;  %990 = vmatpush.msra.mxu2 %v942_v8 }
 0x273   :  { %v653_v19 = vsub.f32 %v645_v7, %v651_v31  ;;  %v937_v31 = vld [vmem:[%s4791_s30 + $0x1c8] sm:$0xff]  ;;  %945 = vmatpush.msra.mxu0 %v936_v6 }
 0x274   :  { %v822_v10 = vpop.xlane.xlu1 %821  ;;  %v610_v12 = vpop.xlane.xlu2 %609  ;;  %968 = vmatpush.msra.mxu1 %v937_v31 }
 0x275   :  { %v824_v32 = vsub.f32 %v816_v11, %v822_v10  ;;  %v612_v16 = vsub.f32 %v603_v18, %v610_v12  ;;  %v656_v11 = vmul.f32 1.442695, %v653_v19  ;;  %v938_v10 = vld [vmem:[%s4791_s30 + $0x1d0] sm:$0xff]  ;;  %v939_v12 = vld [vmem:[%s4791_s30 + $0x1d8] sm:$0xff]  ;;  %v933_v19 = vld [vmem:[%s4791_s30 + $0x1a8] sm:$0xff] }
 0x276   :  { %v5174_v13 = vpop.eup %4429  ;;  %991 = vmatpush.msra.mxu2 %v938_v10  ;;  %1014 = vmatpush.msra.mxu3 %v939_v12 }
 0x277   :  { %v5176_v23 = vpop.eup %4431  ;;  %v827_v26 = vmul.f32 1.442695, %v824_v32  ;;  %v615_v20 = vmul.f32 1.442695, %v612_v16  ;;  %v658_v21 = vsel %vm604_vm4, %v5174_v13, 0.0  ;;  %v932_v32 = vld [vmem:[%s4791_s30 + $0x1a0] sm:$0xff]  ;;  %969 = vmatpush.msra.mxu1 %v933_v19 }
 0x278   :  { %v829_v22 = vsel %vm604_vm4, %v5176_v23, 0.0  ;;  %659 = vadd.xlane.f32.xlu1 %v658_v21  ;;  %v5182_v18 = vpop.eup %4433  ;;  %946 = vmatpush.msra.mxu0 %v932_v32 }
 0x279   :  { %4435 = vpow2.f32 %v827_v26  ;;  %830 = vadd.xlane.f32.xlu2 %v829_v22  ;;  %v760_v27 = vsel %vm604_vm4, %v5182_v18, 0.0  ;;  %v935_v26 = vld [vmem:[%s4791_s30 + $0x1b8] sm:$0xff]  ;;  %v934_v22 = vld [vmem:[%s4791_s30 + $0x1b0] sm:$0xff] }
 0x27a   :  { %4437 = vpow2.f32 %v615_v20  ;;  %1015 = vmatpush.msra.mxu3 %v935_v26  ;;  %992 = vmatpush.msra.mxu2 %v934_v22  ;;  %v924_v26 = vld [vmem:[%s4791_s30 + $0x160] sm:$0xff]  ;;  %v921_v22 = vld [vmem:[%s4791_s30 + $0x148] sm:$0xff] }
 0x27b   :  { %4439 = vpow2.f32 %v656_v11 }
 0x27f   :  { %v5184_v25 = vpop.eup %4435 }
 0x280   :  { %v5186_v7 = vpop.eup %4437  ;;  %v832_v28 = vsel %vm604_vm4, %v5184_v25, 0.0 }
 0x281   :  { %761 = vadd.xlane.f32.xlu2 %v760_v27  ;;  %833 = vadd.xlane.f32.xlu0 %v832_v28  ;;  %v620_v29 = vsel %vm604_vm4, %v5186_v7, 0.0  ;;  %v5194_v30 = vpop.eup %4439  ;;  %v928_v28 = vld [vmem:[%s4791_s30 + $0x180] sm:$0xff] }
 0x282   :  { %621 = vadd.xlane.f32.xlu1 %v620_v29  ;;  %v661_v37 = vsel %vm604_vm4, %v5194_v30, 0.0  ;;  %v929_v29 = vld [vmem:[%s4791_s30 + $0x188] sm:$0xff]  ;;  %947 = vmatpush.msra.mxu0 %v928_v28 }
 0x283   :  { %970 = vmatpush.msra.mxu1 %v929_v29  ;;  %v917_v28 = vld [vmem:[%s4791_s30 + $0x128] sm:$0xff]  ;;  %v918_v29 = vld [vmem:[%s4791_s30 + $0x130] sm:$0xff] }
 0x284   :  { %948 = vmatpush.msra.mxu0 %v924_v26  ;;  %v898_v26 = vld [vmem:[%s4791_s30 + $0x90] sm:$0xff] }
 0x289   :  { %662 = vadd.xlane.f32.xlu2 %v661_v37 }
 0x2e2   :  { %v759_v24 = vpop.xlane.xlu1 %758 }
 0x2e3   :  { %4441 = vrcp.f32 %v759_v24  ;;  %v619_v40 = vpop.xlane.xlu0 %618  ;;  %v930_v24 = vld [vmem:[%s4791_s30 + $0x190] sm:$0xff] }
 0x2e4   :  { %4443 = vrcp.f32 %v619_v40  ;;  %v931_v40 = vld [vmem:[%s4791_s30 + $0x198] sm:$0xff]  ;;  %993 = vmatpush.msra.mxu2 %v930_v24  ;;  %v912_v24 = vld [vmem:[%s4791_s30 + $0x100] sm:$0xff] }
 0x2e5   :  { %1016 = vmatpush.msra.mxu3 %v931_v40  ;;  %v913_v40 = vld [vmem:[%s4791_s30 + $0x108] sm:$0xff] }
 0x2e9   :  { %v4442_v16 = vpop.eup %4441 }
 0x2ea   :  { %v4444_v20 = vpop.eup %4443  ;;  %v765_v21 = vmul.f32 %v4442_v16, %v5166_v38 }
 0x2eb   :  { %v625_v11 = vmul.f32 %v4444_v20, %v5168_v39  ;;  %v660_v27 = vpop.xlane.xlu1 %659  ;;  %v926_v20 = vld [vmem:[%s4791_s30 + $0x170] sm:$0xff] }
 0x2ec   :  { %4445 = vrcp.f32 %v660_v27  ;;  %v831_v37 = vpop.xlane.xlu2 %830  ;;  %4209 = vmatmul.msk.f32.vlgmr.msrb.gmra.mxu2 %vm604_vm4, %v765_v21  ;;  %v920_v21 = vld [vmem:[%s4791_s30 + $0x140] sm:$0xff] }
 0x2ed   :  { %4447 = vrcp.f32 %v831_v37  ;;  %4207 = vmatmul.msk.f32.vlgmr.msrb.gmra.mxu1 %vm604_vm4, %v625_v11  ;;  %994 = vmatpush.msra.mxu2 %v926_v20  ;;  %v922_v11 = vld [vmem:[%s4791_s30 + $0x150] sm:$0xff]  ;;  %v916_v27 = vld [vmem:[%s4791_s30 + $0x120] sm:$0xff]  ;;  %v919_v37 = vld [vmem:[%s4791_s30 + $0x138] sm:$0xff] }
 0x2ee   :  { %949 = vmatpush.msra.mxu0 %v920_v21  ;;  %v892_v20 = vld [vmem:[%s4791_s30 + $0x60] sm:$0xff]  ;;  %v894_v21 = vld [vmem:[%s4791_s30 + $0x70] sm:$0xff] }
 0x2ef   :  { %995 = vmatpush.msra.mxu2 %v922_v11  ;;  %v888_v11 = vld [vmem:[%s4791_s30 + $0x40] sm:$0xff] }
 0x2f0   :  { %950 = vmatpush.msra.mxu0 %v916_v27  ;;  %v890_v27 = vld [vmem:[%s4791_s30 + $0x50] sm:$0xff] }
 0x2f1   :  { %996 = vmatpush.msra.mxu2 %v918_v29  ;;  %v884_v29 = vld [vmem:[%s4791_s30 + $0x20] sm:$0xff] }
 0x2f2   :  { %v4446_v38 = vpop.eup %4445  ;;  %951 = vmatpush.msra.mxu0 %v912_v24  ;;  %v886_v24 = vld [vmem:[%s4791_s30 + $0x30] sm:$0xff] }
 0x2f3   :  { %v4448_v39 = vpop.eup %4447  ;;  %v666_v41 = vmul.f32 %v4446_v38, %v5174_v13  ;;  %v914_v38 = vld [vmem:[%s4791_s30 + $0x110] sm:$0xff] }
 0x2f4   :  { %v837_v42 = vmul.f32 %v4448_v39, %v5176_v23  ;;  %v834_v8 = vpop.xlane.xlu0 %833  ;;  %v762_v9 = vpop.xlane.xlu2 %761  ;;  %v915_v39 = vld [vmem:[%s4791_s30 + $0x118] sm:$0xff]  ;;  %997 = vmatpush.msra.mxu2 %v914_v38  ;;  %v880_v38 = vld [vmem:[%s4791_s30] sm:$0xff] }
 0x2f5   :  { %4449 = vrcp.f32 %v834_v8  ;;  %v622_v6 = vpop.xlane.xlu1 %621  ;;  %4205 = vmatmul.msk.f32.vlgmr.msrb.gmra.mxu0 %vm604_vm4, %v666_v41  ;;  %v908_v41 = vld [vmem:[%s4791_s30 + $0xe0] sm:$0xff]  ;;  %v910_v8 = vld [vmem:[%s4791_s30 + $0xf0] sm:$0xff] }
 0x2f6   :  { %4451 = vrcp.f32 %v762_v9  ;;  %4211 = vmatmul.msk.f32.vlgmr.msrb.gmra.mxu3 %vm604_vm4, %v837_v42  ;;  %v909_v42 = vld [vmem:[%s4791_s30 + $0xe8] sm:$0xff]  ;;  %952 = vmatpush.msra.mxu0 %v908_v41  ;;  %v911_v9 = vld [vmem:[%s4791_s30 + $0xf8] sm:$0xff]  ;;  %v882_v41 = vld [vmem:[%s4791_s30 + $0x10] sm:$0xff] }
 0x2f7   :  { %4453 = vrcp.f32 %v622_v6  ;;  %v904_v6 = vld [vmem:[%s4791_s30 + $0xc0] sm:$0xff]  ;;  %998 = vmatpush.msra.mxu2 %v910_v8  ;;  %v4607_v8 = vld [vmem:[%s4766_s3 + $0x78] sm:$0xff] }
 0x2f8   :  { %953 = vmatpush.msra.mxu0 %v904_v6  ;;  %v4609_v6 = vld [vmem:[%s4766_s3 + $0x178] sm:$0xff] }
 0x2fb   :  { %v4450_v31 = vpop.eup %4449 }
 0x2fc   :  { %v4452_v10 = vpop.eup %4451  ;;  %v663_v12 = vpop.xlane.xlu2 %662  ;;  %v838_v13 = vmul.f32 %v4450_v31, %v5184_v25  ;;  %v905_v31 = vld [vmem:[%s4791_s30 + $0xc8] sm:$0xff] }
 0x2fd   :  { %v4454_v23 = vpop.eup %4453  ;;  %4455 = vrcp.f32 %v663_v12  ;;  %v766_v32 = vmul.f32 %v4452_v10, %v5182_v18  ;;  %v925_v18 = vld [vmem:[%s4791_s30 + $0x168] sm:$0xff]  ;;  %v906_v10 = vld [vmem:[%s4791_s30 + $0xd0] sm:$0xff]  ;;  %v907_v12 = vld [vmem:[%s4791_s30 + $0xd8] sm:$0xff] }
 0x2fe   :  { %4212 = vmatmul.msk.f32.gmra.mxu3 %vm604_vm4, %v838_v13  ;;  %v626_v16 = vmul.f32 %v4454_v23, %v5186_v7  ;;  %971 = vmatpush.msra.mxu1 %v925_v18  ;;  %v927_v7 = vld [vmem:[%s4791_s30 + $0x178] sm:$0xff]  ;;  %v900_v13 = vld [vmem:[%s4791_s30 + $0xa0] sm:$0xff]  ;;  %v901_v23 = vld [vmem:[%s4791_s30 + $0xa8] sm:$0xff] }
 0x2ff   :  { %4210 = vmatmul.msk.f32.gmra.mxu2 %vm604_vm4, %v766_v32  ;;  %1017 = vmatpush.msra.mxu3 %v927_v7  ;;  %v902_v32 = vld [vmem:[%s4791_s30 + $0xb0] sm:$0xff]  ;;  %v899_v18 = vld [vmem:[%s4791_s30 + $0x98] sm:$0xff]  ;;  %v893_v7 = vld [vmem:[%s4791_s30 + $0x68] sm:$0xff] }
 0x300   :  { %4208 = vmatmul.msk.f32.gmra.mxu1 %vm604_vm4, %v626_v16  ;;  %v903_v16 = vld [vmem:[%s4791_s30 + $0xb8] sm:$0xff]  ;;  %999 = vmatpush.msra.mxu2 %v906_v10  ;;  %v4611_v10 = vld [vmem:[%s4766_s3 + $0x70] sm:$0xff] }
 0x301   :  { %972 = vmatpush.msra.mxu1 %v921_v22  ;;  %954 = vmatpush.msra.mxu0 %v900_v13  ;;  %v895_v22 = vld [vmem:[%s4791_s30 + $0x78] sm:$0xff]  ;;  %v4613_v13 = vld [vmem:[%s4766_s3 + $0x170] sm:$0xff] }
 0x302   :  { %1000 = vmatpush.msra.mxu2 %v902_v32  ;;  %v4615_v32 = vld [vmem:[%s4766_s3 + $0x68] sm:$0xff] }
 0x303   :  { %v4456_v19 = vpop.eup %4455  ;;  %973 = vmatpush.msra.mxu1 %v917_v28  ;;  %v891_v28 = vld [vmem:[%s4791_s30 + $0x58] sm:$0xff] }
 0x304   :  { %v667_v25 = vmul.f32 %v4456_v19, %v5194_v30  ;;  %v923_v30 = vld [vmem:[%s4791_s30 + $0x158] sm:$0xff]  ;;  %v896_v19 = vld [vmem:[%s4791_s30 + $0x80] sm:$0xff]  ;;  %1001 = vmatpush.msra.mxu2 %v898_v26 }
 0x305   :  { %1018 = vmatpush.msra.mxu3 %v923_v30  ;;  %974 = vmatpush.msra.mxu1 %v913_v40  ;;  %v889_v30 = vld [vmem:[%s4791_s30 + $0x48] sm:$0xff]  ;;  %v887_v40 = vld [vmem:[%s4791_s30 + $0x38] sm:$0xff]  ;;  %v4619_v26 = vld [vmem:[%s4766_s3 + $0x60] sm:$0xff] }
 0x306   :  { %4206 = vmatmul.msk.f32.gmra.mxu0 %vm604_vm4, %v667_v25  ;;  %v897_v25 = vld [vmem:[%s4791_s30 + $0x88] sm:$0xff]  ;;  %1002 = vmatpush.msra.mxu2 %v894_v21  ;;  %v4623_v21 = vld [vmem:[%s4766_s3 + $0x58] sm:$0xff] }
 0x307   :  { %1019 = vmatpush.msra.mxu3 %v919_v37  ;;  %975 = vmatpush.msra.mxu1 %v909_v42  ;;  %v885_v37 = vld [vmem:[%s4791_s30 + $0x28] sm:$0xff]  ;;  %v883_v42 = vld [vmem:[%s4791_s30 + $0x18] sm:$0xff] }
 0x308   :  { %955 = vmatpush.msra.mxu0 %v896_v19  ;;  %1003 = vmatpush.msra.mxu2 %v890_v27  ;;  %v4617_v19 = vld [vmem:[%s4766_s3 + $0x168] sm:$0xff]  ;;  %v4627_v27 = vld [vmem:[%s4766_s3 + $0x50] sm:$0xff] }
 0x309   :  { %1020 = vmatpush.msra.mxu3 %v915_v39  ;;  %976 = vmatpush.msra.mxu1 %v905_v31  ;;  %v881_v39 = vld [vmem:[%s4791_s30 + $0x8] sm:$0xff]  ;;  %v4610_v31 = vld [vmem:[%s4766_s3 + $0x1f8] sm:$0xff]  ;;  %s6378_s30 = sld [smem:[#allocation19_spill]] }
 0x30a   :  { %956 = vmatpush.msra.mxu0 %v892_v20  ;;  %1004 = vmatpush.msra.mxu2 %v886_v24  ;;  %v4621_v20 = vld [vmem:[%s4766_s3 + $0x160] sm:$0xff]  ;;  %v4631_v24 = vld [vmem:[%s4766_s3 + $0x48] sm:$0xff] }
 0x30b   :  { %1021 = vmatpush.msra.mxu3 %v911_v9  ;;  %977 = vmatpush.msra.mxu1 %v901_v23  ;;  %v4608_v9 = vld [vmem:[%s4766_s3 + $0xf8] sm:$0xff]  ;;  %v4614_v23 = vld [vmem:[%s4766_s3 + $0x1f0] sm:$0xff] }
 0x30c   :  { %957 = vmatpush.msra.mxu0 %v888_v11  ;;  %1005 = vmatpush.msra.mxu2 %v882_v41  ;;  %v4625_v11 = vld [vmem:[%s4766_s3 + $0x158] sm:$0xff] }
 0x30d   :  { %1022 = vmatpush.msra.mxu3 %v907_v12  ;;  %978 = vmatpush.msra.mxu1 %v897_v25  ;;  %v4612_v12 = vld [vmem:[%s4766_s3 + $0xf0] sm:$0xff]  ;;  %v4618_v25 = vld [vmem:[%s4766_s3 + $0x1e8] sm:$0xff] }
 0x30e   :  { %958 = vmatpush.msra.mxu0 %v884_v29  ;;  %1100 = vmatpush.msrb.mxu2 %v4609_v6  ;;  %v4629_v29 = vld [vmem:[%s4766_s3 + $0x150] sm:$0xff]  ;;  %v4637_v6 = vld [vmem:[%s4766_s3 + $0x140] sm:$0xff] }
 0x30f   :  { %1023 = vmatpush.msra.mxu3 %v903_v16  ;;  %979 = vmatpush.msra.mxu1 %v893_v7  ;;  %v4616_v16 = vld [vmem:[%s4766_s3 + $0xe8] sm:$0xff]  ;;  %v4622_v7 = vld [vmem:[%s4766_s3 + $0x1e0] sm:$0xff] }
 0x310   :  { %959 = vmatpush.msra.mxu0 %v880_v38  ;;  %1101 = vmatpush.msrb.mxu2 %v4613_v13  ;;  %v4633_v38 = vld [vmem:[%s4766_s3 + $0x148] sm:$0xff]  ;;  %v4640_v13 = vld [vmem:[%s4766_s3 + $0xb8] sm:$0xff] }
 0x311   :  { %1024 = vmatpush.msra.mxu3 %v899_v18  ;;  %980 = vmatpush.msra.mxu1 %v889_v30  ;;  %v4620_v18 = vld [vmem:[%s4766_s3 + $0xe0] sm:$0xff]  ;;  %v4626_v30 = vld [vmem:[%s4766_s3 + $0x1d8] sm:$0xff] }
 0x312   :  { %1054 = vmatpush.msrb.mxu0 %v4607_v8  ;;  %1102 = vmatpush.msrb.mxu2 %v4617_v19  ;;  %v4636_v8 = vld [vmem:[%s4766_s3 + $0xc0] sm:$0xff] }
 0x313   :  { %1025 = vmatpush.msra.mxu3 %v895_v22  ;;  %981 = vmatpush.msra.mxu1 %v885_v37  ;;  %v4624_v22 = vld [vmem:[%s4766_s3 + $0xd8] sm:$0xff]  ;;  %v4630_v37 = vld [vmem:[%s4766_s3 + $0x1d0] sm:$0xff] }
 0x314   :  { %1055 = vmatpush.msrb.mxu0 %v4611_v10  ;;  %1103 = vmatpush.msrb.mxu2 %v4621_v20  ;;  %v4406_v20 = vld [vmem:[%s4786_s24] ss:$0 sm:$0xff]  ;;  %s6377_s24 = sld [smem:[#allocation16_spill]] }
 0x315   :  { %1026 = vmatpush.msra.mxu3 %v891_v28  ;;  %982 = vmatpush.msra.mxu1 %v881_v39  ;;  %v4628_v28 = vld [vmem:[%s4766_s3 + $0xd0] sm:$0xff]  ;;  %v4634_v39 = vld [vmem:[%s4766_s3 + $0x1c8] sm:$0xff] }
 0x316   :  { %1056 = vmatpush.msrb.mxu0 %v4615_v32  ;;  %1104 = vmatpush.msrb.mxu2 %v4625_v11  ;;  %v4642_v32 = vld [vmem:[%s4766_s3 + $0x1b8] sm:$0xff] }
 0x317   :  { %1027 = vmatpush.msra.mxu3 %v887_v40  ;;  %1077 = vmatpush.msrb.mxu1 %v4608_v9  ;;  %v4632_v40 = vld [vmem:[%s4766_s3 + $0xc8] sm:$0xff] }
 0x318   :  { %1057 = vmatpush.msrb.mxu0 %v4619_v26  ;;  %1105 = vmatpush.msrb.mxu2 %v4629_v29  ;;  %v1153_v29 = vld.sshfl [vmem:[#allocation1] sm:$0xff pattern:$0x75316420] }
 0x319   :  { %1028 = vmatpush.msra.mxu3 %v883_v42  ;;  %1078 = vmatpush.msrb.mxu1 %v4612_v12  ;;  %v4635_v42 = vld [vmem:[%s4766_s3 + $0x40] sm:$0xff]  ;;  %v4639_v12 = vld [vmem:[%s4766_s3 + $0x38] sm:$0xff] }
 0x31a   :  { %1058 = vmatpush.msrb.mxu0 %v4623_v21  ;;  %1106 = vmatpush.msrb.mxu2 %v4633_v38 }
 0x31b   :  { %1123 = vmatpush.msrb.mxu3 %v4610_v31  ;;  %1079 = vmatpush.msrb.mxu1 %v4616_v16  ;;  %v4638_v31 = vld [vmem:[%s4766_s3 + $0x1c0] sm:$0xff]  ;;  %v4643_v16 = vld [vmem:[%s4766_s3 + $0x30] sm:$0xff] }
 0x31c   :  { %1059 = vmatpush.msrb.mxu0 %v4627_v27  ;;  %1107 = vmatpush.msrb.mxu2 %v4637_v6 }
 0x31d   :  { %1124 = vmatpush.msrb.mxu3 %v4614_v23  ;;  %1080 = vmatpush.msrb.mxu1 %v4620_v18  ;;  %v4641_v23 = vld [vmem:[%s4766_s3 + $0x138] sm:$0xff]  ;;  %s6373_s3 = sld [smem:[#allocation15_spill]] }
 0x31e   :  { %1060 = vmatpush.msrb.mxu0 %v4631_v24  ;;  %1108 = vmatpush.msrb.mxu2 %v4641_v23  ;;  %v1155_v24 = vld.sshfl [vmem:[#allocation1 + $0x10] sm:$0xff pattern:$0x75316420] }
 0x31f   :  { %1125 = vmatpush.msrb.mxu3 %v4618_v25  ;;  %1081 = vmatpush.msrb.mxu1 %v4624_v22 }
 0x320   :  { %1061 = vmatpush.msrb.mxu0 %v4635_v42  ;;  %1109 = vmatpush.msrb.mxu2 %v5016_v44 }
 0x321   :  { %1126 = vmatpush.msrb.mxu3 %v4622_v7  ;;  %1082 = vmatpush.msrb.mxu1 %v4628_v28 }
 0x322   :  { %1062 = vmatpush.msrb.mxu0 %v4639_v12  ;;  %1110 = vmatpush.msrb.mxu2 %v5029_v48 }
 0x323   :  { %1127 = vmatpush.msrb.mxu3 %v4626_v30  ;;  %1083 = vmatpush.msrb.mxu1 %v4632_v40  ;;  %v1156_v40 = vld.sshfl [vmem:[#allocation1 + $0x18] sm:$0xff pattern:$0x75316420] }
 0x324   :  { %1063 = vmatpush.msrb.mxu0 %v4643_v16  ;;  %1111 = vmatpush.msrb.mxu2 %v5043_v51 }
 0x325   :  { %1128 = vmatpush.msrb.mxu3 %v4630_v37  ;;  %1084 = vmatpush.msrb.mxu1 %v4636_v8  ;;  %v1154_v37 = vld.sshfl [vmem:[#allocation1 + $0x8] sm:$0xff pattern:$0x75316420] }
 0x326   :  { %1064 = vmatpush.msrb.mxu0 %v5022_v46  ;;  %1112 = vmatpush.msrb.mxu2 %v5059_v55 }
 0x327   :  { %1129 = vmatpush.msrb.mxu3 %v4634_v39  ;;  %1085 = vmatpush.msrb.mxu1 %v4640_v13 }
 0x328   :  { %1065 = vmatpush.msrb.mxu0 %v5037_v49  ;;  %1113 = vmatpush.msrb.mxu2 %v5073_v59 }
 0x329   :  { %1130 = vmatpush.msrb.mxu3 %v4638_v31  ;;  %1086 = vmatpush.msrb.mxu1 %v5013_v43 }
 0x32a   :  { %1066 = vmatpush.msrb.mxu0 %v5051_v53  ;;  %1114 = vmatpush.msrb.mxu2 %v5091_v63 }
 0x32b   :  { %1131 = vmatpush.msrb.mxu3 %v4642_v32  ;;  %1087 = vmatpush.msrb.mxu1 %v5025_v47 }
 0x32c   :  { %1067 = vmatpush.msrb.mxu0 %v5065_v57  ;;  %1115 = vmatpush.msrb.mxu2 %v5107_v3 }
 0x32d   :  { %1132 = vmatpush.msrb.mxu3 %v5019_v45  ;;  %1088 = vmatpush.msrb.mxu1 %v5040_v50 }
 0x32e   :  { %1068 = vmatpush.msrb.mxu0 %v5085_v61 }
 0x32f   :  { %1133 = vmatpush.msrb.mxu3 %v5048_v52  ;;  %1089 = vmatpush.msrb.mxu1 %v5054_v54 }
 0x330   :  { %1069 = vmatpush.msrb.mxu0 %v5101_v1 }
 0x331   :  { %1134 = vmatpush.msrb.mxu3 %v5062_v56  ;;  %1090 = vmatpush.msrb.mxu1 %v5070_v58  ;;  %v1036_v56 = vld [vmem:[%s4796_s6] sm:$0xf]  ;;  %s6379_s6 = sld [smem:[#allocation17_spill]] }
 0x332   :  { %v1038_v57 = vperm.slane %v1036_v56, 0  ;;  %v1039_v58 = vperm.slane %v1036_v56, 1  ;;  %v1040_v63 = vperm.slane %v1036_v56, 2 }
 0x333   :  { %1135 = vmatpush.msrb.mxu3 %v5076_v60  ;;  %1091 = vmatpush.msrb.mxu1 %v5088_v62 }
 0x335   :  { %1136 = vmatpush.msrb.mxu3 %v5096_v0  ;;  %1092 = vmatpush.msrb.mxu1 %v5104_v2  ;;  %v1041_v0 = vperm.slane %v1036_v56, 3 }
 0x337   :  { %1137 = vmatpush.msrb.mxu3 %v5112_v4 }
 0x339   :  { %1138 = vmatpush.msrb.mxu3 %v5117_v5 }
 0x36a   :  { %v720_v9 = vpop.f32.mrf.mxu1 }
 0x36f   :  { %v790_v19 = vpop.f32.mrf.mxu2 }
 0x372   :  { %v691_v41 = vpop.f32.mrf.mxu0 }
 0x373   :  { %v721_v10 = vadd.f32 %v720_v9, %v691_v41 }
 0x375   :  { %v796_v25 = vadd.f32 %v790_v19, %v721_v10 }
 0x379   :  { %v862_v26 = vpop.f32.mrf.mxu3 }
 0x37a   :  { %v868_v18 = vadd.f32 %v862_v26, %v796_v25 }
 0x37c   :  { %v870_v43 = vmul.f32 0.25, %v868_v18 }
 0x37d   :  { %v723_v46 = vpop.f32.mrf.mxu1 }
 0x37e   :  { %v876_v44 = vadd.f32 %v4406_v20, %v870_v43 }
 0x380   :  { %v878_v45 = vmax.f32 %v876_v44, 0.0 }
 0x381   :  { %v865_v51 = vpop.f32.mrf.mxu3 }
 0x382   :  { %960 = vmatmul.f32.vlgmr.msra.gmra.mxu0 %v878_v45  ;;  %983 = vmatmul.f32.vlgmr.msra.gmra.mxu1 %v878_v45  ;;  %v793_v49 = vpop.f32.mrf.mxu2 }
 0x383   :  { %1006 = vmatmul.f32.vlgmr.msra.gmra.mxu2 %v878_v45  ;;  %1029 = vmatmul.f32.vlgmr.msra.gmra.mxu3 %v878_v45  ;;  %v694_v47 = vpop.f32.mrf.mxu0 }
 0x384   :  { %v724_v48 = vadd.f32 %v723_v46, %v694_v47 }
 0x386   :  { %v797_v50 = vadd.f32 %v793_v49, %v724_v48 }
 0x388   :  { %v869_v52 = vadd.f32 %v865_v51, %v797_v50 }
 0x38a   :  { %v871_v53 = vmul.f32 0.25, %v869_v52 }
 0x38c   :  { %v877_v54 = vadd.f32 %v4406_v20, %v871_v53 }
 0x38e   :  { %v879_v55 = vmax.f32 %v877_v54, 0.0 }
 0x390   :  { %963 = vmatmul.f32.gmra.mxu0 %v879_v55  ;;  %986 = vmatmul.f32.gmra.mxu1 %v879_v55 }
 0x391   :  { %1009 = vmatmul.f32.gmra.mxu2 %v879_v55  ;;  %1032 = vmatmul.f32.gmra.mxu3 %v879_v55 }
 0x3ff   :  { %v961_v59 = vpop.f32.mrf.mxu0  ;;  %v984_v60 = vpop.f32.mrf.mxu1 }
 0x400   :  { %v1046_v61 = vmul.f32 %v1038_v57, %v961_v59  ;;  %v1047_v62 = vmul.f32 %v1039_v58, %v984_v60 }
 0x402   :  { %1070 = vmatmul.f32.vlgmr.msrb.gmra.mxu0 %v1046_v61  ;;  %1093 = vmatmul.f32.vlgmr.msrb.gmra.mxu1 %v1047_v62 }
 0x406   :  { %v1007_v1 = vpop.f32.mrf.mxu2  ;;  %v1030_v2 = vpop.f32.mrf.mxu3 }
 0x407   :  { %v1048_v3 = vmul.f32 %v1040_v63, %v1007_v1  ;;  %v1049_v4 = vmul.f32 %v1041_v0, %v1030_v2 }
 0x409   :  { %1116 = vmatmul.f32.vlgmr.msrb.gmra.mxu2 %v1048_v3  ;;  %1139 = vmatmul.f32.vlgmr.msrb.gmra.mxu3 %v1049_v4 }
 0x40d   :  { %v964_v5 = vpop.f32.mrf.mxu0  ;;  %v987_v7 = vpop.f32.mrf.mxu1 }
 0x40e   :  { %1175 = vmatpush.xpose.msra.mxu0 %v964_v5  ;;  %1195 = vmatpush.xpose.msra.mxu1 %v987_v7  ;;  %v1050_v21 = vmul.f32 %v1038_v57, %v964_v5  ;;  %v1051_v22 = vmul.f32 %v1039_v58, %v987_v7 }
 0x410   :  { %1073 = vmatmul.f32.gmra.mxu0 %v1050_v21  ;;  %1096 = vmatmul.f32.gmra.mxu1 %v1051_v22 }
 0x412   :  { %1176 = vmatpush.xpose.msra.mxu0 %v961_v59  ;;  %1196 = vmatpush.xpose.msra.mxu1 %v984_v60 }
 0x414   :  { %v1010_v11 = vpop.f32.mrf.mxu2  ;;  %v1033_v30 = vpop.f32.mrf.mxu3 }
 0x415   :  { %1215 = vmatpush.xpose.msra.mxu2 %v1010_v11  ;;  %1235 = vmatpush.xpose.msra.mxu3 %v1033_v30  ;;  %v1052_v27 = vmul.f32 %v1040_v63, %v1010_v11  ;;  %v1053_v28 = vmul.f32 %v1041_v0, %v1033_v30 }
 0x416   :  { %1345 = vmatpush.msrb.mxu0 %v987_v7  ;;  %1374 = vmatpush.msrb.mxu1 %v964_v5 }
 0x417   :  { %1119 = vmatmul.f32.gmra.mxu2 %v1052_v27  ;;  %1142 = vmatmul.f32.gmra.mxu3 %v1053_v28 }
 0x418   :  { %1346 = vmatpush.msrb.mxu0 %v984_v60  ;;  %1375 = vmatpush.msrb.mxu1 %v961_v59 }
 0x419   :  { %1177 = vmatmul.f32.vlgmr.msra.gmra.mxu0 %v1153_v29  ;;  %1197 = vmatmul.f32.vlgmr.msra.gmra.mxu1 %v1154_v37 }
 0x41a   :  { %1216 = vmatpush.xpose.msra.mxu2 %v1007_v1  ;;  %1236 = vmatpush.xpose.msra.mxu3 %v1030_v2 }
 0x41e   :  { %1444 = vmatpush.msrb.mxu2 %v1010_v11  ;;  %1516 = vmatpush.msrb.mxu3 %v1033_v30 }
 0x41f   :  { %1217 = vmatmul.f32.vlgmr.msra.gmra.mxu2 %v1155_v24  ;;  %1237 = vmatmul.f32.vlgmr.msra.gmra.mxu3 %v1156_v40 }
 0x420   :  { %1445 = vmatpush.msrb.mxu2 %v1007_v1  ;;  %1517 = vmatpush.msrb.mxu3 %v1030_v2 }
 0x47f   :  { %v1071_v38 = vpop.f32.mrf.mxu0  ;;  %v1094_v39 = vpop.f32.mrf.mxu1 }
 0x480   :  { %v1095_v41 = vadd.f32 %v1094_v39, %v1071_v38 }
 0x48c   :  { %v1117_v42 = vpop.f32.mrf.mxu2  ;;  %v1140_v9 = vpop.f32.mrf.mxu3 }
 0x48d   :  { %v1118_v8 = vadd.f32 %v1117_v42, %v1095_v41  ;;  %v1074_v31 = vpop.f32.mrf.mxu0  ;;  %v1097_v10 = vpop.f32.mrf.mxu1 }
 0x48e   :  { %v1098_v12 = vadd.f32 %v1097_v10, %v1074_v31 }
 0x48f   :  { %v1141_v6 = vadd.f32 %v1140_v9, %v1118_v8 }
 0x491   :  { %1243 = vperm.xlu2 %4398, %v1141_v6   ;;  %1456 = vperm.xlu1 %4397, %v1141_v6  }
 0x492   :  { %1384 = vperm.xlu0 %4396, %v1141_v6  }
 0x496   :  { %v1198_v19 = vpop.f32.mrf.mxu1 }
 0x499   :  { %4399 = vset.pattern.permute.xlu1 %v4719_v14  ;;  %4400 = vset.pattern.permute.xlu2 %v4717_v35  ;;  %v1178_v35 = vpop.f32.mrf.mxu0 }
 0x49a   :  { %v1120_v13 = vpop.f32.mrf.mxu2  ;;  %1285 = vperm.xlu1 %4399, %v1141_v6   ;;  %4403 = vset.pattern.permute.xlu0 %v4719_v14  ;;  %v1143_v32 = vpop.f32.mrf.mxu3  ;;  %v1199_v25 = vadd.f32 %v1198_v19, %v1178_v35 }
 0x49b   :  { %v1121_v23 = vadd.f32 %v1120_v13, %v1098_v12 }
 0x49d   :  { %v1144_v16 = vadd.f32 %v1143_v32, %v1121_v23 }
 0x49f   :  { %1289 = vperm.xlu0 %4403, %v1144_v16   ;;  %1388 = vperm.xlu2 %4400, %v1144_v16  }
 0x4a2   :  { %4401 = vset.pattern.permute.xlu1 %v4720_v15  ;;  %v1218_v26 = vpop.f32.mrf.mxu2  ;;  %v1238_v18 = vpop.f32.mrf.mxu3 }
 0x4a3   :  { %1460 = vperm.xlu1 %4401, %v1144_v16   ;;  %v1219_v14 = vadd.f32 %v1218_v26, %v1199_v25 }
 0x4a5   :  { %v1239_v20 = vadd.f32 %v1238_v18, %v1219_v14 }
 0x4a7   :  { %4402 = vset.pattern.permute.xlu2 %v4718_v36  ;;  %4404 = vset.pattern.permute.xlu0 %v4718_v36  ;;  %v1251_v43 = vperm.slane %v1239_v20, 0  ;;  %v1391_v49 = vperm.slane %v1239_v20, 2  ;;  %v1463_v50 = vperm.slane %v1239_v20, 3  ;;  %v1292_v0 = vperm.slane %v1239_v20, 1 }
 0x4a8   :  { %1248 = vperm.xlu2 %4402, %v1144_v16  }
 0x4ab   :  { %4405 = vset.pattern.permute.xlu1 %v4718_v36 }
 0x4eb   :  { %v1244_v44 = vpop.permute.xlu2 %1243 }
 0x4ec   :  { %v1252_v45 = vadd.f32 %v1251_v43, %v1244_v44 }
 0x4ee   :  { %vm1254_vm12 = vcmp.ge.f32.partialorder %v1252_v45, 0.0  ;;  %v1256_v15 = vmul.f32 0.2, %v1252_v45 }
 0x4f0   :  { %v1258_v46 = vsel %vm1254_vm12, %v1252_v45, %v1256_v15  ;;  %vm2044_vm12 = vcmask 158720  }
 0x4f1   :  { %v5352_v47 = vadd.f32 %v1258_v46, %v5142_v34 }
 0x4f3   :  { %v1262_v48 = vsel %vm604_vm4, %v5352_v47, -inf }
 0x4f4   :  { %1263 = vmax.xlane.f32.xlu0 %v1262_v48 }
 0x4f9   :  { %v1389_v36 = vpop.permute.xlu2 %1388 }
 0x4fa   :  { %v1393_v52 = vadd.f32 %v1391_v49, %v1389_v36 }
 0x4fc   :  { %v1397_v58 = vmul.f32 0.2, %v1393_v52  ;;  %vm1395_vm15 = vcmp.ge.f32.partialorder %v1393_v52, 0.0 }
 0x4fe   :  { %v1399_v5 = vsel %vm1395_vm15, %v1393_v52, %v1397_v58 }
 0x4ff   :  { %v1401_v22 = vadd.f32 %v1399_v5, %v5152_v17 }
 0x501   :  { %v1405_v37 = vsel %vm604_vm4, %v1401_v22, -inf }
 0x502   :  { %v1249_v60 = vpop.permute.xlu2 %1248 }
 0x503   :  { %v1457_v51 = vpop.permute.xlu1 %1456  ;;  %v1253_v2 = vadd.f32 %v1251_v43, %v1249_v60 }
 0x504   :  { %v1464_v53 = vadd.f32 %v1463_v50, %v1457_v51  ;;  %v1385_v54 = vpop.permute.xlu0 %1384 }
 0x505   :  { %v1392_v55 = vadd.f32 %v1391_v49, %v1385_v54  ;;  %v1257_v11 = vmul.f32 0.2, %v1253_v2  ;;  %vm1255_vm1 = vcmp.ge.f32.partialorder %v1253_v2, 0.0 }
 0x506   :  { %vm1466_vm13 = vcmp.ge.f32.partialorder %v1464_v53, 0.0  ;;  %v1468_v56 = vmul.f32 0.2, %v1464_v53 }
 0x507   :  { %vm1394_vm14 = vcmp.ge.f32.partialorder %v1392_v55, 0.0  ;;  %v1396_v57 = vmul.f32 0.2, %v1392_v55  ;;  %v1259_v38 = vsel %vm1255_vm1, %v1253_v2, %v1257_v11 }
 0x508   :  { %v1470_v59 = vsel %vm1466_vm13, %v1464_v53, %v1468_v56  ;;  %v1261_v9 = vadd.f32 %v1259_v38, %v5152_v17 }
 0x509   :  { %v1398_v61 = vsel %vm1394_vm14, %v1392_v55, %v1396_v57  ;;  %v1472_v62 = vadd.f32 %v1470_v59, %v5142_v34 }
 0x50a   :  { %v1400_v63 = vadd.f32 %v1398_v61, %v5142_v34  ;;  %v1265_v10 = vsel %vm604_vm4, %v1261_v9, -inf }
 0x50b   :  { %v1474_v1 = vsel %vm604_vm4, %v1472_v62, -inf }
 0x50c   :  { %v1286_v3 = vpop.permute.xlu1 %1285  ;;  %v1402_v4 = vsel %vm604_vm4, %v1400_v63, -inf  ;;  %1475 = vmax.xlane.f32.xlu2 %v1474_v1 }
 0x50d   :  { %v1293_v7 = vadd.f32 %v1292_v0, %v1286_v3  ;;  %1403 = vmax.xlane.f32.xlu1 %v1402_v4 }
 0x50f   :  { %vm1295_vm0 = vcmp.ge.f32.partialorder %v1293_v7, 0.0  ;;  %v1297_v21 = vmul.f32 0.2, %v1293_v7 }
 0x511   :  { %v1290_v30 = vpop.permute.xlu0 %1289  ;;  %v1299_v27 = vsel %vm1295_vm0, %v1293_v7, %v1297_v21  ;;  %v1582_v7 = vld [vmem:[%s4756_s25 + $0x10] sm:$0xf] }
 0x512   :  { %v1294_v28 = vadd.f32 %v1292_v0, %v1290_v30  ;;  %v1301_v29 = vadd.f32 %v1299_v27, %v5142_v34 }
 0x514   :  { %vm1296_vm2 = vcmp.ge.f32.partialorder %v1294_v28, 0.0  ;;  %v1298_v24 = vmul.f32 0.2, %v1294_v28  ;;  %1406 = vmax.xlane.f32.xlu2 %v1405_v37  ;;  %v1303_v40 = vsel %vm604_vm4, %v1301_v29, -inf }
 0x515   :  { %1304 = vmax.xlane.f32.xlu1 %v1303_v40  ;;  %v1461_v39 = vpop.permute.xlu1 %1460 }
 0x516   :  { %v1465_v41 = vadd.f32 %v1463_v50, %v1461_v39  ;;  %v1300_v42 = vsel %vm1296_vm2, %v1294_v28, %v1298_v24 }
 0x517   :  { %v1302_v8 = vadd.f32 %v1300_v42, %v5152_v17 }
 0x518   :  { %vm1467_vm3 = vcmp.ge.f32.partialorder %v1465_v41, 0.0  ;;  %v1469_v6 = vmul.f32 0.2, %v1465_v41 }
 0x519   :  { %v1306_v34 = vsel %vm604_vm4, %v1302_v8, -inf }
 0x51a   :  { %1307 = vmax.xlane.f32.xlu0 %v1306_v34  ;;  %v1471_v31 = vsel %vm1467_vm3, %v1465_v41, %v1469_v6 }
 0x51b   :  { %v1473_v12 = vadd.f32 %v1471_v31, %v5152_v17 }
 0x51c   :  { %1266 = vmax.xlane.f32.xlu2 %v1265_v10 }
 0x51d   :  { %v1477_v13 = vsel %vm604_vm4, %v1473_v12, -inf }
 0x51e   :  { %1478 = vmax.xlane.f32.xlu1 %v1477_v13 }
 0x567   :  { %v1264_v23 = vpop.xlane.xlu0 %1263 }
 0x568   :  { %v1268_v32 = vsub.f32 %v5352_v47, %v1264_v23 }
 0x56a   :  { %v1270_v16 = vmul.f32 1.442695, %v1268_v32 }
 0x56c   :  { %4457 = vpow2.f32 %v1270_v16  ;;  %v1644_v16 = vld [vmem:[%s4811_s27 + $0x120] sm:$0xff] }
 0x56d   :  { %1705 = vmatpush.msra.mxu1 %v1644_v16 }
 0x572   :  { %v4458_v35 = vpop.eup %4457 }
 0x573   :  { %v1274_v19 = vsel %vm604_vm4, %v4458_v35, 0.0 }
 0x574   :  { %1275 = vadd.xlane.f32.xlu0 %v1274_v19  ;;  %v1646_v19 = vld [vmem:[%s4811_s27 + $0x130] sm:$0xff] }
 0x575   :  { %1757 = vmatpush.msra.mxu3 %v1646_v19  ;;  %v1652_v19 = vld [vmem:[%s4811_s27 + $0x160] sm:$0xff] }
 0x57f   :  { %v1476_v25 = vpop.xlane.xlu2 %1475 }
 0x580   :  { %v1404_v26 = vpop.xlane.xlu1 %1403  ;;  %v1480_v14 = vsub.f32 %v1472_v62, %v1476_v25  ;;  %v1632_v25 = vld [vmem:[%s4811_s27 + $0xc0] sm:$0xff] }
 0x581   :  { %v1408_v18 = vsub.f32 %v1400_v63, %v1404_v26  ;;  %v1633_v26 = vld [vmem:[%s4811_s27 + $0xc8] sm:$0xff]  ;;  %1706 = vmatpush.msra.mxu1 %v1632_v25 }
 0x582   :  { %v1482_v20 = vmul.f32 1.442695, %v1480_v14  ;;  %v1634_v14 = vld [vmem:[%s4811_s27 + $0xd0] sm:$0xff]  ;;  %v1653_v25 = vld [vmem:[%s4811_s27 + $0x168] sm:$0xff] }
 0x583   :  { %v1410_v43 = vmul.f32 1.442695, %v1408_v18  ;;  %v1620_v18 = vld [vmem:[%s4811_s27 + $0x60] sm:$0xff]  ;;  %1758 = vmatpush.msra.mxu3 %v1634_v14  ;;  %v1655_v14 = vld [vmem:[%s4811_s27 + $0x178] sm:$0xff] }
 0x584   :  { %4459 = vpow2.f32 %v1482_v20  ;;  %v1621_v20 = vld [vmem:[%s4811_s27 + $0x68] sm:$0xff]  ;;  %1707 = vmatpush.msra.mxu1 %v1620_v18  ;;  %v1640_v18 = vld [vmem:[%s4811_s27 + $0x100] sm:$0xff] }
 0x585   :  { %4461 = vpow2.f32 %v1410_v43  ;;  %v1622_v43 = vld [vmem:[%s4811_s27 + $0x70] sm:$0xff] }
 0x586   :  { %1759 = vmatpush.msra.mxu3 %v1622_v43  ;;  %v1642_v43 = vld [vmem:[%s4811_s27 + $0x110] sm:$0xff] }
 0x587   :  { %v1407_v17 = vpop.xlane.xlu2 %1406 }
 0x588   :  { %v1409_v44 = vsub.f32 %v1401_v22, %v1407_v17  ;;  %v1305_v45 = vpop.xlane.xlu1 %1304 }
 0x589   :  { %v1309_v15 = vsub.f32 %v1301_v29, %v1305_v45  ;;  %v1608_v45 = vld [vmem:[%s4811_s27] sm:$0xff] }
 0x58a   :  { %v4460_v46 = vpop.eup %4459  ;;  %v1412_v47 = vmul.f32 1.442695, %v1409_v44  ;;  %1708 = vmatpush.msra.mxu1 %v1608_v45  ;;  %v1629_v45 = vld [vmem:[%s4811_s27 + $0xa8] sm:$0xff] }
 0x58b   :  { %v4462_v48 = vpop.eup %4461  ;;  %v1311_v36 = vmul.f32 1.442695, %v1309_v15  ;;  %v1486_v49 = vsel %vm604_vm4, %v4460_v46, 0.0  ;;  %v1609_v15 = vld [vmem:[%s4811_s27 + $0x8] sm:$0xff] }
 0x58c   :  { %4463 = vpow2.f32 %v1412_v47  ;;  %v1414_v50 = vsel %vm604_vm4, %v4462_v48, 0.0  ;;  %1487 = vadd.xlane.f32.xlu2 %v1486_v49  ;;  %v1561_v47 = vld [vmem:[%s4746_s17] sm:$0xff] }
 0x58d   :  { %4465 = vpow2.f32 %v1311_v36  ;;  %1415 = vadd.xlane.f32.xlu1 %v1414_v50  ;;  %v1308_v51 = vpop.xlane.xlu0 %1307  ;;  %1565 = vst.msk [vmem:[%s4959_s29 - $0x4] sm:$0xf0] %vm1564_vm5, %v1561_v47 }
 0x58e   :  { %v1310_v52 = vsub.f32 %v1302_v8, %v1308_v51 }
 0x58f   :  { %v1267_v53 = vpop.xlane.xlu2 %1266 }
 0x590   :  { %v1313_v54 = vmul.f32 1.442695, %v1310_v52  ;;  %v1269_v55 = vsub.f32 %v1261_v9, %v1267_v53 }
 0x591   :  { %v1479_v56 = vpop.xlane.xlu1 %1478 }
 0x592   :  { %v4464_v57 = vpop.eup %4463  ;;  %4467 = vpow2.f32 %v1313_v54  ;;  %v1272_v58 = vmul.f32 1.442695, %v1269_v55  ;;  %v1481_v59 = vsub.f32 %v1473_v12, %v1479_v56  ;;  %v1574_v54 = vld [vmem:[%s4751_s21] sm:$0xff] }
 0x593   :  { %v4466_v60 = vpop.eup %4465  ;;  %v1417_v61 = vsel %vm604_vm4, %v4464_v57, 0.0 }
 0x594   :  { %4469 = vpow2.f32 %v1272_v58  ;;  %v1484_v62 = vmul.f32 1.442695, %v1481_v59  ;;  %1418 = vadd.xlane.f32.xlu2 %v1417_v61  ;;  %v1315_v63 = vsel %vm604_vm4, %v4466_v60, 0.0 }
 0x595   :  { %1316 = vadd.xlane.f32.xlu1 %v1315_v63 }
 0x596   :  { %4471 = vpow2.f32 %v1484_v62 }
 0x598   :  { %v4468_v0 = vpop.eup %4467 }
 0x599   :  { %v1318_v2 = vsel %vm604_vm4, %v4468_v0, 0.0 }
 0x59a   :  { %v4470_v1 = vpop.eup %4469 }
 0x59b   :  { %v1277_v3 = vsel %vm604_vm4, %v4470_v1, 0.0 }
 0x59c   :  { %v4472_v4 = vpop.eup %4471  ;;  %1319 = vadd.xlane.f32.xlu2 %v1318_v2 }
 0x59d   :  { %1278 = vadd.xlane.f32.xlu1 %v1277_v3  ;;  %v1489_v5 = vsel %vm604_vm4, %v4472_v4, 0.0 }
 0x59e   :  { %1490 = vadd.xlane.f32.xlu0 %v1489_v5 }
 0x5b4   :  { %1596 = vperm.xlu2 %4402, %v1582_v7   ;;  %v1537_v7 = vld [vmem:[%s6367_s5] sm:$0xf] }
 0x5e7   :  { %v1276_v21 = vpop.xlane.xlu0 %1275 }
 0x5e8   :  { %4473 = vrcp.f32 %v1276_v21  ;;  %v1647_v21 = vld [vmem:[%s4811_s27 + $0x138] sm:$0xff] }
 0x5ee   :  { %v4474_v22 = vpop.eup %4473 }
 0x5ef   :  { %v1282_v11 = vmul.f32 %v4474_v22, %v4458_v35  ;;  %v1645_v35 = vld [vmem:[%s4811_s27 + $0x128] sm:$0xff]  ;;  %v1635_v22 = vld [vmem:[%s4811_s27 + $0xd8] sm:$0xff] }
 0x5f0   :  { %1731 = vmatpush.msra.mxu2 %v1645_v35  ;;  %v1576_v35 = vld [vmem:[%s4751_s21 + $0x10] sm:$0xf] }
 0x5f1   :  { %4215 = vmatmul.msk.f32.vlgmr.msrb.gmra.mxu1 %vm604_vm4, %v1282_v11  ;;  %v1623_v11 = vld [vmem:[%s4811_s27 + $0x78] sm:$0xff] }
 0x5f2   :  { %1732 = vmatpush.msra.mxu2 %v1633_v26  ;;  %v1654_v26 = vld [vmem:[%s4811_s27 + $0x170] sm:$0xff] }
 0x5f4   :  { %1733 = vmatpush.msra.mxu2 %v1621_v20  ;;  %v1641_v20 = vld [vmem:[%s4811_s27 + $0x108] sm:$0xff] }
 0x5f6   :  { %1734 = vmatpush.msra.mxu2 %v1609_v15  ;;  %v1630_v15 = vld [vmem:[%s4811_s27 + $0xb0] sm:$0xff] }
 0x5ff   :  { %v1488_v30 = vpop.xlane.xlu2 %1487 }
 0x600   :  { %v1416_v27 = vpop.xlane.xlu1 %1415  ;;  %4475 = vrcp.f32 %v1488_v30  ;;  %v1611_v30 = vld [vmem:[%s4811_s27 + $0x18] sm:$0xff] }
 0x601   :  { %4477 = vrcp.f32 %v1416_v27  ;;  %v1563_v27 = vld [vmem:[%s4746_s17 + $0x10] sm:$0xf] }
 0x602   :  { %1569 = vst.msk [vmem:[%s4959_s29 + $0xc] sm:$0xf] %vm1568_vm7, %v1563_v27 }
 0x606   :  { %v4476_v28 = vpop.eup %4475 }
 0x607   :  { %v4478_v29 = vpop.eup %4477  ;;  %v1494_v37 = vmul.f32 %v4476_v28, %v4460_v46  ;;  %v1419_v24 = vpop.xlane.xlu2 %1418  ;;  %v1610_v46 = vld [vmem:[%s4811_s27 + $0x10] sm:$0xff] }
 0x608   :  { %v1422_v40 = vmul.f32 %v4478_v29, %v4462_v48  ;;  %4479 = vrcp.f32 %v1419_v24  ;;  %v1317_v38 = vpop.xlane.xlu1 %1316  ;;  %v1562_v48 = vld [vmem:[%s4746_s17 + $0x8] sm:$0xff]  ;;  %1760 = vmatpush.msra.mxu3 %v1610_v46  ;;  %v1648_v24 = vld [vmem:[%s4811_s27 + $0x140] sm:$0xff]  ;;  %v1631_v46 = vld [vmem:[%s4811_s27 + $0xb8] sm:$0xff]  ;;  %s6369_s17 = sld [smem:[#allocation6_spill]] }
 0x609   :  { %4481 = vrcp.f32 %v1317_v38  ;;  %4219 = vmatmul.msk.f32.vlgmr.msrb.gmra.mxu3 %vm604_vm4, %v1494_v37  ;;  %1567 = vst.msk [vmem:[%s4959_s29 + $0x4] sm:$0xff] %vm1566_vm6, %v1562_v48  ;;  %v1575_v29 = vld [vmem:[%s4751_s21 + $0x8] sm:$0xff]  ;;  %1809 = vmatpush.msrb.mxu1 %v1648_v24  ;;  %v1650_v38 = vld [vmem:[%s4811_s27 + $0x150] sm:$0xff]  ;;  %s6370_s21 = sld [smem:[#allocation9_spill]] }
 0x60a   :  { %4217 = vmatmul.msk.f32.vlgmr.msrb.gmra.mxu2 %vm604_vm4, %v1422_v40  ;;  %v1649_v40 = vld [vmem:[%s4811_s27 + $0x148] sm:$0xff]  ;;  %1861 = vmatpush.msrb.mxu3 %v1650_v38 }
 0x60b   :  { %1835 = vmatpush.msrb.mxu2 %v1649_v40 }
 0x60e   :  { %v4480_v39 = vpop.eup %4479 }
 0x60f   :  { %v4482_v41 = vpop.eup %4481  ;;  %v1320_v42 = vpop.xlane.xlu2 %1319  ;;  %v1423_v8 = vmul.f32 %v4480_v39, %v4464_v57  ;;  %v1651_v39 = vld [vmem:[%s4811_s27 + $0x158] sm:$0xff] }
 0x610   :  { %v1323_v9 = vmul.f32 %v4482_v41, %v4466_v60  ;;  %4483 = vrcp.f32 %v1320_v42  ;;  %v1279_v6 = vpop.xlane.xlu1 %1278  ;;  %v1571_v56 = vld [vmem:[%s4959_s29] sm:$0xff]  ;;  %v1572_v28 = vld [vmem:[%s4959_s29 + $0x8] sm:$0xff] }
 0x611   :  { %4485 = vrcp.f32 %v1279_v6  ;;  %v1491_v34 = vpop.xlane.xlu0 %1490  ;;  %v5407_v58 = vadd.f32 %v1574_v54, %v1571_v56  ;;  %v5429_v37 = vadd.f32 %v1575_v29, %v1572_v28  ;;  %v1636_v41 = vld [vmem:[%s4811_s27 + $0xe0] sm:$0xff]  ;;  %v1637_v42 = vld [vmem:[%s4811_s27 + $0xe8] sm:$0xff] }
 0x612   :  { %4487 = vrcp.f32 %v1491_v34  ;;  %4218 = vmatmul.msk.f32.gmra.mxu2 %vm604_vm4, %v1423_v8  ;;  %4213 = vmatmul.msk.f32.vlgmr.msrb.gmra.mxu0 %vm604_vm4, %v1323_v9  ;;  %v1638_v8 = vld [vmem:[%s4811_s27 + $0xf0] sm:$0xff]  ;;  %v1639_v9 = vld [vmem:[%s4811_s27 + $0xf8] sm:$0xff]  ;;  %v1624_v6 = vld [vmem:[%s4811_s27 + $0x80] sm:$0xff] }
 0x613   :  { %1810 = vmatpush.msrb.mxu1 %v1636_v41  ;;  %1836 = vmatpush.msrb.mxu2 %v1637_v42  ;;  %v1625_v34 = vld [vmem:[%s4811_s27 + $0x88] sm:$0xff] }
 0x614   :  { %1862 = vmatpush.msrb.mxu3 %v1638_v8  ;;  %v1581_v29 = vld [vmem:[%s4756_s25 + $0x8] sm:$0xff] }
 0x615   :  { %1811 = vmatpush.msrb.mxu1 %v1624_v6  ;;  %1837 = vmatpush.msrb.mxu2 %v1625_v34 }
 0x616   :  { %v4484_v31 = vpop.eup %4483  ;;  %1591 = vperm.xlu1 %4405, %v1581_v29  }
 0x617   :  { %v4486_v10 = vpop.eup %4485  ;;  %v1324_v12 = vmul.f32 %v4484_v31, %v4468_v0  ;;  %v4408_v0 = vld [vmem:[%s6366_s0] ss:$0 sm:$0xff]  ;;  %v1626_v31 = vld [vmem:[%s4811_s27 + $0x90] sm:$0xff] }
 0x618   :  { %v4488_v13 = vpop.eup %4487  ;;  %v1283_v23 = vmul.f32 %v4486_v10, %v4470_v1  ;;  %v1627_v10 = vld [vmem:[%s4811_s27 + $0x98] sm:$0xff]  ;;  %1863 = vmatpush.msrb.mxu3 %v1626_v31 }
 0x619   :  { %v1495_v32 = vmul.f32 %v4488_v13, %v4472_v4  ;;  %v1613_v13 = vld [vmem:[%s4811_s27 + $0x28] sm:$0xff] }
 0x61a   :  { %4214 = vmatmul.msk.f32.gmra.mxu0 %vm604_vm4, %v1324_v12  ;;  %4216 = vmatmul.msk.f32.gmra.mxu1 %vm604_vm4, %v1283_v23  ;;  %v1612_v12 = vld [vmem:[%s4811_s27 + $0x20] sm:$0xff]  ;;  %v1614_v23 = vld [vmem:[%s4811_s27 + $0x30] sm:$0xff] }
 0x61b   :  { %4220 = vmatmul.msk.f32.gmra.mxu3 %vm604_vm4, %v1495_v32  ;;  %4225 = vmatmul.msk.f32.vlgmr.msra.gmra.mxu2 %vm1566_vm6, %v5407_v58  ;;  %v1615_v32 = vld [vmem:[%s4811_s27 + $0x38] sm:$0xff] }
 0x61c   :  { %1812 = vmatpush.msrb.mxu1 %v1612_v12  ;;  %1838 = vmatpush.msrb.mxu2 %v1613_v13 }
 0x61d   :  { %1864 = vmatpush.msrb.mxu3 %v1614_v23 }
 0x61e   :  { %1939 = vmatpush.msra.mxu2 %v1653_v25 }
 0x620   :  { %1940 = vmatpush.msra.mxu2 %v1641_v20 }
 0x622   :  { %4222 = vmatmul.msk.f32.vlgmr.msra.gmra.mxu1 %vm1566_vm6, %v5407_v58  ;;  %1941 = vmatpush.msra.mxu2 %v1629_v45  ;;  %v1657_v45 = vld [vmem:[%s6368_s9 + $0x8] sm:$0xf] }
 0x623   :  { %4228 = vmatmul.msk.f32.vlgmr.msra.gmra.mxu3 %vm1566_vm6, %v5407_v58  ;;  %4226 = vmatmul.msk.f32.gmra.mxu2 %vm1566_vm6, %v5429_v37 }
 0x624   :  { %1913 = vmatpush.msra.mxu1 %v1652_v19  ;;  %1965 = vmatpush.msra.mxu3 %v1654_v26 }
 0x626   :  { %1914 = vmatpush.msra.mxu1 %v1640_v18  ;;  %1966 = vmatpush.msra.mxu3 %v1642_v43 }
 0x628   :  { %1967 = vmatpush.msra.mxu3 %v1630_v15 }
 0x62a   :  { %4223 = vmatmul.msk.f32.gmra.mxu1 %vm1566_vm6, %v5429_v37 }
 0x62b   :  { %4229 = vmatmul.msk.f32.gmra.mxu3 %vm1566_vm6, %v5429_v37 }
 0x66e   :  { %v1377_v17 = vpop.f32.mrf.mxu1 }
 0x68c   :  { %v1519_v50 = vpop.f32.mrf.mxu3 }
 0x68d   :  { %v1447_v36 = vpop.f32.mrf.mxu2 }
 0x68f   :  { %v1348_v44 = vpop.f32.mrf.mxu0 }
 0x690   :  { %v1378_v49 = vadd.f32 %v1377_v17, %v1348_v44  ;;  %v1643_v17 = vld [vmem:[%s4811_s27 + $0x118] sm:$0xff]  ;;  %v1628_v44 = vld [vmem:[%s4811_s27 + $0xa0] sm:$0xff] }
 0x691   :  { %1915 = vmatpush.msra.mxu1 %v1628_v44 }
 0x692   :  { %v1453_v51 = vadd.f32 %v1447_v36, %v1378_v49  ;;  %v1616_v36 = vld [vmem:[%s4811_s27 + $0x40] sm:$0xff]  ;;  %v1617_v49 = vld [vmem:[%s4811_s27 + $0x48] sm:$0xff] }
 0x693   :  { %1916 = vmatpush.msra.mxu1 %v1616_v36  ;;  %1942 = vmatpush.msra.mxu2 %v1617_v49 }
 0x694   :  { %v1525_v57 = vadd.f32 %v1519_v50, %v1453_v51  ;;  %v1618_v50 = vld [vmem:[%s4811_s27 + $0x50] sm:$0xff]  ;;  %v1619_v51 = vld [vmem:[%s4811_s27 + $0x58] sm:$0xff]  ;;  %s6382_s27 = sld [smem:[#allocation21_spill]] }
 0x695   :  { %v1450_v59 = vpop.f32.mrf.mxu2  ;;  %1968 = vmatpush.msra.mxu3 %v1618_v50 }
 0x696   :  { %v1527_v62 = vmul.f32 0.25, %v1525_v57 }
 0x697   :  { %v1351_v52 = vpop.f32.mrf.mxu0  ;;  %v1380_v53 = vpop.f32.mrf.mxu1 }
 0x698   :  { %v1381_v55 = vadd.f32 %v1380_v53, %v1351_v52  ;;  %v1533_v3 = vadd.f32 %v4408_v0, %v1527_v62 }
 0x69a   :  { %v1454_v60 = vadd.f32 %v1450_v59, %v1381_v55  ;;  %v1535_v5 = vmax.f32 %v1533_v3, 0.0 }
 0x69e   :  { %v1522_v61 = vpop.f32.mrf.mxu3  ;;  %v1736_v54 = vpop.f32.mrf.mxu2 }
 0x69f   :  { %v1526_v63 = vadd.f32 %v1522_v61, %v1454_v60  ;;  %v1710_v52 = vpop.f32.mrf.mxu1 }
 0x6a1   :  { %v1528_v1 = vmul.f32 0.25, %v1526_v63 }
 0x6a3   :  { %v1534_v2 = vadd.f32 %v4408_v0, %v1528_v1 }
 0x6a5   :  { %v1536_v4 = vmax.f32 %v1534_v2, 0.0 }
 0x6a6   :  { %v5538_v55 = vpop.f32.mrf.mxu3  ;;  %v5542_v59 = vpop.f32.mrf.mxu2 }
 0x6a7   :  { %1555 = vmatpush.msra.mxu0 %v1536_v4  ;;  %v1713_v56 = vpop.f32.mrf.mxu1 }
 0x6a9   :  { %1556 = vmatpush.msra.mxu0 %v1535_v5 }
 0x6aa   :  { %4221 = vmatmul.msk.f32.vlgmr.msra.gmra.mxu0 %vm604_vm4, %v1537_v7  ;;  %vm2081_vm4 = vcmask 1043456  }
 0x6ab   :  { %1783 = vmatpush.msrb.mxu0 %v1647_v21  ;;  %v1580_v21 = vld [vmem:[%s4756_s25] sm:$0xff]  ;;  %s6371_s25 = sld [smem:[#allocation10_spill]] }
 0x6ac   :  { %1586 = vperm.xlu0 %4404, %v1580_v21  }
 0x6ad   :  { %1784 = vmatpush.msrb.mxu0 %v1635_v22  ;;  %v5556_v22 = vld [vmem:[%s6368_s9] sm:$0xff] }
 0x6ae   :  { %v5544_v60 = vpop.f32.mrf.mxu3  ;;  %v1665_v38 = vperm.slane %v5556_v22, 5  ;;  %v1666_v41 = vperm.slane %v5556_v22, 6  ;;  %v1660_v6 = vperm.slane %v5556_v22, 0  ;;  %v1667_v23 = vperm.slane %v5556_v22, 7 }
 0x6af   :  { %1785 = vmatpush.msrb.mxu0 %v1623_v11  ;;  %v1661_v19 = vperm.slane %v5556_v22, 1 }
 0x6b0   :  { %v1711_v13 = vadd.f32 %v1710_v52, %v1660_v6  ;;  %v1714_v15 = vadd.f32 %v1713_v56, %v1660_v6 }
 0x6b1   :  { %1786 = vmatpush.msrb.mxu0 %v1611_v30  ;;  %v1664_v30 = vperm.slane %v5556_v22, 4  ;;  %v1737_v43 = vadd.f32 %v1736_v54, %v1661_v19  ;;  %v1740_v54 = vadd.f32 %v5542_v59, %v1661_v19 }
 0x6b2   :  { %4231 = vmatmul.msk.f32.vlgmr.msrb.gmra.mxu0 %vm1566_vm6, %v5407_v58 }
 0x6b3   :  { %1887 = vmatpush.msra.mxu0 %v1651_v39 }
 0x6b5   :  { %1888 = vmatpush.msra.mxu0 %v1639_v9 }
 0x6b7   :  { %1889 = vmatpush.msra.mxu0 %v1627_v10 }
 0x6b9   :  { %1890 = vmatpush.msra.mxu0 %v1615_v32 }
 0x6ba   :  { %4232 = vmatmul.msk.f32.gmra.mxu0 %vm1566_vm6, %v5429_v37 }
 0x6bb   :  { %1991 = vmatpush.msrb.mxu0 %v1655_v14 }
 0x6bd   :  { %1992 = vmatpush.msrb.mxu0 %v1643_v17 }
 0x6bf   :  { %1993 = vmatpush.msrb.mxu0 %v1631_v46  ;;  %v1668_v46 = vperm.slane %v1657_v45, 0 }
 0x6c1   :  { %1994 = vmatpush.msrb.mxu0 %v1619_v51 }
 0x727   :  { %v5455_v16 = vpop.f32.mrf.mxu0 }
 0x728   :  { %1570 = vst.msk [vmem:[%s4959_s29 + $0x10] sm:$0xf] %vm1568_vm7, %v5455_v16 }
 0x72f   :  { %v1573_v47 = vld [vmem:[%s4959_s29 + $0x10] sm:$0xf]  ;;  %v5536_v53 = vpop.f32.mrf.mxu0  ;;  %s6372_s29 = sld [smem:[#allocation13_spill]] }
 0x730   :  { %v5474_v48 = vadd.f32 %v1576_v35, %v1573_v47 }
 0x732   :  { %4224 = vmatmul.msk.f32.gmra.mxu1 %vm1566_vm6, %v5474_v48  ;;  %4227 = vmatmul.msk.f32.gmra.mxu2 %vm1566_vm6, %v5474_v48 }
 0x733   :  { %4230 = vmatmul.msk.f32.gmra.mxu3 %vm1566_vm6, %v5474_v48  ;;  %4233 = vmatmul.msk.f32.gmra.mxu0 %vm1566_vm6, %v5474_v48 }
 0x737   :  { %v5540_v57 = vpop.f32.mrf.mxu0 }
 0x73a   :  { %4234 = vmatmul.msk.f32.vlgmr.msrb.gmra.mxu1 %vm1566_vm6, %v5407_v58  ;;  %4237 = vmatmul.msk.f32.vlgmr.msrb.gmra.mxu2 %vm1566_vm6, %v5407_v58 }
 0x73b   :  { %4240 = vmatmul.msk.f32.vlgmr.msrb.gmra.mxu3 %vm1566_vm6, %v5407_v58  ;;  %4243 = vmatmul.msk.f32.vlgmr.msra.gmra.mxu0 %vm1566_vm6, %v5407_v58 }
 0x742   :  { %4235 = vmatmul.msk.f32.gmra.mxu1 %vm1566_vm6, %v5429_v37  ;;  %4238 = vmatmul.msk.f32.gmra.mxu2 %vm1566_vm6, %v5429_v37 }
 0x743   :  { %4241 = vmatmul.msk.f32.gmra.mxu3 %vm1566_vm6, %v5429_v37  ;;  %4244 = vmatmul.msk.f32.gmra.mxu0 %vm1566_vm6, %v5429_v37 }
 0x74a   :  { %4236 = vmatmul.msk.f32.gmra.mxu1 %vm1566_vm6, %v5474_v48  ;;  %4239 = vmatmul.msk.f32.gmra.mxu2 %vm1566_vm6, %v5474_v48 }
 0x74b   :  { %4242 = vmatmul.msk.f32.gmra.mxu3 %vm1566_vm6, %v5474_v48  ;;  %4245 = vmatmul.msk.f32.gmra.mxu0 %vm1566_vm6, %v5474_v48 }
 0x752   :  { %4246 = vmatmul.msk.f32.vlgmr.msra.gmra.mxu1 %vm1566_vm6, %v5407_v58  ;;  %4249 = vmatmul.msk.f32.vlgmr.msra.gmra.mxu2 %vm1566_vm6, %v5407_v58 }
 0x753   :  { %4252 = vmatmul.msk.f32.vlgmr.msra.gmra.mxu3 %vm1566_vm6, %v5407_v58  ;;  %4255 = vmatmul.msk.f32.vlgmr.msrb.gmra.mxu0 %vm1566_vm6, %v5407_v58 }
 0x75a   :  { %4247 = vmatmul.msk.f32.gmra.mxu1 %vm1566_vm6, %v5429_v37  ;;  %4250 = vmatmul.msk.f32.gmra.mxu2 %vm1566_vm6, %v5429_v37 }
 0x75b   :  { %4253 = vmatmul.msk.f32.gmra.mxu3 %vm1566_vm6, %v5429_v37  ;;  %4256 = vmatmul.msk.f32.gmra.mxu0 %vm1566_vm6, %v5429_v37 }
 0x762   :  { %4248 = vmatmul.msk.f32.gmra.mxu1 %vm1566_vm6, %v5474_v48  ;;  %4251 = vmatmul.msk.f32.gmra.mxu2 %vm1566_vm6, %v5474_v48 }
 0x763   :  { %4254 = vmatmul.msk.f32.gmra.mxu3 %vm1566_vm6, %v5474_v48  ;;  %4257 = vmatmul.msk.f32.gmra.mxu0 %vm1566_vm6, %v5474_v48 }
 0x7af   :  { %v5546_v61 = vpop.f32.mrf.mxu1 }
 0x7b0   :  { %v5548_v62 = vpop.f32.mrf.mxu0  ;;  %v1717_v56 = vadd.f32 %v5546_v61, %v1660_v6 }
 0x7b5   :  { %v5550_v63 = vpop.f32.mrf.mxu2 }
 0x7b6   :  { %v5552_v0 = vpop.f32.mrf.mxu3  ;;  %v1743_v61 = vadd.f32 %v5550_v63, %v1661_v19 }
 0x7b7   :  { %v1814_v1 = vpop.f32.mrf.mxu1 }
 0x7b8   :  { %v1892_v2 = vpop.f32.mrf.mxu0  ;;  %v1815_v31 = vadd.f32 %v1814_v1, %v1664_v30 }
 0x7b9   :  { %v1893_v50 = vadd.f32 %v1892_v2, %v1667_v23 }
 0x7bd   :  { %v1840_v3 = vpop.f32.mrf.mxu2 }
 0x7be   :  { %v1866_v4 = vpop.f32.mrf.mxu3  ;;  %v1841_v26 = vadd.f32 %v1840_v3, %v1665_v38 }
 0x7bf   :  { %v1817_v5 = vpop.f32.mrf.mxu1  ;;  %v1867_v17 = vadd.f32 %v1866_v4, %v1666_v41  ;;  %v1669_v4 = vperm.slane %v1657_v45, 1 }
 0x7c0   :  { %v1895_v7 = vpop.f32.mrf.mxu0  ;;  %v1818_v39 = vadd.f32 %v1817_v5, %v1664_v30  ;;  %v1670_v5 = vperm.slane %v1657_v45, 2 }
 0x7c1   :  { %v1896_v44 = vadd.f32 %v1895_v7, %v1667_v23 }
 0x7c5   :  { %v1843_v11 = vpop.f32.mrf.mxu2 }
 0x7c6   :  { %v1869_v27 = vpop.f32.mrf.mxu3  ;;  %v1844_v12 = vadd.f32 %v1843_v11, %v1665_v38 }
 0x7c7   :  { %v1820_v28 = vpop.f32.mrf.mxu1  ;;  %v1870_v32 = vadd.f32 %v1869_v27, %v1666_v41 }
 0x7c8   :  { %v1821_v24 = vadd.f32 %v1820_v28, %v1664_v30  ;;  %v1898_v40 = vpop.f32.mrf.mxu0  ;;  %v1671_v30 = vperm.slane %v1657_v45, 3 }
 0x7c9   :  { %v1899_v18 = vadd.f32 %v1898_v40, %v1667_v23 }
 0x7ca   :  { %2018 = vmatpush.xpose.msrb.mxu1 %v1821_v24  ;;  %v1662_v24 = vperm.slane %v5556_v22, 2 }
 0x7cc   :  { %v1769_v6 = vadd.f32 %v5552_v0, %v1662_v24 }
 0x7cd   :  { %v1846_v42 = vpop.f32.mrf.mxu2 }
 0x7ce   :  { %v1847_v8 = vadd.f32 %v1846_v42, %v1665_v38  ;;  %v1872_v9 = vpop.f32.mrf.mxu3  ;;  %2019 = vmatpush.xpose.msrb.mxu1 %v1818_v39  ;;  %v1763_v38 = vadd.f32 %v5538_v55, %v1662_v24 }
 0x7cf   :  { %v1918_v34 = vpop.f32.mrf.mxu1  ;;  %v1873_v10 = vadd.f32 %v1872_v9, %v1666_v41  ;;  %v1766_v9 = vadd.f32 %v5544_v60, %v1662_v24  ;;  %v1592_v60 = vpop.permute.xlu1 %1591 }
 0x7d0   :  { %2124 = vmatpush.xpose.msrb.mxu3 %v1847_v8  ;;  %v1996_v35 = vpop.f32.mrf.mxu0  ;;  %v1919_v3 = vadd.f32 %v1918_v34, %v1668_v46  ;;  %v1663_v8 = vperm.slane %v5556_v22, 3 }
 0x7d1   :  { %v1997_v42 = vadd.f32 %v1996_v35, %v1671_v30  ;;  %v1597_v35 = vpop.permute.xlu2 %1596 }
 0x7d2   :  { %2020 = vmatpush.xpose.msrb.mxu1 %v1815_v31  ;;  %v1789_v63 = vadd.f32 %v5536_v53, %v1663_v8  ;;  %v1792_v55 = vadd.f32 %v5540_v57, %v1663_v8  ;;  %v1795_v34 = vadd.f32 %v5548_v62, %v1663_v8  ;;  %v1587_v31 = vpop.permute.xlu0 %1586 }
 0x7d4   :  { %2125 = vmatpush.xpose.msrb.mxu3 %v1844_v12 }
 0x7d5   :  { %v1944_v25 = vpop.f32.mrf.mxu2  ;;  %2021 = vmatmul.f32.vlgmr.msrb.gmra.mxu1 %v1711_v13 }
 0x7d6   :  { %2227 = vmatpush.xpose.msra.mxu1 %v1873_v10  ;;  %v1970_v14 = vpop.f32.mrf.mxu3  ;;  %v1945_v59 = vadd.f32 %v1944_v25, %v1669_v4  ;;  %v4407_v10 = vld [vmem:[%s6369_s17] ss:$0 sm:$0xff] }
 0x7d7   :  { %v1921_v20 = vpop.f32.mrf.mxu1  ;;  %v1971_v40 = vadd.f32 %v1970_v14, %v1670_v5  ;;  %vm1602_vm8 = vcmp.eq.f32.partialorder %v1587_v31, %v4407_v10  ;;  %vm1603_vm10 = vcmp.eq.f32.partialorder %v1592_v60, %v4407_v10  ;;  %vm1604_vm11 = vcmp.eq.f32.partialorder %v1597_v35, %v4407_v10 }
 0x7d8   :  { %2126 = vmatpush.xpose.msrb.mxu3 %v1841_v26  ;;  %v1999_v36 = vpop.f32.mrf.mxu0  ;;  %v1922_v52 = vadd.f32 %v1921_v20, %v1668_v46  ;;  %v5583_v22 = vsel %vm1602_vm8, 0.0, %v4721_v33  ;;  %v5591_v62 = vsel %vm1603_vm10, 0.0, %v4721_v33 }
 0x7d9   :  { %v2000_v39 = vadd.f32 %v1999_v36, %v1671_v30 }
 0x7da   :  { %2228 = vmatpush.xpose.msra.mxu1 %v1870_v32 }
 0x7db   :  { %2127 = vmatmul.f32.vlgmr.msrb.gmra.mxu3 %v1737_v43 }
 0x7dc   :  { %2330 = vmatpush.xpose.msra.mxu3 %v1899_v18 }
 0x7dd   :  { %v1947_v47 = vpop.f32.mrf.mxu2  ;;  %2024 = vmatmul.f32.gmra.mxu1 %v1714_v15 }
 0x7de   :  { %2229 = vmatpush.xpose.msra.mxu1 %v1867_v17  ;;  %v1973_v49 = vpop.f32.mrf.mxu3  ;;  %v1948_v21 = vadd.f32 %v1947_v47, %v1669_v4  ;;  %v5604_v17 = vsel %vm1604_vm11, 0.0, %v4721_v33 }
 0x7df   :  { %v1924_v51 = vpop.f32.mrf.mxu1  ;;  %v1974_v27 = vadd.f32 %v1973_v49, %v1670_v5 }
 0x7e0   :  { %2331 = vmatpush.xpose.msra.mxu3 %v1896_v44  ;;  %v1925_v1 = vadd.f32 %v1924_v51, %v1668_v46  ;;  %v2002_v29 = vpop.f32.mrf.mxu0 }
 0x7e1   :  { %v2003_v41 = vadd.f32 %v2002_v29, %v1671_v30 }
 0x7e2   :  { %4258 = vmatpush.msk.msrb.mxu2 %vm2081_vm4, %v1925_v1 }
 0x7e3   :  { %2130 = vmatmul.f32.gmra.mxu3 %v1740_v54 }
 0x7e4   :  { %2332 = vmatpush.xpose.msra.mxu3 %v1893_v50  ;;  %2099 = vmatpush.msrb.mxu2 %v1922_v52 }
 0x7e5   :  { %v1950_v7 = vpop.f32.mrf.mxu2  ;;  %2027 = vmatmul.f32.gmra.mxu1 %v1717_v56 }
 0x7e6   :  { %v1951_v2 = vadd.f32 %v1950_v7, %v1669_v4  ;;  %v1976_v11 = vpop.f32.mrf.mxu3  ;;  %2100 = vmatpush.msrb.mxu2 %v1919_v3 }
 0x7e7   :  { %v1977_v28 = vadd.f32 %v1976_v11, %v1670_v5 }
 0x7e8   :  { %4262 = vmatpush.msk.msra.mxu0 %vm2081_vm4, %v1951_v2 }
 0x7e9   :  { %4266 = vmatpush.msk.msra.mxu2 %vm2081_vm4, %v1977_v28 }
 0x7ea   :  { %2202 = vmatpush.msra.mxu0 %v1948_v21 }
 0x7eb   :  { %2133 = vmatmul.f32.gmra.mxu3 %v1743_v61  ;;  %2305 = vmatpush.msra.mxu2 %v1974_v27 }
 0x7ec   :  { %2203 = vmatpush.msra.mxu0 %v1945_v59 }
 0x7ed   :  { %2230 = vmatmul.f32.vlgmr.msra.gmra.mxu1 %v1763_v38  ;;  %2306 = vmatpush.msra.mxu2 %v1971_v40 }
 0x7ee   :  { %4270 = vmatpush.msk.msrb.mxu0 %vm2081_vm4, %v2003_v41 }
 0x7f0   :  { %2408 = vmatpush.msrb.mxu0 %v2000_v39 }
 0x7f2   :  { %2409 = vmatpush.msrb.mxu0 %v1997_v42 }
 0x7f3   :  { %2333 = vmatmul.f32.vlgmr.msra.gmra.mxu3 %v1789_v63 }
 0x7f5   :  { %2233 = vmatmul.f32.gmra.mxu1 %v1766_v9 }
 0x7fb   :  { %2336 = vmatmul.f32.gmra.mxu3 %v1792_v55 }
 0x7fd   :  { %2236 = vmatmul.f32.gmra.mxu1 %v1769_v6 }
 0x803   :  { %2339 = vmatmul.f32.gmra.mxu3 %v1795_v34 }
 0x852   :  { %v2022_v53 = vpop.f32.mrf.mxu1 }
 0x853   :  { %v2031_v12 = vmul.f32 0.35355338, %v2022_v53 }
 0x855   :  { %v5586_v13 = vadd.f32 %v2031_v12, %v5583_v22 }
 0x857   :  { %v2038_v57 = vsel %vm2037_vm9, %v5586_v13, -inf }
 0x858   :  { %2039 = vmax.xlane.f32.xlu1 %v2038_v57 }
 0x85a   :  { %v2025_v0 = vpop.f32.mrf.mxu1 }
 0x85b   :  { %v2032_v23 = vmul.f32 0.35355338, %v2025_v0 }
 0x85d   :  { %v5594_v32 = vadd.f32 %v2032_v23, %v5591_v62 }
 0x85e   :  { %v2128_v19 = vpop.f32.mrf.mxu3 }
 0x85f   :  { %v2137_v25 = vmul.f32 0.35355338, %v2128_v19  ;;  %v2041_v26 = vsel %vm2037_vm9, %v5594_v32, -inf }
 0x860   :  { %2042 = vmax.xlane.f32.xlu2 %v2041_v26 }
 0x861   :  { %v5599_v14 = vadd.f32 %v2137_v25, %v5583_v22 }
 0x862   :  { %v2028_v18 = vpop.f32.mrf.mxu1 }
 0x863   :  { %v2033_v20 = vmul.f32 0.35355338, %v2028_v18  ;;  %v2143_v43 = vsel %vm2037_vm9, %v5599_v14, -inf }
 0x864   :  { %2144 = vmax.xlane.f32.xlu0 %v2143_v43 }
 0x865   :  { %v2036_v44 = vadd.f32 %v2033_v20, %v5604_v17 }
 0x866   :  { %v2131_v45 = vpop.f32.mrf.mxu3 }
 0x867   :  { %v2138_v15 = vmul.f32 0.35355338, %v2131_v45  ;;  %v2045_v46 = vsel %vm2044_vm12, %v2036_v44, -inf }
 0x868   :  { %2046 = vmax.xlane.f32.xlu1 %v2045_v46 }
 0x869   :  { %v5609_v47 = vadd.f32 %v2138_v15, %v5591_v62 }
 0x86a   :  { %v2231_v36 = vpop.f32.mrf.mxu1 }
 0x86b   :  { %v2240_v49 = vmul.f32 0.35355338, %v2231_v36  ;;  %v2146_v50 = vsel %vm2037_vm9, %v5609_v47, -inf }
 0x86c   :  { %2147 = vmax.xlane.f32.xlu2 %v2146_v50 }
 0x86d   :  { %v5614_v33 = vadd.f32 %v2240_v49, %v5583_v22 }
 0x86e   :  { %v2134_v51 = vpop.f32.mrf.mxu3 }
 0x86f   :  { %v2139_v52 = vmul.f32 0.35355338, %v2134_v51  ;;  %v2246_v1 = vsel %vm2037_vm9, %v5614_v33, -inf }
 0x870   :  { %2247 = vmax.xlane.f32.xlu1 %v2246_v1 }
 0x871   :  { %v5619_v54 = vadd.f32 %v2139_v52, %v5604_v17 }
 0x872   :  { %v2234_v3 = vpop.f32.mrf.mxu1 }
 0x873   :  { %v2241_v4 = vmul.f32 0.35355338, %v2234_v3  ;;  %v2149_v56 = vsel %vm2044_vm12, %v5619_v54, -inf }
 0x874   :  { %2150 = vmax.xlane.f32.xlu2 %v2149_v56 }
 0x875   :  { %v5624_v5 = vadd.f32 %v2241_v4, %v5591_v62 }
 0x876   :  { %v2334_v7 = vpop.f32.mrf.mxu3 }
 0x877   :  { %v2343_v21 = vmul.f32 0.35355338, %v2334_v7  ;;  %v2249_v2 = vsel %vm2037_vm9, %v5624_v5, -inf }
 0x878   :  { %2250 = vmax.xlane.f32.xlu0 %v2249_v2 }
 0x879   :  { %v5629_v11 = vadd.f32 %v2343_v21, %v5583_v22 }
 0x87a   :  { %v2237_v30 = vpop.f32.mrf.mxu1 }
 0x87b   :  { %v2242_v27 = vmul.f32 0.35355338, %v2237_v30  ;;  %v2349_v28 = vsel %vm2037_vm9, %v5629_v11, -inf }
 0x87c   :  { %2350 = vmax.xlane.f32.xlu1 %v2349_v28 }
 0x87d   :  { %v5634_v59 = vadd.f32 %v2242_v27, %v5604_v17 }
 0x87e   :  { %v2337_v29 = vpop.f32.mrf.mxu3 }
 0x87f   :  { %v2344_v24 = vmul.f32 0.35355338, %v2337_v29  ;;  %v2252_v61 = vsel %vm2044_vm12, %v5634_v59, -inf }
 0x880   :  { %2253 = vmax.xlane.f32.xlu2 %v2252_v61 }
 0x881   :  { %v5639_v40 = vadd.f32 %v2344_v24, %v5591_v62 }
 0x883   :  { %v2352_v38 = vsel %vm2037_vm9, %v5639_v40, -inf }
 0x884   :  { %2353 = vmax.xlane.f32.xlu0 %v2352_v38 }
 0x886   :  { %v2340_v39 = vpop.f32.mrf.mxu3 }
 0x887   :  { %v2345_v41 = vmul.f32 0.35355338, %v2340_v39 }
 0x889   :  { %v5644_v42 = vadd.f32 %v2345_v41, %v5604_v17 }
 0x88b   :  { %v2355_v8 = vsel %vm2044_vm12, %v5644_v42, -inf }
 0x88c   :  { %2356 = vmax.xlane.f32.xlu2 %v2355_v8 }
 0x8cb   :  { %v2040_v63 = vpop.xlane.xlu1 %2039 }
 0x8cc   :  { %v2048_v9 = vsub.f32 %v5586_v13, %v2040_v63 }
 0x8ce   :  { %v2051_v55 = vmul.f32 1.442695, %v2048_v9 }
 0x8d0   :  { %4489 = vpow2.f32 %v2051_v55 }
 0x8d3   :  { %v2043_v6 = vpop.xlane.xlu2 %2042 }
 0x8d4   :  { %v2049_v34 = vsub.f32 %v5594_v32, %v2043_v6 }
 0x8d6   :  { %v5650_v31 = vpop.eup %4489  ;;  %v2053_v10 = vmul.f32 1.442695, %v2049_v34 }
 0x8d7   :  { %v2145_v53 = vpop.xlane.xlu0 %2144  ;;  %v2057_v12 = vsel %vm2037_vm9, %v5650_v31, 0.0 }
 0x8d8   :  { %4491 = vpow2.f32 %v2053_v10  ;;  %v2152_v60 = vsub.f32 %v5599_v14, %v2145_v53  ;;  %2058 = vadd.xlane.f32.xlu1 %v2057_v12 }
 0x8da   :  { %v2155_v57 = vmul.f32 1.442695, %v2152_v60 }
 0x8db   :  { %v2047_v0 = vpop.xlane.xlu1 %2046 }
 0x8dc   :  { %4493 = vpow2.f32 %v2155_v57  ;;  %v2050_v13 = vsub.f32 %v2036_v44, %v2047_v0 }
 0x8de   :  { %v5655_v23 = vpop.eup %4491  ;;  %v2055_v35 = vmul.f32 1.442695, %v2050_v13 }
 0x8df   :  { %v2148_v19 = vpop.xlane.xlu2 %2147  ;;  %v2060_v32 = vsel %vm2037_vm9, %v5655_v23, 0.0 }
 0x8e0   :  { %4495 = vpow2.f32 %v2055_v35  ;;  %v2153_v25 = vsub.f32 %v5609_v47, %v2148_v19  ;;  %2061 = vadd.xlane.f32.xlu0 %v2060_v32 }
 0x8e2   :  { %v5660_v26 = vpop.eup %4493  ;;  %v2157_v18 = vmul.f32 1.442695, %v2153_v25 }
 0x8e3   :  { %v2248_v14 = vpop.xlane.xlu1 %2247  ;;  %v2161_v20 = vsel %vm2037_vm9, %v5660_v26, 0.0 }
 0x8e4   :  { %4497 = vpow2.f32 %v2157_v18  ;;  %v2255_v43 = vsub.f32 %v5614_v33, %v2248_v14  ;;  %2162 = vadd.xlane.f32.xlu1 %v2161_v20  ;;  %v2434_v20 = vld [vmem:[%s6370_s21 + $0x70] sm:$0xff] }
 0x8e6   :  { %v5665_v44 = vpop.eup %4495  ;;  %v2258_v45 = vmul.f32 1.442695, %v2255_v43 }
 0x8e7   :  { %v2151_v15 = vpop.xlane.xlu2 %2150  ;;  %v2063_v46 = vsel %vm2044_vm12, %v5665_v44, 0.0 }
 0x8e8   :  { %4499 = vpow2.f32 %v2258_v45  ;;  %v2154_v47 = vsub.f32 %v5619_v54, %v2151_v15  ;;  %2064 = vadd.xlane.f32.xlu2 %v2063_v46  ;;  %v2451_v45 = vld [vmem:[%s6370_s21 + $0xf8] sm:$0xff]  ;;  %v2433_v46 = vld [vmem:[%s6370_s21 + $0x68] sm:$0xff] }
 0x8ea   :  { %v5670_v36 = vpop.eup %4497  ;;  %v2159_v49 = vmul.f32 1.442695, %v2154_v47  ;;  %v2450_v47 = vld [vmem:[%s6370_s21 + $0xf0] sm:$0xff] }
 0x8eb   :  { %v2251_v50 = vpop.xlane.xlu0 %2250  ;;  %v2164_v51 = vsel %vm2037_vm9, %v5670_v36, 0.0 }
 0x8ec   :  { %4501 = vpow2.f32 %v2159_v49  ;;  %v2256_v33 = vsub.f32 %v5624_v5, %v2251_v50  ;;  %2165 = vadd.xlane.f32.xlu0 %v2164_v51  ;;  %v2449_v49 = vld [vmem:[%s6370_s21 + $0xe8] sm:$0xff] }
 0x8ee   :  { %v5675_v52 = vpop.eup %4499  ;;  %v2260_v1 = vmul.f32 1.442695, %v2256_v33 }
 0x8ef   :  { %v2351_v3 = vpop.xlane.xlu1 %2350  ;;  %v2264_v4 = vsel %vm2037_vm9, %v5675_v52, 0.0 }
 0x8f0   :  { %4503 = vpow2.f32 %v2260_v1  ;;  %v2358_v54 = vsub.f32 %v5629_v11, %v2351_v3  ;;  %2265 = vadd.xlane.f32.xlu1 %v2264_v4  ;;  %v2448_v1 = vld [vmem:[%s6370_s21 + $0xe0] sm:$0xff]  ;;  %v2467_v3 = vld [vmem:[%s6370_s21 + $0x178] sm:$0xff]  ;;  %v2430_v4 = vld [vmem:[%s6370_s21 + $0x50] sm:$0xff] }
 0x8f1   :  { %2540 = vmatpush.msrb.mxu3 %v2467_v3  ;;  %v2455_v3 = vld [vmem:[%s6370_s21 + $0x118] sm:$0xff] }
 0x8f2   :  { %v5680_v56 = vpop.eup %4501  ;;  %v2361_v7 = vmul.f32 1.442695, %v2358_v54  ;;  %v2447_v54 = vld [vmem:[%s6370_s21 + $0xd8] sm:$0xff] }
 0x8f3   :  { %v2254_v21 = vpop.xlane.xlu2 %2253  ;;  %v2167_v2 = vsel %vm2044_vm12, %v5680_v56, 0.0 }
 0x8f4   :  { %4505 = vpow2.f32 %v2361_v7  ;;  %v2257_v5 = vsub.f32 %v5634_v59, %v2254_v21  ;;  %2168 = vadd.xlane.f32.xlu2 %v2167_v2  ;;  %v2466_v7 = vld [vmem:[%s6370_s21 + $0x170] sm:$0xff] }
 0x8f5   :  { %2541 = vmatpush.msrb.mxu3 %v2466_v7  ;;  %v2473_v7 = vld [vmem:[%s6370_s21 + $0x1a8] sm:$0xff] }
 0x8f6   :  { %v5685_v30 = vpop.eup %4503  ;;  %v2262_v27 = vmul.f32 1.442695, %v2257_v5 }
 0x8f7   :  { %v2354_v28 = vpop.xlane.xlu0 %2353  ;;  %v2267_v29 = vsel %vm2037_vm9, %v5685_v30, 0.0 }
 0x8f8   :  { %4507 = vpow2.f32 %v2262_v27  ;;  %v2359_v11 = vsub.f32 %v5639_v40, %v2354_v28  ;;  %2268 = vadd.xlane.f32.xlu0 %v2267_v29  ;;  %v2429_v27 = vld [vmem:[%s6370_s21 + $0x48] sm:$0xff]  ;;  %v2446_v28 = vld [vmem:[%s6370_s21 + $0xd0] sm:$0xff]  ;;  %v2428_v29 = vld [vmem:[%s6370_s21 + $0x40] sm:$0xff] }
 0x8fa   :  { %v5690_v24 = vpop.eup %4505  ;;  %v2363_v61 = vmul.f32 1.442695, %v2359_v11  ;;  %v2445_v11 = vld [vmem:[%s6370_s21 + $0xc8] sm:$0xff] }
 0x8fb   :  { %v2367_v38 = vsel %vm2037_vm9, %v5690_v24, 0.0 }
 0x8fc   :  { %4509 = vpow2.f32 %v2363_v61  ;;  %2368 = vadd.xlane.f32.xlu1 %v2367_v38 }
 0x8fe   :  { %v5694_v59 = vpop.eup %4507 }
 0x8ff   :  { %v2357_v39 = vpop.xlane.xlu2 %2356  ;;  %v2270_v41 = vsel %vm2044_vm12, %v5694_v59, 0.0 }
 0x900   :  { %v2360_v8 = vsub.f32 %v5644_v42, %v2357_v39  ;;  %2271 = vadd.xlane.f32.xlu2 %v2270_v41  ;;  %v2427_v39 = vld [vmem:[%s6370_s21 + $0x38] sm:$0xff]  ;;  %v2444_v41 = vld [vmem:[%s6370_s21 + $0xc0] sm:$0xff] }
 0x902   :  { %v5699_v63 = vpop.eup %4509  ;;  %v2365_v40 = vmul.f32 1.442695, %v2360_v8  ;;  %v2426_v8 = vld [vmem:[%s6370_s21 + $0x30] sm:$0xff] }
 0x903   :  { %v2370_v9 = vsel %vm2037_vm9, %v5699_v63, 0.0 }
 0x904   :  { %4511 = vpow2.f32 %v2365_v40  ;;  %2371 = vadd.xlane.f32.xlu0 %v2370_v9  ;;  %v2443_v40 = vld [vmem:[%s6370_s21 + $0xb8] sm:$0xff] }
 0x90a   :  { %v5703_v55 = vpop.eup %4511 }
 0x90b   :  { %v2373_v6 = vsel %vm2044_vm12, %v5703_v55, 0.0 }
 0x90c   :  { %2374 = vadd.xlane.f32.xlu1 %v2373_v6 }
 0x94b   :  { %v2059_v34 = vpop.xlane.xlu1 %2058 }
 0x94c   :  { %4513 = vrcp.f32 %v2059_v34  ;;  %v2442_v34 = vld [vmem:[%s6370_s21 + $0xb0] sm:$0xff] }
 0x952   :  { %v4514_v10 = vpop.eup %4513 }
 0x953   :  { %v2069_v42 = vmul.f32 %v4514_v10, %v5650_v31  ;;  %v2062_v53 = vpop.xlane.xlu0 %2061  ;;  %v2424_v10 = vld [vmem:[%s6370_s21 + $0x20] sm:$0xff] }
 0x954   :  { %4515 = vrcp.f32 %v2062_v53 }
 0x955   :  { %4259 = vmatmul.msk.f32.vlgmr.msrb.gmra.mxu2 %vm2037_vm9, %v2069_v42  ;;  %v2441_v42 = vld [vmem:[%s6370_s21 + $0xa8] sm:$0xff] }
 0x956   :  { %2514 = vmatpush.msrb.mxu2 %v2451_v45  ;;  %v2461_v45 = vld [vmem:[%s6370_s21 + $0x148] sm:$0xff] }
 0x957   :  { %v2163_v12 = vpop.xlane.xlu1 %2162 }
 0x958   :  { %4517 = vrcp.f32 %v2163_v12  ;;  %2515 = vmatpush.msrb.mxu2 %v2450_v47  ;;  %v2459_v47 = vld [vmem:[%s6370_s21 + $0x138] sm:$0xff] }
 0x95a   :  { %v4516_v60 = vpop.eup %4515  ;;  %2516 = vmatpush.msrb.mxu2 %v2449_v49  ;;  %v2458_v49 = vld [vmem:[%s6370_s21 + $0x130] sm:$0xff] }
 0x95b   :  { %v2065_v57 = vpop.xlane.xlu2 %2064  ;;  %v2070_v0 = vmul.f32 %v4516_v60, %v5655_v23 }
 0x95c   :  { %4519 = vrcp.f32 %v2065_v57  ;;  %2517 = vmatpush.msrb.mxu2 %v2448_v1  ;;  %v2423_v57 = vld [vmem:[%s6370_s21 + $0x18] sm:$0xff] }
 0x95d   :  { %4260 = vmatmul.msk.f32.gmra.mxu2 %vm2037_vm9, %v2070_v0  ;;  %v2422_v0 = vld [vmem:[%s6370_s21 + $0x10] sm:$0xff]  ;;  %v2475_v1 = vld [vmem:[%s6370_s21 + $0x1b8] sm:$0xff] }
 0x95e   :  { %v4518_v13 = vpop.eup %4517  ;;  %2518 = vmatpush.msrb.mxu2 %v2447_v54  ;;  %v2454_v54 = vld [vmem:[%s6370_s21 + $0x110] sm:$0xff] }
 0x95f   :  { %v2173_v35 = vmul.f32 %v4518_v13, %v5660_v26  ;;  %v2166_v19 = vpop.xlane.xlu0 %2165  ;;  %v2435_v26 = vld [vmem:[%s6370_s21 + $0x78] sm:$0xff]  ;;  %v2421_v13 = vld [vmem:[%s6370_s21 + $0x8] sm:$0xff] }
 0x960   :  { %4521 = vrcp.f32 %v2166_v19  ;;  %2488 = vmatpush.msrb.mxu1 %v2435_v26  ;;  %2519 = vmatpush.msrb.mxu2 %v2446_v28  ;;  %v2420_v19 = vld [vmem:[%s6370_s21] sm:$0xff]  ;;  %v2437_v26 = vld [vmem:[%s6370_s21 + $0x88] sm:$0xff] }
 0x961   :  { %4263 = vmatmul.msk.f32.vlgmr.msra.gmra.mxu0 %vm2037_vm9, %v2173_v35  ;;  %v2469_v28 = vld [vmem:[%s6370_s21 + $0x188] sm:$0xff] }
 0x962   :  { %v4520_v31 = vpop.eup %4519  ;;  %2489 = vmatpush.msrb.mxu1 %v2434_v20  ;;  %2520 = vmatpush.msrb.mxu2 %v2445_v11  ;;  %v2481_v20 = vld [vmem:[%s6370_s21 + $0x1e8] sm:$0xff] }
 0x963   :  { %v2266_v32 = vpop.xlane.xlu1 %2265  ;;  %v2071_v25 = vmul.f32 %v4520_v31, %v5665_v44  ;;  %v2439_v31 = vld [vmem:[%s6370_s21 + $0x98] sm:$0xff] }
 0x964   :  { %4523 = vrcp.f32 %v2266_v32  ;;  %2490 = vmatpush.msrb.mxu1 %v2433_v46  ;;  %2521 = vmatpush.msrb.mxu2 %v2444_v41  ;;  %v2464_v32 = vld [vmem:[%s6370_s21 + $0x160] sm:$0xff]  ;;  %v2479_v46 = vld [vmem:[%s6370_s21 + $0x1d8] sm:$0xff] }
 0x965   :  { %4261 = vmatmul.msk.f32.gmra.mxu2 %vm2037_vm9, %v2071_v25  ;;  %v2483_v25 = vld [vmem:[%s6370_s21 + $0x1f8] sm:$0xff] }
 0x966   :  { %v4522_v23 = vpop.eup %4521  ;;  %2522 = vmatpush.msrb.mxu2 %v2443_v40  ;;  %2566 = vmatpush.msra.mxu0 %v2483_v25 }
 0x967   :  { %v2169_v18 = vpop.xlane.xlu2 %2168  ;;  %v2174_v14 = vmul.f32 %v4522_v23, %v5670_v36  ;;  %v2432_v36 = vld [vmem:[%s6370_s21 + $0x60] sm:$0xff]  ;;  %v2438_v23 = vld [vmem:[%s6370_s21 + $0x90] sm:$0xff] }
 0x968   :  { %4525 = vrcp.f32 %v2169_v18  ;;  %2491 = vmatpush.msrb.mxu1 %v2432_v36  ;;  %2523 = vmatpush.msrb.mxu2 %v2442_v34  ;;  %v2463_v18 = vld [vmem:[%s6370_s21 + $0x158] sm:$0xff]  ;;  %v2478_v36 = vld [vmem:[%s6370_s21 + $0x1d0] sm:$0xff] }
 0x969   :  { %4264 = vmatmul.msk.f32.gmra.mxu0 %vm2037_vm9, %v2174_v14  ;;  %v2482_v14 = vld [vmem:[%s6370_s21 + $0x1f0] sm:$0xff] }
 0x96a   :  { %v4524_v43 = vpop.eup %4523  ;;  %2524 = vmatpush.msrb.mxu2 %v2441_v42  ;;  %2567 = vmatpush.msra.mxu0 %v2482_v14 }
 0x96b   :  { %v2276_v44 = vmul.f32 %v4524_v43, %v5675_v52  ;;  %v2269_v15 = vpop.xlane.xlu0 %2268  ;;  %v2431_v52 = vld [vmem:[%s6370_s21 + $0x58] sm:$0xff]  ;;  %v2436_v43 = vld [vmem:[%s6370_s21 + $0x80] sm:$0xff] }
 0x96c   :  { %4527 = vrcp.f32 %v2269_v15  ;;  %2492 = vmatpush.msrb.mxu1 %v2431_v52  ;;  %2568 = vmatpush.msra.mxu0 %v2481_v20  ;;  %v2460_v15 = vld [vmem:[%s6370_s21 + $0x140] sm:$0xff] }
 0x96d   :  { %4267 = vmatmul.msk.f32.vlgmr.msra.gmra.mxu2 %vm2037_vm9, %v2276_v44  ;;  %v2480_v44 = vld [vmem:[%s6370_s21 + $0x1e0] sm:$0xff] }
 0x96e   :  { %v4526_v50 = vpop.eup %4525  ;;  %2493 = vmatpush.msrb.mxu1 %v2430_v4  ;;  %2569 = vmatpush.msra.mxu0 %v2480_v44  ;;  %v2456_v52 = vld [vmem:[%s6370_s21 + $0x120] sm:$0xff]  ;;  %v2474_v4 = vld [vmem:[%s6370_s21 + $0x1b0] sm:$0xff] }
 0x96f   :  { %v2369_v51 = vpop.xlane.xlu1 %2368  ;;  %v2175_v33 = vmul.f32 %v4526_v50, %v5680_v56  ;;  %v2465_v56 = vld [vmem:[%s6370_s21 + $0x168] sm:$0xff] }
 0x970   :  { %4529 = vrcp.f32 %v2369_v51  ;;  %2542 = vmatpush.msrb.mxu3 %v2465_v56  ;;  %2494 = vmatpush.msrb.mxu1 %v2429_v27  ;;  %v2477_v50 = vld [vmem:[%s6370_s21 + $0x1c8] sm:$0xff]  ;;  %v2472_v56 = vld [vmem:[%s6370_s21 + $0x1a0] sm:$0xff]  ;;  %v2470_v27 = vld [vmem:[%s6370_s21 + $0x190] sm:$0xff] }
 0x971   :  { %4265 = vmatmul.msk.f32.gmra.mxu0 %vm2037_vm9, %v2175_v33  ;;  %v2457_v51 = vld [vmem:[%s6370_s21 + $0x128] sm:$0xff]  ;;  %v2476_v33 = vld [vmem:[%s6370_s21 + $0x1c0] sm:$0xff] }
 0x972   :  { %v4528_v21 = vpop.eup %4527  ;;  %2495 = vmatpush.msrb.mxu1 %v2428_v29  ;;  %2543 = vmatpush.msrb.mxu3 %v2464_v32  ;;  %v2468_v29 = vld [vmem:[%s6370_s21 + $0x180] sm:$0xff] }
 0x973   :  { %v2272_v2 = vpop.xlane.xlu2 %2271  ;;  %v2277_v5 = vmul.f32 %v4528_v21, %v5685_v30  ;;  %2570 = vmatpush.msra.mxu0 %v2479_v46  ;;  %v2453_v21 = vld [vmem:[%s6370_s21 + $0x108] sm:$0xff] }
 0x974   :  { %4531 = vrcp.f32 %v2272_v2  ;;  %2496 = vmatpush.msrb.mxu1 %v2427_v39  ;;  %2544 = vmatpush.msrb.mxu3 %v2463_v18  ;;  %v2452_v2 = vld [vmem:[%s6370_s21 + $0x100] sm:$0xff] }
 0x975   :  { %4268 = vmatmul.msk.f32.gmra.mxu2 %vm2037_vm9, %v2277_v5  ;;  %2571 = vmatpush.msra.mxu0 %v2478_v36  ;;  %v2471_v5 = vld [vmem:[%s6370_s21 + $0x198] sm:$0xff] }
 0x976   :  { %v4530_v61 = vpop.eup %4529  ;;  %2497 = vmatpush.msrb.mxu1 %v2426_v8 }
 0x977   :  { %v2379_v30 = vmul.f32 %v4530_v61, %v5690_v24  ;;  %v2372_v38 = vpop.xlane.xlu0 %2371  ;;  %v2425_v24 = vld [vmem:[%s6370_s21 + $0x28] sm:$0xff]  ;;  %2572 = vmatpush.msra.mxu0 %v2477_v50 }
 0x978   :  { %4533 = vrcp.f32 %v2372_v38  ;;  %2498 = vmatpush.msrb.mxu1 %v2425_v24 }
 0x979   :  { %4271 = vmatmul.msk.f32.vlgmr.msrb.gmra.mxu0 %vm2037_vm9, %v2379_v30 }
 0x97a   :  { %v4532_v9 = vpop.eup %4531  ;;  %2499 = vmatpush.msrb.mxu1 %v2424_v10  ;;  %2573 = vmatpush.msra.mxu0 %v2476_v33 }
 0x97b   :  { %v2278_v6 = vmul.f32 %v4532_v9, %v5694_v59  ;;  %v2440_v59 = vld [vmem:[%s6370_s21 + $0xa0] sm:$0xff] }
 0x97c   :  { %2500 = vmatpush.msrb.mxu1 %v2423_v57  ;;  %2525 = vmatpush.msrb.mxu2 %v2440_v59 }
 0x97d   :  { %4269 = vmatmul.msk.f32.gmra.mxu2 %vm2037_vm9, %v2278_v6  ;;  %2574 = vmatpush.msra.mxu0 %v2475_v1 }
 0x97e   :  { %v4534_v53 = vpop.eup %4533  ;;  %2501 = vmatpush.msrb.mxu1 %v2422_v0  ;;  %2526 = vmatpush.msrb.mxu2 %v2439_v31 }
 0x97f   :  { %v2375_v12 = vpop.xlane.xlu1 %2374  ;;  %v2380_v60 = vmul.f32 %v4534_v53, %v5699_v63  ;;  %2575 = vmatpush.msra.mxu0 %v2474_v4  ;;  %v4409_v53 = vld [vmem:[%s6371_s25] ss:$0 sm:$0xff] }
 0x980   :  { %4535 = vrcp.f32 %v2375_v12  ;;  %2502 = vmatpush.msrb.mxu1 %v2421_v13  ;;  %2527 = vmatpush.msrb.mxu2 %v2438_v23 }
 0x981   :  { %4272 = vmatmul.msk.f32.gmra.mxu0 %vm2037_vm9, %v2380_v60 }
 0x982   :  { %2503 = vmatpush.msrb.mxu1 %v2420_v19  ;;  %2528 = vmatpush.msrb.mxu2 %v2437_v26 }
 0x983   :  { %2576 = vmatpush.msra.mxu0 %v2473_v7 }
 0x984   :  { %2529 = vmatpush.msrb.mxu2 %v2436_v43 }
 0x985   :  { %2577 = vmatpush.msra.mxu0 %v2472_v56 }
 0x986   :  { %v4536_v63 = vpop.eup %4535 }
 0x987   :  { %v2381_v35 = vmul.f32 %v4536_v63, %v5703_v55  ;;  %v2462_v55 = vld [vmem:[%s6370_s21 + $0x150] sm:$0xff]  ;;  %2578 = vmatpush.msra.mxu0 %v2471_v5 }
 0x988   :  { %2545 = vmatpush.msrb.mxu3 %v2462_v55 }
 0x989   :  { %4273 = vmatmul.msk.f32.gmra.mxu0 %vm2037_vm9, %v2381_v35 }
 0x98a   :  { %2546 = vmatpush.msrb.mxu3 %v2461_v45  ;;  %2579 = vmatpush.msra.mxu0 %v2470_v27 }
 0x98c   :  { %2547 = vmatpush.msrb.mxu3 %v2460_v15  ;;  %2580 = vmatpush.msra.mxu0 %v2469_v28 }
 0x98e   :  { %2548 = vmatpush.msrb.mxu3 %v2459_v47  ;;  %2581 = vmatpush.msra.mxu0 %v2468_v29 }
 0x990   :  { %2549 = vmatpush.msrb.mxu3 %v2458_v49 }
 0x992   :  { %2550 = vmatpush.msrb.mxu3 %v2457_v51  ;;  %v4722_v51 = vmov 32.0  }
 0x993   :  { %4537 = vrcp.f32 %v4722_v51 }
 0x994   :  { %2551 = vmatpush.msrb.mxu3 %v2456_v52 }
 0x996   :  { %2552 = vmatpush.msrb.mxu3 %v2455_v3 }
 0x998   :  { %2553 = vmatpush.msrb.mxu3 %v2454_v54 }
 0x999   :  { %v4538_v33 = vpop.eup %4537 }
 0x99a   :  { %2554 = vmatpush.msrb.mxu3 %v2453_v21  ;;  %v2607_v52 = vmul.f32 32.0, %v4538_v33  ;;  %vm2611_vm13 = vweird.f32 %v4538_v33 }
 0x99c   :  { %2555 = vmatpush.msrb.mxu3 %v2452_v2  ;;  %v2608_v1 = vsub.f32 1.0, %v2607_v52 }
 0x99e   :  { %v2609_v3 = vmul.f32 %v4538_v33, %v2608_v1 }
 0x9d8   :  { %v2102_v11 = vpop.f32.mrf.mxu2 }
 0x9d9   :  { %2504 = vmatmul.f32.vlgmr.msrb.gmra.mxu1 %v2102_v11 }
 0x9de   :  { %v2205_v61 = vpop.f32.mrf.mxu0 }
 0x9df   :  { %2530 = vmatmul.f32.vlgmr.msrb.gmra.mxu2 %v2205_v61 }
 0x9e0   :  { %v2105_v30 = vpop.f32.mrf.mxu2 }
 0x9e1   :  { %2507 = vmatmul.f32.gmra.mxu1 %v2105_v30 }
 0x9e6   :  { %v2208_v38 = vpop.f32.mrf.mxu0 }
 0x9e7   :  { %2533 = vmatmul.f32.gmra.mxu2 %v2208_v38 }
 0x9e8   :  { %v2108_v39 = vpop.f32.mrf.mxu2 }
 0x9e9   :  { %2510 = vmatmul.f32.gmra.mxu1 %v2108_v39 }
 0x9ee   :  { %v2211_v41 = vpop.f32.mrf.mxu0 }
 0x9ef   :  { %2536 = vmatmul.f32.gmra.mxu2 %v2211_v41  ;;  %v2685_v41 = vld [vmem:[%s6372_s29 + $0x18] sm:$0xff] }
 0x9f0   :  { %v2308_v8 = vpop.f32.mrf.mxu2  ;;  %2711 = vmatpush.msra.mxu1 %v2685_v41  ;;  %v2730_v41 = vld [vmem:[%s6373_s3 + $0x10] sm:$0xff] }
 0x9f1   :  { %2556 = vmatmul.f32.vlgmr.msrb.gmra.mxu3 %v2308_v8  ;;  %v2684_v8 = vld [vmem:[%s6372_s29 + $0x10] sm:$0xff] }
 0x9f2   :  { %2712 = vmatpush.msra.mxu1 %v2684_v8  ;;  %v2729_v8 = vld [vmem:[%s6373_s3 + $0x8] sm:$0xff] }
 0x9f6   :  { %v2411_v40 = vpop.f32.mrf.mxu0 }
 0x9f7   :  { %2582 = vmatmul.f32.vlgmr.msra.gmra.mxu0 %v2411_v40  ;;  %v2683_v40 = vld [vmem:[%s6372_s29 + $0x8] sm:$0xff] }
 0x9f8   :  { %v2311_v9 = vpop.f32.mrf.mxu2  ;;  %2713 = vmatpush.msra.mxu1 %v2683_v40  ;;  %v2728_v40 = vld [vmem:[%s6373_s3] sm:$0xff] }
 0x9f9   :  { %2559 = vmatmul.f32.gmra.mxu3 %v2311_v9  ;;  %v2682_v9 = vld [vmem:[%s6372_s29] sm:$0xff] }
 0x9fa   :  { %2714 = vmatpush.msra.mxu1 %v2682_v9  ;;  %v4412_v9 = vld [vmem:[%s6376_s19] ss:$0 sm:$0xff] }
 0x9fe   :  { %v2414_v6 = vpop.f32.mrf.mxu0 }
 0x9ff   :  { %2585 = vmatmul.f32.gmra.mxu0 %v2414_v6 }
 0xa00   :  { %v2314_v24 = vpop.f32.mrf.mxu2 }
 0xa01   :  { %2562 = vmatmul.f32.gmra.mxu3 %v2314_v24 }
 0xa06   :  { %v2417_v34 = vpop.f32.mrf.mxu0 }
 0xa07   :  { %2588 = vmatmul.f32.gmra.mxu0 %v2417_v34 }
 0xa56   :  { %v2505_v10 = vpop.f32.mrf.mxu1 }
 0xa57   :  { %v2506_v12 = vadd.f32 %v4409_v53, %v2505_v10 }
 0xa5e   :  { %v2508_v60 = vpop.f32.mrf.mxu1 }
 0xa5f   :  { %v2509_v19 = vadd.f32 %v4409_v53, %v2508_v60 }
 0xa62   :  { %v2531_v42 = vpop.f32.mrf.mxu2 }
 0xa63   :  { %v2532_v57 = vadd.f32 %v2531_v42, %v2506_v12 }
 0xa66   :  { %v2511_v26 = vpop.f32.mrf.mxu1 }
 0xa67   :  { %v2512_v43 = vadd.f32 %v4409_v53, %v2511_v26 }
 0xa6a   :  { %v2534_v63 = vpop.f32.mrf.mxu2 }
 0xa6b   :  { %v2535_v32 = vadd.f32 %v2534_v63, %v2509_v19 }
 0xa72   :  { %v2537_v20 = vpop.f32.mrf.mxu2 }
 0xa73   :  { %v2538_v44 = vadd.f32 %v2537_v20, %v2512_v43  ;;  %v2738_v20 = vld [vmem:[%s6373_s3 + $0x50] sm:$0xff] }
 0xa74   :  { %v2557_v59 = vpop.f32.mrf.mxu3  ;;  %v2583_v0 = vpop.f32.mrf.mxu0 }
 0xa75   :  { %v2558_v13 = vadd.f32 %v2557_v59, %v2532_v57  ;;  %v2743_v57 = vld [vmem:[%s6373_s3 + $0x78] sm:$0xff]  ;;  %v2742_v59 = vld [vmem:[%s6373_s3 + $0x70] sm:$0xff] }
 0xa76   :  { %2748 = vmatpush.msra.mxu2 %v2743_v57  ;;  %v4413_v57 = vld [vmem:[%s6377_s24] ss:$0 sm:$0xff] }
 0xa77   :  { %v2584_v35 = vadd.f32 %v2583_v0, %v2558_v13  ;;  %v2741_v13 = vld [vmem:[%s6373_s3 + $0x68] sm:$0xff] }
 0xa78   :  { %2749 = vmatpush.msra.mxu2 %v2742_v59 }
 0xa79   :  { %v2592_v31 = vadd.f32 %v2584_v35, %v5407_v58 }
 0xa7a   :  { %2750 = vmatpush.msra.mxu2 %v2741_v13 }
 0xa7b   :  { %v2597_v25 = vsel %vm1566_vm6, %v2592_v31, 0.0 }
 0xa7c   :  { %v2560_v23 = vpop.f32.mrf.mxu3  ;;  %v2586_v18 = vpop.f32.mrf.mxu0  ;;  %2598 = vadd.xlane.f32.xlu2 %v2597_v25 }
 0xa7d   :  { %v2561_v14 = vadd.f32 %v2560_v23, %v2535_v32 }
 0xa7f   :  { %v2587_v55 = vadd.f32 %v2586_v18, %v2561_v14  ;;  %v2739_v18 = vld [vmem:[%s6373_s3 + $0x58] sm:$0xff] }
 0xa81   :  { %v2593_v45 = vadd.f32 %v2587_v55, %v5429_v37  ;;  %v2610_v37 = vadd.f32 %v4538_v33, %v2609_v3  ;;  %v4410_v55 = vld [vmem:[%s6374_s8] ss:$0 sm:$0xff]  ;;  %v2734_v3 = vld [vmem:[%s6373_s3 + $0x30] sm:$0xff] }
 0xa83   :  { %v2600_v15 = vsel %vm1566_vm6, %v2593_v45, 0.0  ;;  %v5802_v4 = vsel %vm2611_vm13, %v4538_v33, %v2610_v37  ;;  %v2735_v33 = vld [vmem:[%s6373_s3 + $0x38] sm:$0xff] }
 0xa84   :  { %v2563_v46 = vpop.f32.mrf.mxu3  ;;  %2601 = vadd.xlane.f32.xlu0 %v2600_v15  ;;  %v2589_v58 = vpop.f32.mrf.mxu0 }
 0xa85   :  { %v2564_v47 = vadd.f32 %v2563_v46, %v2538_v44  ;;  %v4411_v44 = vld [vmem:[%s6375_s14] ss:$0 sm:$0xff]  ;;  %v2737_v46 = vld [vmem:[%s6373_s3 + $0x48] sm:$0xff] }
 0xa87   :  { %v2590_v36 = vadd.f32 %v2589_v58, %v2564_v47 }
 0xa89   :  { %v2594_v49 = vadd.f32 %v2590_v36, %v5474_v48  ;;  %v2736_v36 = vld [vmem:[%s6373_s3 + $0x40] sm:$0xff] }
 0xa8b   :  { %v2603_v50 = vsel %vm1568_vm7, %v2594_v49, 0.0 }
 0xa8c   :  { %2604 = vadd.xlane.f32.xlu1 %v2603_v50 }
 0xaef   :  { %v2599_v54 = vpop.xlane.xlu2 %2598 }
 0xaf0   :  { %v2613_v7 = vmul.f32 %v5802_v4, %v2599_v54 }
 0xaf2   :  { %v2616_v21 = vsub.f32 %v2592_v31, %v2613_v7  ;;  %v2740_v31 = vld [vmem:[%s6373_s3 + $0x60] sm:$0xff] }
 0xaf3   :  { %2751 = vmatpush.msra.mxu2 %v2740_v31 }
 0xaf4   :  { %v2619_v56 = vmul.f32 %v2616_v21, %v2616_v21 }
 0xaf5   :  { %2752 = vmatpush.msra.mxu2 %v2739_v18 }
 0xaf6   :  { %v2622_v48 = vsel %vm1566_vm6, %v2619_v56, 0.0 }
 0xaf7   :  { %v2602_v2 = vpop.xlane.xlu0 %2601  ;;  %2623 = vadd.xlane.f32.xlu2 %v2622_v48  ;;  %2753 = vmatpush.msra.mxu2 %v2738_v20 }
 0xaf8   :  { %v2614_v5 = vmul.f32 %v5802_v4, %v2602_v2  ;;  %v2732_v2 = vld [vmem:[%s6373_s3 + $0x20] sm:$0xff] }
 0xaf9   :  { %2754 = vmatpush.msra.mxu2 %v2737_v46 }
 0xafa   :  { %v5807_v27 = vsub.f32 %v2593_v45, %v2614_v5 }
 0xafb   :  { %2755 = vmatpush.msra.mxu2 %v2736_v36 }
 0xafc   :  { %v2620_v28 = vmul.f32 %v5807_v27, %v5807_v27 }
 0xafd   :  { %2756 = vmatpush.msra.mxu2 %v2735_v33 }
 0xafe   :  { %v2625_v29 = vsel %vm1566_vm6, %v2620_v28, 0.0 }
 0xaff   :  { %v2605_v11 = vpop.xlane.xlu1 %2604  ;;  %2626 = vadd.xlane.f32.xlu0 %v2625_v29  ;;  %2757 = vmatpush.msra.mxu2 %v2734_v3  ;;  %v2731_v29 = vld [vmem:[%s6373_s3 + $0x18] sm:$0xff]  ;;  %v2895_v3 = vld [vmem:[%s6378_s30 + $0x130] sm:$0xff] }
 0xb00   :  { %v2615_v61 = vmul.f32 %v5802_v4, %v2605_v11  ;;  %3006 = vmatpush.msrb.mxu1 %v2895_v3 }
 0xb02   :  { %v5813_v30 = vsub.f32 %v2594_v49, %v2615_v61 }
 0xb04   :  { %v2621_v38 = vmul.f32 %v5813_v30, %v5813_v30 }
 0xb06   :  { %v2628_v39 = vsel %vm1568_vm7, %v2621_v38, 0.0 }
 0xb07   :  { %2629 = vadd.xlane.f32.xlu1 %v2628_v39 }
 0xb6a   :  { %v2624_v6 = vpop.xlane.xlu2 %2623 }
 0xb6b   :  { %v2631_v24 = vmul.f32 %v2624_v6, %v5802_v4 }
 0xb6d   :  { %v2634_v34 = vadd.f32 1e-05, %v2631_v24 }
 0xb6f   :  { %4539 = vrsqrt.f32 %v2634_v34  ;;  %vm2643_vm15 = vweird.f32 %v2634_v34 }
 0xb72   :  { %v2627_v10 = vpop.xlane.xlu0 %2626 }
 0xb73   :  { %v2632_v42 = vmul.f32 %v2627_v10, %v5802_v4 }
 0xb75   :  { %v4540_v53 = vpop.eup %4539  ;;  %v2635_v12 = vadd.f32 1e-05, %v2632_v42 }
 0xb76   :  { %v2638_v60 = vmul.f32 %v4540_v53, %v2634_v34  ;;  %vm2644_vm14 = vweird.f32 %v4540_v53 }
 0xb77   :  { %4541 = vrsqrt.f32 %v2635_v12  ;;  %vm2645_vm0 = vmor %vm2643_vm15, %vm2644_vm14  ;;  %vm2653_vm2 = vweird.f32 %v2635_v12 }
 0xb78   :  { %v2639_v0 = vmul.f32 %v4540_v53, %v2638_v60 }
 0xb7a   :  { %v2640_v63 = vmul.f32 0.5, %v2639_v0  ;;  %v2630_v35 = vpop.xlane.xlu1 %2629 }
 0xb7b   :  { %v2633_v19 = vmul.f32 %v2630_v35, %v5802_v4 }
 0xb7c   :  { %v2641_v32 = vsub.f32 1.5, %v2640_v63 }
 0xb7d   :  { %v4542_v25 = vpop.eup %4541  ;;  %v2636_v23 = vadd.f32 1e-05, %v2633_v19 }
 0xb7e   :  { %v2642_v14 = vmul.f32 %v4540_v53, %v2641_v32  ;;  %v2648_v26 = vmul.f32 %v4542_v25, %v2635_v12  ;;  %vm2654_vm1 = vweird.f32 %v4542_v25 }
 0xb7f   :  { %4543 = vrsqrt.f32 %v2636_v23  ;;  %vm2655_vm3 = vmor %vm2653_vm2, %vm2654_vm1  ;;  %vm2663_vm8 = vweird.f32 %v2636_v23 }
 0xb80   :  { %v2646_v43 = vsel %vm2645_vm0, %v4540_v53, %v2642_v14  ;;  %v2649_v45 = vmul.f32 %v4542_v25, %v2648_v26 }
 0xb81   :  { %v2667_v15 = vmul.f32 %v2646_v43, %v2616_v21  ;;  %v2733_v21 = vld [vmem:[%s6373_s3 + $0x28] sm:$0xff] }
 0xb82   :  { %v2650_v47 = vmul.f32 0.5, %v2649_v45  ;;  %2758 = vmatpush.msra.mxu2 %v2733_v21  ;;  %v2883_v21 = vld [vmem:[%s6378_s30 + $0xd0] sm:$0xff] }
 0xb83   :  { %v2673_v58 = vmul.f32 %v4410_v55, %v2667_v15  ;;  %3007 = vmatpush.msrb.mxu1 %v2883_v21  ;;  %v2900_v21 = vld [vmem:[%s6378_s30 + $0x158] sm:$0xff] }
 0xb84   :  { %v2651_v49 = vsub.f32 1.5, %v2650_v47  ;;  %2759 = vmatpush.msra.mxu2 %v2732_v2  ;;  %v2870_v2 = vld [vmem:[%s6378_s30 + $0x68] sm:$0xff] }
 0xb85   :  { %v4544_v50 = vpop.eup %4543  ;;  %v2679_v51 = vadd.f32 %v4411_v44, %v2673_v58 }
 0xb86   :  { %v2652_v52 = vmul.f32 %v4542_v25, %v2651_v49  ;;  %v2658_v1 = vmul.f32 %v4544_v50, %v2636_v23  ;;  %vm2664_vm5 = vweird.f32 %v4544_v50  ;;  %2760 = vmatpush.msra.mxu2 %v2731_v29  ;;  %v2857_v29 = vld [vmem:[%s6378_s30] sm:$0xff] }
 0xb87   :  { %4274 = vmatmul.msk.f32.vlgmr.msra.gmra.mxu1 %vm1566_vm6, %v2679_v51  ;;  %vm2665_vm10 = vmor %vm2663_vm8, %vm2664_vm5 }
 0xb88   :  { %v2656_v37 = vsel %vm2655_vm3, %v4542_v25, %v2652_v52  ;;  %v2659_v54 = vmul.f32 %v4544_v50, %v2658_v1  ;;  %2761 = vmatpush.msra.mxu2 %v2730_v41  ;;  %v2893_v52 = vld [vmem:[%s6378_s30 + $0x120] sm:$0xff]  ;;  %v2894_v1 = vld [vmem:[%s6378_s30 + $0x128] sm:$0xff] }
 0xb89   :  { %v2668_v7 = vmul.f32 %v2656_v37, %v5807_v27  ;;  %2954 = vmatpush.msra.mxu3 %v2893_v52  ;;  %2980 = vmatpush.msrb.mxu0 %v2894_v1  ;;  %v2898_v37 = vld [vmem:[%s6378_s30 + $0x148] sm:$0xff] }
 0xb8a   :  { %v2660_v56 = vmul.f32 0.5, %v2659_v54  ;;  %2762 = vmatpush.msra.mxu2 %v2729_v8  ;;  %v2881_v54 = vld [vmem:[%s6378_s30 + $0xc0] sm:$0xff] }
 0xb8b   :  { %v2674_v48 = vmul.f32 %v4410_v55, %v2668_v7  ;;  %v2882_v7 = vld [vmem:[%s6378_s30 + $0xc8] sm:$0xff]  ;;  %2955 = vmatpush.msra.mxu3 %v2881_v54 }
 0xb8c   :  { %v2661_v5 = vsub.f32 1.5, %v2660_v56  ;;  %2763 = vmatpush.msra.mxu2 %v2728_v40  ;;  %2981 = vmatpush.msrb.mxu0 %v2882_v7  ;;  %v2886_v56 = vld [vmem:[%s6378_s30 + $0xe8] sm:$0xff] }
 0xb8d   :  { %v2680_v28 = vadd.f32 %v4411_v44, %v2674_v48  ;;  %v2869_v48 = vld [vmem:[%s6378_s30 + $0x60] sm:$0xff] }
 0xb8e   :  { %v2662_v11 = vmul.f32 %v4544_v50, %v2661_v5  ;;  %3084 = vmatpush.msrb.mxu2 %v2898_v37  ;;  %v2871_v5 = vld [vmem:[%s6378_s30 + $0x70] sm:$0xff]  ;;  %2956 = vmatpush.msra.mxu3 %v2869_v48 }
 0xb8f   :  { %4275 = vmatmul.msk.f32.gmra.mxu1 %vm1566_vm6, %v2680_v28  ;;  %2982 = vmatpush.msrb.mxu0 %v2870_v2 }
 0xb90   :  { %v2666_v27 = vsel %vm2665_vm10, %v4544_v50, %v2662_v11  ;;  %3085 = vmatpush.msrb.mxu2 %v2886_v56  ;;  %3008 = vmatpush.msrb.mxu1 %v2871_v5  ;;  %v2858_v11 = vld [vmem:[%s6378_s30 + $0x8] sm:$0xff] }
 0xb91   :  { %v2669_v61 = vmul.f32 %v2666_v27, %v5813_v30  ;;  %v2859_v27 = vld [vmem:[%s6378_s30 + $0x10] sm:$0xff]  ;;  %2957 = vmatpush.msra.mxu3 %v2857_v29  ;;  %2983 = vmatpush.msrb.mxu0 %v2858_v11  ;;  %v2901_v11 = vld [vmem:[%s6378_s30 + $0x160] sm:$0xff] }
 0xb92   :  { %3009 = vmatpush.msrb.mxu1 %v2859_v27  ;;  %v2903_v27 = vld [vmem:[%s6378_s30 + $0x170] sm:$0xff] }
 0xb93   :  { %v2675_v38 = vmul.f32 %v4410_v55, %v2669_v61  ;;  %v2862_v61 = vld [vmem:[%s6378_s30 + $0x28] sm:$0xff] }
 0xb95   :  { %v2681_v39 = vadd.f32 %v4411_v44, %v2675_v38 }
 0xb97   :  { %4276 = vmatmul.msk.f32.gmra.mxu1 %vm1566_vm6, %v2681_v39 }
 0xc04   :  { %v2716_v6 = vpop.f32.mrf.mxu1 }
 0xc05   :  { %v2717_v24 = vadd.f32 %v4412_v9, %v2716_v6 }
 0xc07   :  { %v2725_v34 = vmax.f32 %v2717_v24, 0.0  ;;  %v2896_v24 = vld [vmem:[%s6378_s30 + $0x138] sm:$0xff] }
 0xc08   :  { %3032 = vmatpush.msrb.mxu3 %v2896_v24  ;;  %v2864_v24 = vld [vmem:[%s6378_s30 + $0x38] sm:$0xff] }
 0xc09   :  { %2764 = vmatmul.f32.vlgmr.msra.gmra.mxu2 %v2725_v34 }
 0xc0c   :  { %v2719_v10 = vpop.f32.mrf.mxu1 }
 0xc0d   :  { %v2720_v42 = vadd.f32 %v4412_v9, %v2719_v10 }
 0xc0f   :  { %v2726_v53 = vmax.f32 %v2720_v42, 0.0  ;;  %v2897_v42 = vld [vmem:[%s6378_s30 + $0x140] sm:$0xff] }
 0xc10   :  { %3058 = vmatpush.msra.mxu0 %v2897_v42  ;;  %v2904_v42 = vld [vmem:[%s6378_s30 + $0x178] sm:$0xff] }
 0xc11   :  { %2767 = vmatmul.f32.gmra.mxu2 %v2726_v53  ;;  %v2899_v53 = vld [vmem:[%s6378_s30 + $0x150] sm:$0xff] }
 0xc12   :  { %3110 = vmatpush.msra.mxu1 %v2899_v53  ;;  %v2892_v53 = vld [vmem:[%s6378_s30 + $0x118] sm:$0xff] }
 0xc14   :  { %v2722_v30 = vpop.f32.mrf.mxu1 }
 0xc15   :  { %v2723_v12 = vadd.f32 %v4412_v9, %v2722_v30  ;;  %v2902_v30 = vld [vmem:[%s6378_s30 + $0x168] sm:$0xff] }
 0xc17   :  { %v2727_v60 = vmax.f32 %v2723_v12, 0.0  ;;  %v2884_v12 = vld [vmem:[%s6378_s30 + $0xd8] sm:$0xff] }
 0xc18   :  { %3033 = vmatpush.msrb.mxu3 %v2884_v12  ;;  %v2868_v12 = vld [vmem:[%s6378_s30 + $0x58] sm:$0xff] }
 0xc19   :  { %2770 = vmatmul.f32.gmra.mxu2 %v2727_v60  ;;  %v2885_v60 = vld [vmem:[%s6378_s30 + $0xe0] sm:$0xff] }
 0xc1a   :  { %3059 = vmatpush.msra.mxu0 %v2885_v60 }
 0xc8c   :  { %v2765_v59 = vpop.f32.mrf.mxu2 }
 0xc8d   :  { %v2766_v0 = vadd.f32 %v4413_v57, %v2765_v59 }
 0xc8f   :  { %v2774_v13 = vadd.f32 %v2766_v0, %v2679_v51 }
 0xc91   :  { %v2779_v63 = vsel %vm1566_vm6, %v2774_v13, 0.0 }
 0xc92   :  { %2780 = vadd.xlane.f32.xlu2 %v2779_v63  ;;  %v2872_v63 = vld [vmem:[%s6378_s30 + $0x78] sm:$0xff] }
 0xc93   :  { %3034 = vmatpush.msrb.mxu3 %v2872_v63 }
 0xc94   :  { %v2768_v35 = vpop.f32.mrf.mxu2 }
 0xc95   :  { %v2769_v19 = vadd.f32 %v4413_v57, %v2768_v35  ;;  %v2873_v35 = vld [vmem:[%s6378_s30 + $0x80] sm:$0xff] }
 0xc96   :  { %3060 = vmatpush.msra.mxu0 %v2873_v35 }
 0xc97   :  { %v2775_v31 = vadd.f32 %v2769_v19, %v2680_v28  ;;  %v2874_v28 = vld [vmem:[%s6378_s30 + $0x88] sm:$0xff] }
 0xc98   :  { %3086 = vmatpush.msrb.mxu2 %v2874_v28 }
 0xc99   :  { %v2782_v32 = vsel %vm1566_vm6, %v2775_v31, 0.0 }
 0xc9a   :  { %2783 = vadd.xlane.f32.xlu0 %v2782_v32  ;;  %3087 = vmatpush.msrb.mxu2 %v2862_v61  ;;  %v2878_v32 = vld [vmem:[%s6378_s30 + $0xa8] sm:$0xff]  ;;  %v2888_v61 = vld [vmem:[%s6378_s30 + $0xf8] sm:$0xff] }
 0xc9c   :  { %v2771_v25 = vpop.f32.mrf.mxu2  ;;  %3188 = vmatpush.msra.mxu2 %v2902_v30  ;;  %v2880_v30 = vld [vmem:[%s6378_s30 + $0xb8] sm:$0xff] }
 0xc9d   :  { %v2772_v23 = vadd.f32 %v4413_v57, %v2771_v25  ;;  %v2887_v57 = vld [vmem:[%s6378_s30 + $0xf0] sm:$0xff]  ;;  %v2860_v25 = vld [vmem:[%s6378_s30 + $0x18] sm:$0xff] }
 0xc9e   :  { %3111 = vmatpush.msra.mxu1 %v2887_v57  ;;  %3035 = vmatpush.msrb.mxu3 %v2860_v25  ;;  %v6013_v25 = vld [vmem:[%s6381_s20] sm:$0xff] }
 0xc9f   :  { %v2776_v18 = vadd.f32 %v2772_v23, %v2681_v39 }
 0xca1   :  { %v2785_v14 = vsel %vm1568_vm7, %v2776_v18, 0.0 }
 0xca2   :  { %2786 = vadd.xlane.f32.xlu1 %v2785_v14  ;;  %v2863_v14 = vld [vmem:[%s6378_s30 + $0x30] sm:$0xff] }
 0xd05   :  { %v2781_v26 = vpop.xlane.xlu2 %2780 }
 0xd06   :  { %v2788_v55 = vmul.f32 %v2781_v26, %v5802_v4 }
 0xd08   :  { %v5854_v20 = vsub.f32 %v2774_v13, %v2788_v55  ;;  %v2890_v13 = vld [vmem:[%s6378_s30 + $0x108] sm:$0xff] }
 0xd09   :  { %3189 = vmatpush.msra.mxu2 %v2890_v13 }
 0xd0a   :  { %v2794_v43 = vmul.f32 %v5854_v20, %v5854_v20 }
 0xd0b   :  { %3190 = vmatpush.msra.mxu2 %v2878_v32 }
 0xd0c   :  { %v2797_v45 = vsel %vm1566_vm6, %v2794_v43, 0.0  ;;  %v2866_v43 = vld [vmem:[%s6378_s30 + $0x48] sm:$0xff] }
 0xd0d   :  { %v2784_v44 = vpop.xlane.xlu0 %2783  ;;  %2798 = vadd.xlane.f32.xlu2 %v2797_v45  ;;  %3191 = vmatpush.msra.mxu2 %v2866_v43 }
 0xd0e   :  { %v2789_v15 = vmul.f32 %v2784_v44, %v5802_v4 }
 0xd10   :  { %v5860_v46 = vsub.f32 %v2775_v31, %v2789_v15  ;;  %v2875_v31 = vld [vmem:[%s6378_s30 + $0x90] sm:$0xff]  ;;  %v4414_v15 = vld [vmem:[%s6379_s6] ss:$0 sm:$0xff] }
 0xd11   :  { %3112 = vmatpush.msra.mxu1 %v2875_v31 }
 0xd12   :  { %v2795_v47 = vmul.f32 %v5860_v46, %v5860_v46 }
 0xd13   :  { %3113 = vmatpush.msra.mxu1 %v2863_v14 }
 0xd14   :  { %v2800_v58 = vsel %vm1566_vm6, %v2795_v47, 0.0 }
 0xd15   :  { %v2787_v36 = vpop.xlane.xlu1 %2786  ;;  %2801 = vadd.xlane.f32.xlu0 %v2800_v58 }
 0xd16   :  { %v2790_v49 = vmul.f32 %v2787_v36, %v5802_v4  ;;  %v4415_v36 = vld [vmem:[%s6380_s12] ss:$0 sm:$0xff] }
 0xd18   :  { %v5866_v50 = vsub.f32 %v2776_v18, %v2790_v49  ;;  %v2861_v18 = vld [vmem:[%s6378_s30 + $0x20] sm:$0xff] }
 0xd19   :  { %3061 = vmatpush.msra.mxu0 %v2861_v18 }
 0xd1a   :  { %v2796_v51 = vmul.f32 %v5866_v50, %v5866_v50 }
 0xd1c   :  { %v2803_v33 = vsel %vm1568_vm7, %v2796_v51, 0.0 }
 0xd1d   :  { %2804 = vadd.xlane.f32.xlu1 %v2803_v33 }
 0xd80   :  { %v2799_v38 = vpop.xlane.xlu2 %2798 }
 0xd81   :  { %v2806_v39 = vmul.f32 %v2799_v38, %v5802_v4 }
 0xd83   :  { %v2809_v41 = vadd.f32 1e-05, %v2806_v39  ;;  %v2889_v39 = vld [vmem:[%s6378_s30 + $0x100] sm:$0xff] }
 0xd85   :  { %4545 = vrsqrt.f32 %v2809_v41  ;;  %vm2818_vm13 = vweird.f32 %v2809_v41 }
 0xd88   :  { %v2802_v8 = vpop.xlane.xlu0 %2801 }
 0xd89   :  { %v2807_v40 = vmul.f32 %v2802_v8, %v5802_v4  ;;  %v2876_v8 = vld [vmem:[%s6378_s30 + $0x98] sm:$0xff] }
 0xd8b   :  { %v4546_v9 = vpop.eup %4545  ;;  %v2810_v6 = vadd.f32 1e-05, %v2807_v40  ;;  %v2877_v40 = vld [vmem:[%s6378_s30 + $0xa0] sm:$0xff] }
 0xd8c   :  { %v2813_v34 = vmul.f32 %v4546_v9, %v2809_v41  ;;  %vm2819_vm11 = vweird.f32 %v4546_v9  ;;  %v2891_v41 = vld [vmem:[%s6378_s30 + $0x110] sm:$0xff] }
 0xd8d   :  { %4547 = vrsqrt.f32 %v2810_v6  ;;  %vm2820_vm14 = vmor %vm2818_vm13, %vm2819_vm11  ;;  %vm2828_vm0 = vweird.f32 %v2810_v6 }
 0xd8e   :  { %v2814_v10 = vmul.f32 %v4546_v9, %v2813_v34 }
 0xd90   :  { %v2815_v59 = vmul.f32 0.5, %v2814_v10  ;;  %v2805_v0 = vpop.xlane.xlu1 %2804  ;;  %v2867_v10 = vld [vmem:[%s6378_s30 + $0x50] sm:$0xff] }
 0xd91   :  { %v2808_v19 = vmul.f32 %v2805_v0, %v5802_v4 }
 0xd92   :  { %v2816_v23 = vsub.f32 1.5, %v2815_v59 }
 0xd93   :  { %v4548_v26 = vpop.eup %4547  ;;  %v2811_v55 = vadd.f32 1e-05, %v2808_v19 }
 0xd94   :  { %v2817_v45 = vmul.f32 %v4546_v9, %v2816_v23  ;;  %v2823_v44 = vmul.f32 %v4548_v26, %v2810_v6  ;;  %vm2829_vm15 = vweird.f32 %v4548_v26  ;;  %v2914_v23 = vperm.slane %v6013_v25, 5 }
 0xd95   :  { %4549 = vrsqrt.f32 %v2811_v55  ;;  %vm2830_vm1 = vmor %vm2828_vm0, %vm2829_vm15  ;;  %vm2838_vm3 = vweird.f32 %v2811_v55 }
 0xd96   :  { %v2821_v47 = vsel %vm2820_vm14, %v4546_v9, %v2817_v45  ;;  %v2824_v58 = vmul.f32 %v4548_v26, %v2823_v44  ;;  %v2879_v9 = vld [vmem:[%s6378_s30 + $0xb0] sm:$0xff] }
 0xd97   :  { %v2842_v49 = vmul.f32 %v2821_v47, %v5854_v20 }
 0xd98   :  { %v2825_v51 = vmul.f32 0.5, %v2824_v58 }
 0xd99   :  { %v2848_v33 = vmul.f32 %v4414_v15, %v2842_v49 }
 0xd9a   :  { %v2826_v52 = vsub.f32 1.5, %v2825_v51 }
 0xd9b   :  { %v4550_v1 = vpop.eup %4549  ;;  %v5910_v3 = vadd.f32 %v4415_v36, %v2848_v33 }
 0xd9c   :  { %v2827_v37 = vmul.f32 %v4548_v26, %v2826_v52  ;;  %v2833_v54 = vmul.f32 %v4550_v1, %v2811_v55  ;;  %vm2839_vm2 = vweird.f32 %v4550_v1  ;;  %v2913_v52 = vperm.slane %v6013_v25, 4 }
 0xd9d   :  { %4277 = vmatmul.msk.f32.vlgmr.msra.gmra.mxu3 %vm1566_vm6, %v5910_v3  ;;  %4280 = vmatmul.msk.f32.vlgmr.msrb.gmra.mxu0 %vm1566_vm6, %v5910_v3  ;;  %vm2840_vm5 = vmor %vm2838_vm3, %vm2839_vm2  ;;  %vm4116_vm2 = vcmask 523264  }
 0xd9e   :  { %v2831_v7 = vsel %vm2830_vm1, %v4548_v26, %v2827_v37  ;;  %v2834_v20 = vmul.f32 %v4550_v1, %v2833_v54  ;;  %4283 = vmatmul.msk.f32.vlgmr.msrb.gmra.mxu1 %vm1566_vm6, %v5910_v3  ;;  %4292 = vmatmul.msk.f32.vlgmr.msrb.gmra.mxu2 %vm1566_vm6, %v5910_v3 }
 0xd9f   :  { %v2843_v56 = vmul.f32 %v2831_v7, %v5860_v46  ;;  %3136 = vmatpush.msra.mxu3 %v2900_v21  ;;  %3162 = vmatpush.msrb.mxu0 %v2901_v11  ;;  %v6025_v21 = vld [vmem:[%s6381_s20 + $0x8] sm:$0xf] }
 0xda0   :  { %v2835_v48 = vmul.f32 0.5, %v2834_v20  ;;  %3214 = vmatpush.msrb.mxu1 %v2903_v27 }
 0xda1   :  { %v2849_v2 = vmul.f32 %v4414_v15, %v2843_v56  ;;  %3137 = vmatpush.msra.mxu3 %v2888_v61  ;;  %3163 = vmatpush.msrb.mxu0 %v2889_v39 }
 0xda2   :  { %v2836_v5 = vsub.f32 1.5, %v2835_v48  ;;  %3215 = vmatpush.msrb.mxu1 %v2891_v41  ;;  %v2918_v48 = vperm.slane %v6025_v21, 1 }
 0xda3   :  { %v5922_v28 = vadd.f32 %v4415_v36, %v2849_v2  ;;  %3138 = vmatpush.msra.mxu3 %v2876_v8  ;;  %3164 = vmatpush.msrb.mxu0 %v2877_v40 }
 0xda4   :  { %v2837_v29 = vmul.f32 %v4550_v1, %v2836_v5  ;;  %3216 = vmatpush.msrb.mxu1 %v2879_v9 }
 0xda5   :  { %4278 = vmatmul.msk.f32.gmra.mxu3 %vm1566_vm6, %v5922_v28  ;;  %4281 = vmatmul.msk.f32.gmra.mxu0 %vm1566_vm6, %v5922_v28 }
 0xda6   :  { %v2841_v46 = vsel %vm2840_vm5, %v4550_v1, %v2837_v29  ;;  %4284 = vmatmul.msk.f32.gmra.mxu1 %vm1566_vm6, %v5922_v28  ;;  %4293 = vmatmul.msk.f32.gmra.mxu2 %vm1566_vm6, %v5922_v28  ;;  %v2909_v29 = vperm.slane %v6013_v25, 0 }
 0xda7   :  { %v2844_v38 = vmul.f32 %v2841_v46, %v5866_v50  ;;  %3139 = vmatpush.msra.mxu3 %v2864_v24  ;;  %v2865_v50 = vld [vmem:[%s6378_s30 + $0x40] sm:$0xff]  ;;  %3217 = vmatpush.msrb.mxu1 %v2867_v10  ;;  %v2915_v46 = vperm.slane %v6013_v25, 6 }
 0xda8   :  { %3165 = vmatpush.msrb.mxu0 %v2865_v50 }
 0xda9   :  { %v2850_v6 = vmul.f32 %v4414_v15, %v2844_v38  ;;  %v2910_v15 = vperm.slane %v6013_v25, 1 }
 0xdab   :  { %v5942_v34 = vadd.f32 %v4415_v36, %v2850_v6 }
 0xdad   :  { %4279 = vmatmul.msk.f32.gmra.mxu3 %vm1566_vm6, %v5942_v34  ;;  %4282 = vmatmul.msk.f32.gmra.mxu0 %vm1566_vm6, %v5942_v34 }
 0xdae   :  { %4285 = vmatmul.msk.f32.gmra.mxu1 %vm1566_vm6, %v5942_v34  ;;  %4294 = vmatmul.msk.f32.gmra.mxu2 %vm1566_vm6, %v5942_v34 }
 0xdb5   :  { %4286 = vmatmul.msk.f32.vlgmr.msrb.gmra.mxu3 %vm1566_vm6, %v5910_v3  ;;  %4289 = vmatmul.msk.f32.vlgmr.msra.gmra.mxu0 %vm1566_vm6, %v5910_v3 }
 0xdb6   :  { %4295 = vmatmul.msk.f32.vlgmr.msra.gmra.mxu1 %vm1566_vm6, %v5910_v3  ;;  %4304 = vmatmul.msk.f32.vlgmr.msra.gmra.mxu2 %vm1566_vm6, %v5910_v3 }
 0xdb7   :  { %3240 = vmatpush.msrb.mxu3 %v2904_v42 }
 0xdb9   :  { %3241 = vmatpush.msrb.mxu3 %v2892_v53 }
 0xdbb   :  { %3242 = vmatpush.msrb.mxu3 %v2880_v30 }
 0xdbd   :  { %4287 = vmatmul.msk.f32.gmra.mxu3 %vm1566_vm6, %v5922_v28  ;;  %4290 = vmatmul.msk.f32.gmra.mxu0 %vm1566_vm6, %v5922_v28 }
 0xdbe   :  { %4296 = vmatmul.msk.f32.gmra.mxu1 %vm1566_vm6, %v5922_v28  ;;  %4305 = vmatmul.msk.f32.gmra.mxu2 %vm1566_vm6, %v5922_v28 }
 0xdbf   :  { %3243 = vmatpush.msrb.mxu3 %v2868_v12  ;;  %v2917_v12 = vperm.slane %v6025_v21, 0 }
 0xdc5   :  { %4288 = vmatmul.msk.f32.gmra.mxu3 %vm1566_vm6, %v5942_v34  ;;  %4291 = vmatmul.msk.f32.gmra.mxu0 %vm1566_vm6, %v5942_v34 }
 0xdc6   :  { %4297 = vmatmul.msk.f32.gmra.mxu1 %vm1566_vm6, %v5942_v34  ;;  %4306 = vmatmul.msk.f32.gmra.mxu2 %vm1566_vm6, %v5942_v34 }
 0xdcd   :  { %4298 = vmatmul.msk.f32.vlgmr.msra.gmra.mxu3 %vm1566_vm6, %v5910_v3  ;;  %4301 = vmatmul.msk.f32.vlgmr.msrb.gmra.mxu0 %vm1566_vm6, %v5910_v3 }
 0xdce   :  { %4307 = vmatmul.msk.f32.vlgmr.msrb.gmra.mxu1 %vm1566_vm6, %v5910_v3 }
 0xdd5   :  { %4299 = vmatmul.msk.f32.gmra.mxu3 %vm1566_vm6, %v5922_v28  ;;  %4302 = vmatmul.msk.f32.gmra.mxu0 %vm1566_vm6, %v5922_v28 }
 0xdd6   :  { %4308 = vmatmul.msk.f32.gmra.mxu1 %vm1566_vm6, %v5922_v28 }
 0xddd   :  { %4300 = vmatmul.msk.f32.gmra.mxu3 %vm1566_vm6, %v5942_v34  ;;  %4303 = vmatmul.msk.f32.gmra.mxu0 %vm1566_vm6, %v5942_v34 }
 0xdde   :  { %4309 = vmatmul.msk.f32.gmra.mxu1 %vm1566_vm6, %v5942_v34 }
 0xde5   :  { %4310 = vmatmul.msk.f32.vlgmr.msrb.gmra.mxu3 %vm1566_vm6, %v5910_v3 }
 0xded   :  { %4311 = vmatmul.msk.f32.gmra.mxu3 %vm1566_vm6, %v5922_v28 }
 0xdf5   :  { %4312 = vmatmul.msk.f32.gmra.mxu3 %vm1566_vm6, %v5942_v34 }
 0xe1a   :  { %v2985_v60 = vpop.f32.mrf.mxu0 }
 0xe1b   :  { %v6006_v57 = vpop.f32.mrf.mxu1  ;;  %v2986_v51 = vadd.f32 %v2985_v60, %v2910_v15 }
 0xe20   :  { %v2959_v59 = vpop.f32.mrf.mxu3 }
 0xe21   :  { %v3089_v0 = vpop.f32.mrf.mxu2  ;;  %v2960_v40 = vadd.f32 %v2959_v59, %v2909_v29 }
 0xe22   :  { %v2988_v13 = vpop.f32.mrf.mxu0  ;;  %v3090_v58 = vadd.f32 %v3089_v0, %v2914_v23 }
 0xe23   :  { %v6008_v63 = vpop.f32.mrf.mxu1  ;;  %v2989_v20 = vadd.f32 %v2988_v13, %v2910_v15 }
 0xe28   :  { %v2962_v35 = vpop.f32.mrf.mxu3 }
 0xe29   :  { %v3092_v19 = vpop.f32.mrf.mxu2  ;;  %v2963_v53 = vadd.f32 %v2962_v35, %v2909_v29 }
 0xe2a   :  { %v2991_v31 = vpop.f32.mrf.mxu0  ;;  %v3093_v45 = vadd.f32 %v3092_v19, %v2914_v23 }
 0xe2b   :  { %v6010_v32 = vpop.f32.mrf.mxu1  ;;  %v2992_v8 = vadd.f32 %v2991_v31, %v2910_v15  ;;  %v2919_v31 = vperm.slane %v6025_v21, 2 }
 0xe30   :  { %v6016_v18 = vpop.f32.mrf.mxu3 }
 0xe31   :  { %v3095_v14 = vpop.f32.mrf.mxu2  ;;  %v2966_v19 = vadd.f32 %v6016_v18, %v2909_v29 }
 0xe32   :  { %v3096_v26 = vadd.f32 %v3095_v14, %v2914_v23  ;;  %v3063_v55 = vpop.f32.mrf.mxu0  ;;  %v2916_v14 = vperm.slane %v6013_v25, 7 }
 0xe33   :  { %v3115_v43 = vpop.f32.mrf.mxu1  ;;  %v3064_v61 = vadd.f32 %v3063_v55, %v2913_v52 }
 0xe34   :  { %3370 = vmatpush.xpose.msra.mxu1 %v3096_v26  ;;  %v3116_v42 = vadd.f32 %v3115_v43, %v2915_v46  ;;  %v2911_v43 = vperm.slane %v6013_v25, 2 }
 0xe38   :  { %3371 = vmatpush.xpose.msra.mxu1 %v3093_v45  ;;  %v6018_v44 = vpop.f32.mrf.mxu3 }
 0xe39   :  { %v3193_v47 = vpop.f32.mrf.mxu2 }
 0xe3a   :  { %v3066_v36 = vpop.f32.mrf.mxu0  ;;  %v3194_v9 = vadd.f32 %v3193_v47, %v2918_v48  ;;  %v3012_v47 = vadd.f32 %v6006_v57, %v2911_v43  ;;  %v2920_v57 = vperm.slane %v6025_v21, 3 }
 0xe3b   :  { %v3118_v49 = vpop.f32.mrf.mxu1  ;;  %v3067_v56 = vadd.f32 %v3066_v36, %v2913_v52 }
 0xe3c   :  { %3372 = vmatpush.xpose.msra.mxu1 %v3090_v58  ;;  %v3119_v6 = vadd.f32 %v3118_v49, %v2915_v46  ;;  %v2912_v58 = vperm.slane %v6013_v25, 3 }
 0xe3f   :  { %3373 = vmatmul.f32.vlgmr.msra.gmra.mxu1 %v2986_v51  ;;  %v3038_v51 = vadd.f32 %v6018_v44, %v2912_v58 }
 0xe40   :  { %v6021_v33 = vpop.f32.mrf.mxu3 }
 0xe41   :  { %v3196_v1 = vpop.f32.mrf.mxu2 }
 0xe42   :  { %v3069_v37 = vpop.f32.mrf.mxu0  ;;  %v3197_v39 = vadd.f32 %v3196_v1, %v2918_v48 }
 0xe43   :  { %v3070_v54 = vadd.f32 %v3069_v37, %v2913_v52  ;;  %v3121_v7 = vpop.f32.mrf.mxu1  ;;  %v3015_v52 = vadd.f32 %v6008_v63, %v2911_v43  ;;  %v3041_v37 = vadd.f32 %v6021_v33, %v2912_v58 }
 0xe44   :  { %v3122_v41 = vadd.f32 %v3121_v7, %v2915_v46 }
 0xe45   :  { %3267 = vmatpush.xpose.msra.mxu0 %v3070_v54  ;;  %v3018_v54 = vadd.f32 %v6010_v32, %v2911_v43 }
 0xe47   :  { %3376 = vmatmul.f32.gmra.mxu1 %v2989_v20 }
 0xe48   :  { %v6028_v2 = vpop.f32.mrf.mxu3 }
 0xe49   :  { %v3199_v5 = vpop.f32.mrf.mxu2  ;;  %3268 = vmatpush.xpose.msra.mxu0 %v3067_v56  ;;  %v3044_v44 = vadd.f32 %v6028_v2, %v2912_v58 }
 0xe4a   :  { %v3200_v11 = vadd.f32 %v3199_v5, %v2918_v48  ;;  %v3167_v27 = vpop.f32.mrf.mxu0 }
 0xe4b   :  { %v3219_v38 = vpop.f32.mrf.mxu1  ;;  %v3168_v23 = vadd.f32 %v3167_v27, %v2917_v12 }
 0xe4c   :  { %4317 = vmatpush.msk.msra.mxu3 %vm2081_vm4, %v3200_v11  ;;  %v3220_v15 = vadd.f32 %v3219_v38, %v2919_v31 }
 0xe4d   :  { %3269 = vmatpush.xpose.msra.mxu0 %v3064_v61 }
 0xe4e   :  { %3448 = vmatpush.msra.mxu3 %v3197_v39 }
 0xe4f   :  { %3379 = vmatmul.f32.gmra.mxu1 %v2992_v8 }
 0xe50   :  { %3449 = vmatpush.msra.mxu3 %v3194_v9  ;;  %v3141_v24 = vpop.f32.mrf.mxu3  ;;  %3270 = vmatmul.f32.vlgmr.msra.gmra.mxu0 %v2960_v40 }
 0xe51   :  { %3473 = vmatpush.xpose.msrb.mxu0 %v3122_v41  ;;  %v3142_v49 = vadd.f32 %v3141_v24, %v2916_v14 }
 0xe52   :  { %v3170_v50 = vpop.f32.mrf.mxu0 }
 0xe53   :  { %v3222_v10 = vpop.f32.mrf.mxu1  ;;  %v3171_v0 = vadd.f32 %v3170_v50, %v2917_v12 }
 0xe54   :  { %v3223_v45 = vadd.f32 %v3222_v10, %v2919_v31 }
 0xe55   :  { %3474 = vmatpush.xpose.msrb.mxu0 %v3119_v6 }
 0xe58   :  { %v3144_v30 = vpop.f32.mrf.mxu3  ;;  %3273 = vmatmul.f32.gmra.mxu0 %v2963_v53 }
 0xe59   :  { %3475 = vmatpush.xpose.msrb.mxu0 %v3116_v42  ;;  %v3145_v18 = vadd.f32 %v3144_v30, %v2916_v14 }
 0xe5a   :  { %v3173_v60 = vpop.f32.mrf.mxu0 }
 0xe5b   :  { %v3174_v59 = vadd.f32 %v3173_v60, %v2917_v12  ;;  %v3225_v13 = vpop.f32.mrf.mxu1 }
 0xe5c   :  { %v3226_v35 = vadd.f32 %v3225_v13, %v2919_v31 }
 0xe5d   :  { %4313 = vmatpush.msk.msrb.mxu2 %vm2081_vm4, %v3174_v59 }
 0xe5f   :  { %3345 = vmatpush.msrb.mxu2 %v3171_v0 }
 0xe60   :  { %v3147_v26 = vpop.f32.mrf.mxu3  ;;  %3276 = vmatmul.f32.gmra.mxu0 %v2966_v19 }
 0xe61   :  { %v3148_v55 = vadd.f32 %v3147_v26, %v2916_v14  ;;  %3346 = vmatpush.msrb.mxu2 %v3168_v23 }
 0xe63   :  { %4321 = vmatpush.msk.msra.mxu2 %vm2081_vm4, %v3226_v35  ;;  %3576 = vmatpush.xpose.msrb.mxu1 %v3148_v55 }
 0xe65   :  { %3551 = vmatpush.msra.mxu2 %v3223_v45 }
 0xe67   :  { %3552 = vmatpush.msra.mxu2 %v3220_v15  ;;  %3577 = vmatpush.xpose.msrb.mxu1 %v3145_v18 }
 0xe68   :  { %v3245_v36 = vpop.f32.mrf.mxu3  ;;  %3476 = vmatmul.f32.vlgmr.msrb.gmra.mxu0 %v3012_v47 }
 0xe69   :  { %v3246_v56 = vadd.f32 %v3245_v36, %v2920_v57 }
 0xe6b   :  { %3578 = vmatpush.xpose.msrb.mxu1 %v3142_v49 }
 0xe6e   :  { %3579 = vmatmul.f32.vlgmr.msrb.gmra.mxu1 %v3038_v51 }
 0xe70   :  { %v3248_v1 = vpop.f32.mrf.mxu3  ;;  %3479 = vmatmul.f32.gmra.mxu0 %v3015_v52 }
 0xe71   :  { %v3249_v20 = vadd.f32 %v3248_v1, %v2920_v57 }
 0xe76   :  { %3582 = vmatmul.f32.gmra.mxu1 %v3041_v37 }
 0xe78   :  { %v3251_v7 = vpop.f32.mrf.mxu3  ;;  %3482 = vmatmul.f32.gmra.mxu0 %v3018_v54 }
 0xe79   :  { %v3252_v25 = vadd.f32 %v3251_v7, %v2920_v57 }
 0xe7b   :  { %4325 = vmatpush.msk.msrb.mxu3 %vm2081_vm4, %v3252_v25 }
 0xe7d   :  { %3654 = vmatpush.msrb.mxu3 %v3249_v20 }
 0xe7e   :  { %3585 = vmatmul.f32.gmra.mxu1 %v3044_v44 }
 0xe7f   :  { %3655 = vmatpush.msrb.mxu3 %v3246_v56 }
 0xebc   :  { %v3374_v63 = vpop.f32.mrf.mxu1 }
 0xebd   :  { %v3383_v48 = vmul.f32 0.35355338, %v3374_v63 }
 0xebf   :  { %v3386_v33 = vadd.f32 %v3383_v48, %v5583_v22 }
 0xec1   :  { %v3389_v32 = vsel %vm2037_vm9, %v3386_v33, -inf }
 0xec2   :  { %3390 = vmax.xlane.f32.xlu2 %v3389_v32 }
 0xec4   :  { %v3377_v21 = vpop.f32.mrf.mxu1 }
 0xec5   :  { %v3384_v5 = vmul.f32 0.35355338, %v3377_v21 }
 0xec7   :  { %v3387_v29 = vadd.f32 %v3384_v5, %v5591_v62 }
 0xec9   :  { %v3392_v46 = vsel %vm2037_vm9, %v3387_v29, -inf }
 0xeca   :  { %3393 = vmax.xlane.f32.xlu1 %v3392_v46 }
 0xecc   :  { %v3380_v27 = vpop.f32.mrf.mxu1 }
 0xecd   :  { %v3271_v11 = vpop.f32.mrf.mxu0  ;;  %v3385_v38 = vmul.f32 0.35355338, %v3380_v27 }
 0xece   :  { %v3280_v2 = vmul.f32 0.35355338, %v3271_v11 }
 0xecf   :  { %v6056_v40 = vadd.f32 %v3385_v38, %v5604_v17 }
 0xed0   :  { %v3283_v61 = vadd.f32 %v3280_v2, %v5583_v22 }
 0xed1   :  { %v3395_v6 = vsel %vm2044_vm12, %v6056_v40, -inf }
 0xed2   :  { %v3286_v39 = vsel %vm2037_vm9, %v3283_v61, -inf }
 0xed3   :  { %3287 = vmax.xlane.f32.xlu0 %v3286_v39 }
 0xed5   :  { %v3274_v41 = vpop.f32.mrf.mxu0 }
 0xed6   :  { %v3281_v8 = vmul.f32 0.35355338, %v3274_v41 }
 0xed8   :  { %v6059_v9 = vadd.f32 %v3281_v8, %v5591_v62 }
 0xeda   :  { %v3289_v24 = vsel %vm2037_vm9, %v6059_v9, -inf }
 0xedb   :  { %3396 = vmax.xlane.f32.xlu0 %v3395_v6  ;;  %3290 = vmax.xlane.f32.xlu2 %v3289_v24 }
 0xedd   :  { %v3277_v50 = vpop.f32.mrf.mxu0 }
 0xede   :  { %v3282_v10 = vmul.f32 0.35355338, %v3277_v50 }
 0xee0   :  { %v6066_v42 = vadd.f32 %v3282_v10, %v5604_v17 }
 0xee2   :  { %v3292_v53 = vsel %vm2044_vm12, %v6066_v42, -inf }
 0xee3   :  { %3293 = vmax.xlane.f32.xlu1 %v3292_v53 }
 0xee5   :  { %v3477_v30 = vpop.f32.mrf.mxu0 }
 0xee6   :  { %v3486_v12 = vmul.f32 0.35355338, %v3477_v30 }
 0xee8   :  { %v6071_v60 = vadd.f32 %v3486_v12, %v5583_v22 }
 0xeea   :  { %v3492_v59 = vsel %vm2037_vm9, %v6071_v60, -inf }
 0xeeb   :  { %v3580_v0 = vpop.f32.mrf.mxu1  ;;  %3493 = vmax.xlane.f32.xlu0 %v3492_v59 }
 0xeec   :  { %v3589_v13 = vmul.f32 0.35355338, %v3580_v0 }
 0xeed   :  { %v3480_v19 = vpop.f32.mrf.mxu0 }
 0xeee   :  { %v6076_v31 = vadd.f32 %v3589_v13, %v5583_v22  ;;  %v3487_v23 = vmul.f32 0.35355338, %v3480_v19 }
 0xef0   :  { %v3595_v14 = vsel %vm2037_vm9, %v6076_v31, -inf  ;;  %v6081_v55 = vadd.f32 %v3487_v23, %v5591_v62 }
 0xef1   :  { %3596 = vmax.xlane.f32.xlu2 %v3595_v14 }
 0xef2   :  { %v3495_v18 = vsel %vm2037_vm9, %v6081_v55, -inf }
 0xef3   :  { %v3583_v35 = vpop.f32.mrf.mxu1 }
 0xef4   :  { %v3590_v26 = vmul.f32 0.35355338, %v3583_v35 }
 0xef5   :  { %v3483_v43 = vpop.f32.mrf.mxu0 }
 0xef6   :  { %v6084_v45 = vadd.f32 %v3590_v26, %v5591_v62  ;;  %v3488_v15 = vmul.f32 0.35355338, %v3483_v43 }
 0xef8   :  { %v3598_v22 = vsel %vm2037_vm9, %v6084_v45, -inf  ;;  %v6091_v36 = vadd.f32 %v3488_v15, %v5604_v17 }
 0xef9   :  { %3496 = vmax.xlane.f32.xlu2 %v3495_v18  ;;  %3599 = vmax.xlane.f32.xlu1 %v3598_v22 }
 0xefa   :  { %v3498_v51 = vsel %vm2044_vm12, %v6091_v36, -inf }
 0xefb   :  { %v3586_v47 = vpop.f32.mrf.mxu1 }
 0xefc   :  { %v3591_v58 = vmul.f32 0.35355338, %v3586_v47 }
 0xefe   :  { %v6094_v49 = vadd.f32 %v3591_v58, %v5604_v17 }
 0xf00   :  { %v3601_v62 = vsel %vm2044_vm12, %v6094_v49, -inf }
 0xf01   :  { %3602 = vmax.xlane.f32.xlu0 %v3601_v62  ;;  %3499 = vmax.xlane.f32.xlu1 %v3498_v51 }
 0xf35   :  { %v3391_v52 = vpop.xlane.xlu2 %3390 }
 0xf36   :  { %v3398_v1 = vsub.f32 %v3386_v33, %v3391_v52 }
 0xf38   :  { %v3401_v37 = vmul.f32 1.442695, %v3398_v1 }
 0xf3a   :  { %4551 = vpow2.f32 %v3401_v37 }
 0xf3d   :  { %v3394_v54 = vpop.xlane.xlu1 %3393 }
 0xf3e   :  { %v3399_v57 = vsub.f32 %v3387_v29, %v3394_v54 }
 0xf40   :  { %v6100_v7 = vpop.eup %4551  ;;  %v3403_v25 = vmul.f32 1.442695, %v3399_v57 }
 0xf41   :  { %v3407_v17 = vsel %vm2037_vm9, %v6100_v7, 0.0 }
 0xf42   :  { %4553 = vpow2.f32 %v3403_v25  ;;  %3408 = vadd.xlane.f32.xlu2 %v3407_v17 }
 0xf46   :  { %v3288_v20 = vpop.xlane.xlu0 %3287 }
 0xf47   :  { %v3295_v44 = vsub.f32 %v3283_v61, %v3288_v20 }
 0xf48   :  { %v6104_v56 = vpop.eup %4553 }
 0xf49   :  { %v3298_v63 = vmul.f32 1.442695, %v3295_v44  ;;  %v3410_v48 = vsel %vm2037_vm9, %v6104_v56, 0.0 }
 0xf4a   :  { %3411 = vadd.xlane.f32.xlu1 %v3410_v48 }
 0xf4b   :  { %4555 = vpow2.f32 %v3298_v63 }
 0xf4e   :  { %v3397_v33 = vpop.xlane.xlu0 %3396  ;;  %v3291_v32 = vpop.xlane.xlu2 %3290 }
 0xf4f   :  { %v3400_v21 = vsub.f32 %v6056_v40, %v3397_v33  ;;  %v3296_v5 = vsub.f32 %v6059_v9, %v3291_v32 }
 0xf51   :  { %v6110_v29 = vpop.eup %4555  ;;  %v3405_v46 = vmul.f32 1.442695, %v3400_v21  ;;  %v3300_v11 = vmul.f32 1.442695, %v3296_v5 }
 0xf52   :  { %v3304_v2 = vsel %vm2037_vm9, %v6110_v29, 0.0 }
 0xf53   :  { %4557 = vpow2.f32 %v3405_v46  ;;  %3305 = vadd.xlane.f32.xlu0 %v3304_v2  ;;  %v3697_v2 = vld [vmem:[%s6382_s27 + $0xf8] sm:$0xff] }
 0xf54   :  { %4559 = vpow2.f32 %v3300_v11 }
 0xf56   :  { %v3294_v27 = vpop.xlane.xlu1 %3293 }
 0xf57   :  { %v3297_v61 = vsub.f32 %v6066_v42, %v3294_v27  ;;  %v3696_v27 = vld [vmem:[%s6382_s27 + $0xf0] sm:$0xff] }
 0xf59   :  { %v6115_v38 = vpop.eup %4557  ;;  %v3302_v39 = vmul.f32 1.442695, %v3297_v61  ;;  %v3695_v61 = vld [vmem:[%s6382_s27 + $0xe8] sm:$0xff] }
 0xf5a   :  { %v6117_v41 = vpop.eup %4559  ;;  %v3413_v8 = vsel %vm2044_vm12, %v6115_v38, 0.0 }
 0xf5b   :  { %4561 = vpow2.f32 %v3302_v39  ;;  %3414 = vadd.xlane.f32.xlu0 %v3413_v8  ;;  %v3307_v40 = vsel %vm2037_vm9, %v6117_v41, 0.0  ;;  %v3680_v39 = vld [vmem:[%s6382_s27 + $0x70] sm:$0xff] }
 0xf5c   :  { %3308 = vadd.xlane.f32.xlu2 %v3307_v40  ;;  %v3679_v40 = vld [vmem:[%s6382_s27 + $0x68] sm:$0xff] }
 0xf5e   :  { %v3494_v9 = vpop.xlane.xlu0 %3493 }
 0xf5f   :  { %v3501_v6 = vsub.f32 %v6071_v60, %v3494_v9 }
 0xf61   :  { %v6124_v24 = vpop.eup %4561  ;;  %v3504_v50 = vmul.f32 1.442695, %v3501_v6  ;;  %v3693_v6 = vld [vmem:[%s6382_s27 + $0xd8] sm:$0xff] }
 0xf62   :  { %v3310_v10 = vsel %vm2044_vm12, %v6124_v24, 0.0 }
 0xf63   :  { %4563 = vpow2.f32 %v3504_v50  ;;  %3311 = vadd.xlane.f32.xlu1 %v3310_v10  ;;  %v3678_v50 = vld [vmem:[%s6382_s27 + $0x60] sm:$0xff]  ;;  %v3692_v10 = vld [vmem:[%s6382_s27 + $0xd0] sm:$0xff] }
 0xf64   :  { %v3597_v42 = vpop.xlane.xlu2 %3596 }
 0xf65   :  { %v3604_v53 = vsub.f32 %v6076_v31, %v3597_v42  ;;  %v3677_v42 = vld [vmem:[%s6382_s27 + $0x58] sm:$0xff] }
 0xf67   :  { %v3607_v30 = vmul.f32 1.442695, %v3604_v53  ;;  %v3691_v53 = vld [vmem:[%s6382_s27 + $0xc8] sm:$0xff] }
 0xf69   :  { %v6129_v12 = vpop.eup %4563  ;;  %4565 = vpow2.f32 %v3607_v30  ;;  %v3676_v30 = vld [vmem:[%s6382_s27 + $0x50] sm:$0xff] }
 0xf6a   :  { %v3510_v59 = vsel %vm2037_vm9, %v6129_v12, 0.0 }
 0xf6b   :  { %3511 = vadd.xlane.f32.xlu0 %v3510_v59 }
 0xf6c   :  { %v3497_v60 = vpop.xlane.xlu2 %3496  ;;  %v3600_v0 = vpop.xlane.xlu1 %3599 }
 0xf6d   :  { %v3502_v13 = vsub.f32 %v6081_v55, %v3497_v60  ;;  %v3605_v19 = vsub.f32 %v6084_v45, %v3600_v0  ;;  %v3690_v60 = vld [vmem:[%s6382_s27 + $0xc0] sm:$0xff] }
 0xf6f   :  { %v6135_v23 = vpop.eup %4565  ;;  %v3506_v14 = vmul.f32 1.442695, %v3502_v13  ;;  %v3609_v35 = vmul.f32 1.442695, %v3605_v19  ;;  %v3689_v19 = vld [vmem:[%s6382_s27 + $0xb8] sm:$0xff] }
 0xf70   :  { %v3613_v31 = vsel %vm2037_vm9, %v6135_v23, 0.0 }
 0xf71   :  { %4567 = vpow2.f32 %v3506_v14  ;;  %3614 = vadd.xlane.f32.xlu2 %v3613_v31  ;;  %v3688_v14 = vld [vmem:[%s6382_s27 + $0xb0] sm:$0xff] }
 0xf72   :  { %4569 = vpow2.f32 %v3609_v35  ;;  %v3687_v35 = vld [vmem:[%s6382_s27 + $0xa8] sm:$0xff] }
 0xf74   :  { %v3603_v26 = vpop.xlane.xlu0 %3602  ;;  %v3500_v43 = vpop.xlane.xlu1 %3499 }
 0xf75   :  { %v3606_v15 = vsub.f32 %v6094_v49, %v3603_v26  ;;  %v3503_v18 = vsub.f32 %v6091_v36, %v3500_v43 }
 0xf77   :  { %v6141_v22 = vpop.eup %4567  ;;  %v3611_v55 = vmul.f32 1.442695, %v3606_v15  ;;  %v3508_v45 = vmul.f32 1.442695, %v3503_v18  ;;  %v3686_v15 = vld [vmem:[%s6382_s27 + $0xa0] sm:$0xff] }
 0xf78   :  { %v6143_v47 = vpop.eup %4569  ;;  %v3513_v58 = vsel %vm2037_vm9, %v6141_v22, 0.0 }
 0xf79   :  { %4571 = vpow2.f32 %v3611_v55  ;;  %3514 = vadd.xlane.f32.xlu2 %v3513_v58  ;;  %v3616_v62 = vsel %vm2037_vm9, %v6143_v47, 0.0  ;;  %v3684_v58 = vld [vmem:[%s6382_s27 + $0x90] sm:$0xff] }
 0xf7a   :  { %4573 = vpow2.f32 %v3508_v45  ;;  %3617 = vadd.xlane.f32.xlu1 %v3616_v62  ;;  %v3685_v45 = vld [vmem:[%s6382_s27 + $0x98] sm:$0xff] }
 0xf7f   :  { %v6149_v51 = vpop.eup %4571 }
 0xf80   :  { %v6151_v49 = vpop.eup %4573  ;;  %v3619_v36 = vsel %vm2044_vm12, %v6149_v51, 0.0 }
 0xf81   :  { %3620 = vadd.xlane.f32.xlu0 %v3619_v36  ;;  %v3516_v52 = vsel %vm2044_vm12, %v6151_v49, 0.0 }
 0xf82   :  { %3517 = vadd.xlane.f32.xlu1 %v3516_v52 }
 0xfb5   :  { %v3409_v1 = vpop.xlane.xlu2 %3408 }
 0xfb6   :  { %4575 = vrcp.f32 %v3409_v1  ;;  %v3675_v1 = vld [vmem:[%s6382_s27 + $0x48] sm:$0xff] }
 0xfbc   :  { %v4576_v37 = vpop.eup %4575 }
 0xfbd   :  { %v3419_v54 = vmul.f32 %v4576_v37, %v6100_v7  ;;  %v3412_v57 = vpop.xlane.xlu1 %3411  ;;  %v3682_v37 = vld [vmem:[%s6382_s27 + $0x80] sm:$0xff] }
 0xfbe   :  { %4577 = vrcp.f32 %v3412_v57  ;;  %v3673_v57 = vld [vmem:[%s6382_s27 + $0x38] sm:$0xff] }
 0xfbf   :  { %4318 = vmatmul.msk.f32.vlgmr.msra.gmra.mxu3 %vm2037_vm9, %v3419_v54  ;;  %v3674_v54 = vld [vmem:[%s6382_s27 + $0x40] sm:$0xff] }
 0xfc4   :  { %v4578_v25 = vpop.eup %4577 }
 0xfc5   :  { %v3420_v17 = vmul.f32 %v4578_v25, %v6104_v56  ;;  %v3670_v25 = vld [vmem:[%s6382_s27 + $0x20] sm:$0xff] }
 0xfc6   :  { %v3306_v20 = vpop.xlane.xlu0 %3305 }
 0xfc7   :  { %4579 = vrcp.f32 %v3306_v20  ;;  %4319 = vmatmul.msk.f32.gmra.mxu3 %vm2037_vm9, %v3420_v17  ;;  %v3669_v17 = vld [vmem:[%s6382_s27 + $0x18] sm:$0xff] }
 0xfc8   :  { %v3713_v20 = vld [vmem:[%s6382_s27 + $0x178] sm:$0xff] }
 0xfc9   :  { %3786 = vmatpush.msra.mxu1 %v3713_v20 }
 0xfcd   :  { %v4580_v44 = vpop.eup %4579 }
 0xfce   :  { %v3316_v63 = vmul.f32 %v4580_v44, %v6110_v29  ;;  %v3415_v48 = vpop.xlane.xlu0 %3414  ;;  %v3712_v44 = vld [vmem:[%s6382_s27 + $0x170] sm:$0xff] }
 0xfcf   :  { %4581 = vrcp.f32 %v3415_v48  ;;  %v3309_v33 = vpop.xlane.xlu2 %3308  ;;  %v3711_v48 = vld [vmem:[%s6382_s27 + $0x168] sm:$0xff]  ;;  %3787 = vmatpush.msra.mxu1 %v3712_v44 }
 0xfd0   :  { %4583 = vrcp.f32 %v3309_v33  ;;  %4314 = vmatmul.msk.f32.vlgmr.msrb.gmra.mxu2 %vm2037_vm9, %v3316_v63  ;;  %v3668_v63 = vld [vmem:[%s6382_s27 + $0x10] sm:$0xff]  ;;  %v3667_v33 = vld [vmem:[%s6382_s27 + $0x8] sm:$0xff] }
 0xfd1   :  { %3760 = vmatpush.msrb.mxu2 %v3697_v2  ;;  %3788 = vmatpush.msra.mxu1 %v3711_v48  ;;  %v3726_v2 = vld [vmem:[%s6382_s27 + $0x1e0] sm:$0xff] }
 0xfd3   :  { %3761 = vmatpush.msrb.mxu2 %v3696_v27  ;;  %v3706_v27 = vld [vmem:[%s6382_s27 + $0x140] sm:$0xff] }
 0xfd5   :  { %v4582_v7 = vpop.eup %4581  ;;  %3762 = vmatpush.msrb.mxu2 %v3695_v61  ;;  %v3725_v61 = vld [vmem:[%s6382_s27 + $0x1d8] sm:$0xff] }
 0xfd6   :  { %v4584_v32 = vpop.eup %4583  ;;  %v3312_v21 = vpop.xlane.xlu1 %3311  ;;  %v3421_v56 = vmul.f32 %v4582_v7, %v6115_v38  ;;  %v3681_v38 = vld [vmem:[%s6382_s27 + $0x78] sm:$0xff]  ;;  %v3666_v7 = vld [vmem:[%s6382_s27] sm:$0xff] }
 0xfd7   :  { %4585 = vrcp.f32 %v3312_v21  ;;  %v3317_v5 = vmul.f32 %v4584_v32, %v6117_v41  ;;  %v3694_v41 = vld [vmem:[%s6382_s27 + $0xe0] sm:$0xff]  ;;  %3734 = vmatpush.msra.mxu0 %v3681_v38  ;;  %v3729_v21 = vld [vmem:[%s6382_s27 + $0x1f8] sm:$0xff] }
 0xfd8   :  { %4320 = vmatmul.msk.f32.gmra.mxu3 %vm2037_vm9, %v3421_v56  ;;  %3763 = vmatpush.msrb.mxu2 %v3694_v41  ;;  %v3710_v32 = vld [vmem:[%s6382_s27 + $0x160] sm:$0xff]  ;;  %v3709_v56 = vld [vmem:[%s6382_s27 + $0x158] sm:$0xff]  ;;  %v3704_v41 = vld [vmem:[%s6382_s27 + $0x130] sm:$0xff] }
 0xfd9   :  { %4315 = vmatmul.msk.f32.gmra.mxu2 %vm2037_vm9, %v3317_v5  ;;  %3735 = vmatpush.msra.mxu0 %v3680_v39  ;;  %v3728_v5 = vld [vmem:[%s6382_s27 + $0x1f0] sm:$0xff]  ;;  %v3705_v38 = vld [vmem:[%s6382_s27 + $0x138] sm:$0xff] }
 0xfda   :  { %3764 = vmatpush.msrb.mxu2 %v3693_v6  ;;  %3789 = vmatpush.msra.mxu1 %v3710_v32  ;;  %v3724_v39 = vld [vmem:[%s6382_s27 + $0x1d0] sm:$0xff] }
 0xfdb   :  { %3736 = vmatpush.msra.mxu0 %v3679_v40  ;;  %3812 = vmatpush.msra.mxu3 %v3729_v21  ;;  %v3703_v40 = vld [vmem:[%s6382_s27 + $0x128] sm:$0xff] }
 0xfdc   :  { %3765 = vmatpush.msrb.mxu2 %v3692_v10  ;;  %3790 = vmatpush.msra.mxu1 %v3709_v56  ;;  %v3701_v10 = vld [vmem:[%s6382_s27 + $0x118] sm:$0xff] }
 0xfdd   :  { %v4586_v29 = vpop.eup %4585  ;;  %3737 = vmatpush.msra.mxu0 %v3678_v50  ;;  %3813 = vmatpush.msra.mxu3 %v3728_v5  ;;  %v3721_v50 = vld [vmem:[%s6382_s27 + $0x1b8] sm:$0xff] }
 0xfde   :  { %v3512_v46 = vpop.xlane.xlu0 %3511  ;;  %v3318_v11 = vmul.f32 %v4586_v29, %v6124_v24  ;;  %3766 = vmatpush.msrb.mxu2 %v3691_v53  ;;  %v3708_v29 = vld [vmem:[%s6382_s27 + $0x150] sm:$0xff] }
 0xfdf   :  { %4587 = vrcp.f32 %v3512_v46  ;;  %3738 = vmatpush.msra.mxu0 %v3677_v42  ;;  %v3727_v46 = vld [vmem:[%s6382_s27 + $0x1e8] sm:$0xff]  ;;  %3791 = vmatpush.msra.mxu1 %v3708_v29  ;;  %v3720_v42 = vld [vmem:[%s6382_s27 + $0x1b0] sm:$0xff] }
 0xfe0   :  { %3767 = vmatpush.msrb.mxu2 %v3690_v60  ;;  %3814 = vmatpush.msra.mxu3 %v3727_v46  ;;  %v3700_v53 = vld [vmem:[%s6382_s27 + $0x110] sm:$0xff]  ;;  %v3718_v60 = vld [vmem:[%s6382_s27 + $0x1a0] sm:$0xff] }
 0xfe1   :  { %4316 = vmatmul.msk.f32.gmra.mxu2 %vm2037_vm9, %v3318_v11  ;;  %3739 = vmatpush.msra.mxu0 %v3676_v30  ;;  %v3707_v11 = vld [vmem:[%s6382_s27 + $0x148] sm:$0xff] }
 0xfe2   :  { %3768 = vmatpush.msrb.mxu2 %v3689_v19  ;;  %3792 = vmatpush.msra.mxu1 %v3707_v11  ;;  %v3719_v30 = vld [vmem:[%s6382_s27 + $0x1a8] sm:$0xff]  ;;  %v3716_v19 = vld [vmem:[%s6382_s27 + $0x190] sm:$0xff] }
 0xfe3   :  { %3740 = vmatpush.msra.mxu0 %v3675_v1  ;;  %3815 = vmatpush.msra.mxu3 %v3726_v2 }
 0xfe4   :  { %v3615_v8 = vpop.xlane.xlu2 %3614  ;;  %3769 = vmatpush.msrb.mxu2 %v3688_v14  ;;  %3793 = vmatpush.msra.mxu1 %v3706_v27  ;;  %v3715_v14 = vld [vmem:[%s6382_s27 + $0x188] sm:$0xff] }
 0xfe5   :  { %v4588_v9 = vpop.eup %4587  ;;  %4589 = vrcp.f32 %v3615_v8  ;;  %3741 = vmatpush.msra.mxu0 %v3674_v54  ;;  %3816 = vmatpush.msra.mxu3 %v3725_v61  ;;  %v3723_v8 = vld [vmem:[%s6382_s27 + $0x1c8] sm:$0xff] }
 0xfe6   :  { %v3522_v24 = vmul.f32 %v4588_v9, %v6129_v12  ;;  %3770 = vmatpush.msrb.mxu2 %v3687_v35  ;;  %3794 = vmatpush.msra.mxu1 %v3705_v38  ;;  %v3722_v9 = vld [vmem:[%s6382_s27 + $0x1c0] sm:$0xff] }
 0xfe7   :  { %3742 = vmatpush.msra.mxu0 %v3673_v57  ;;  %3817 = vmatpush.msra.mxu3 %v3724_v39  ;;  %v3714_v35 = vld [vmem:[%s6382_s27 + $0x180] sm:$0xff] }
 0xfe8   :  { %3771 = vmatpush.msrb.mxu2 %v3686_v15  ;;  %3795 = vmatpush.msra.mxu1 %v3704_v41  ;;  %v4046_v15 = vld [vmem:[%s6383_s1 + $0x10] sm:$0xff] }
 0xfe9   :  { %4322 = vmatmul.msk.f32.vlgmr.msra.gmra.mxu2 %vm2037_vm9, %v3522_v24  ;;  %3818 = vmatpush.msra.mxu3 %v3723_v8  ;;  %v3702_v24 = vld [vmem:[%s6382_s27 + $0x120] sm:$0xff] }
 0xfea   :  { %3772 = vmatpush.msrb.mxu2 %v3685_v45  ;;  %3796 = vmatpush.msra.mxu1 %v3703_v40  ;;  %v4044_v45 = vld [vmem:[%s6383_s1] sm:$0xff] }
 0xfeb   :  { %v4590_v59 = vpop.eup %4589  ;;  %3819 = vmatpush.msra.mxu3 %v3722_v9 }
 0xfec   :  { %v3625_v12 = vmul.f32 %v4590_v59, %v6135_v23  ;;  %v3515_v0 = vpop.xlane.xlu2 %3514  ;;  %3773 = vmatpush.msrb.mxu2 %v3684_v58  ;;  %3797 = vmatpush.msra.mxu1 %v3702_v24  ;;  %v3699_v59 = vld [vmem:[%s6382_s27 + $0x108] sm:$0xff] }
 0xfed   :  { %4591 = vrcp.f32 %v3515_v0  ;;  %v3618_v13 = vpop.xlane.xlu1 %3617  ;;  %3820 = vmatpush.msra.mxu3 %v3721_v50  ;;  %v3698_v0 = vld [vmem:[%s6382_s27 + $0x100] sm:$0xff] }
 0xfee   :  { %4593 = vrcp.f32 %v3618_v13  ;;  %4326 = vmatmul.msk.f32.vlgmr.msrb.gmra.mxu3 %vm2037_vm9, %v3625_v12  ;;  %3798 = vmatpush.msra.mxu1 %v3701_v10  ;;  %v3717_v13 = vld [vmem:[%s6382_s27 + $0x198] sm:$0xff] }
 0xfef   :  { %3821 = vmatpush.msra.mxu3 %v3720_v42 }
 0xff0   :  { %3799 = vmatpush.msra.mxu1 %v3700_v53 }
 0xff1   :  { %3822 = vmatpush.msra.mxu3 %v3719_v30 }
 0xff2   :  { %3800 = vmatpush.msra.mxu1 %v3699_v59 }
 0xff3   :  { %v4592_v31 = vpop.eup %4591  ;;  %3823 = vmatpush.msra.mxu3 %v3718_v60 }
 0xff4   :  { %v4594_v23 = vpop.eup %4593  ;;  %v3621_v26 = vpop.xlane.xlu0 %3620  ;;  %v3523_v43 = vmul.f32 %v4592_v31, %v6141_v22  ;;  %v3683_v22 = vld [vmem:[%s6382_s27 + $0x88] sm:$0xff]  ;;  %3801 = vmatpush.msra.mxu1 %v3698_v0 }
 0xff5   :  { %4595 = vrcp.f32 %v3621_v26  ;;  %v3518_v18 = vpop.xlane.xlu1 %3517  ;;  %v3626_v55 = vmul.f32 %v4594_v23, %v6143_v47  ;;  %3774 = vmatpush.msrb.mxu2 %v3683_v22  ;;  %3824 = vmatpush.msra.mxu3 %v3717_v13 }
 0xff6   :  { %4597 = vrcp.f32 %v3518_v18  ;;  %4323 = vmatmul.msk.f32.gmra.mxu2 %vm2037_vm9, %v3523_v43  ;;  %v4047_v43 = vld [vmem:[%s6383_s1 + $0x18] sm:$0xff] }
 0xff7   :  { %4327 = vmatmul.msk.f32.gmra.mxu3 %vm2037_vm9, %v3626_v55  ;;  %3775 = vmatpush.msrb.mxu2 %v3682_v37  ;;  %v4045_v55 = vld [vmem:[%s6383_s1 + $0x8] sm:$0xff]  ;;  %v4416_v37 = vld [vmem:[%s6384_s28] ss:$0 sm:$0xff] }
 0xff8   :  { %3825 = vmatpush.msra.mxu3 %v3716_v19  ;;  %v3924_v19 = vld [vmem:[%s6385_s2 + $0x18] sm:$0xff] }
 0xffa   :  { %3826 = vmatpush.msra.mxu3 %v3715_v14  ;;  %v3923_v14 = vld [vmem:[%s6385_s2 + $0x10] sm:$0xff] }
 0xffb   :  { %v4596_v62 = vpop.eup %4595 }
 0xffc   :  { %v4598_v36 = vpop.eup %4597  ;;  %v3627_v47 = vmul.f32 %v4596_v62, %v6149_v51  ;;  %v3672_v51 = vld [vmem:[%s6382_s27 + $0x30] sm:$0xff]  ;;  %3827 = vmatpush.msra.mxu3 %v3714_v35  ;;  %v3922_v35 = vld [vmem:[%s6385_s2 + $0x8] sm:$0xff] }
 0xffd   :  { %v3524_v52 = vmul.f32 %v4598_v36, %v6151_v49  ;;  %3743 = vmatpush.msra.mxu0 %v3672_v51  ;;  %v3671_v49 = vld [vmem:[%s6382_s27 + $0x28] sm:$0xff] }
 0xffe   :  { %4090 = vmatpush.msrb.mxu3 %v4047_v43 }
 0xfff   :  { %4324 = vmatmul.msk.f32.gmra.mxu2 %vm2037_vm9, %v3524_v52  ;;  %4328 = vmatmul.msk.f32.gmra.mxu3 %vm2037_vm9, %v3627_v47 }
0x1000   :  { %3744 = vmatpush.msra.mxu0 %v3671_v49  ;;  %4091 = vmatpush.msrb.mxu3 %v4046_v15 }
0x1002   :  { %3745 = vmatpush.msra.mxu0 %v3670_v25  ;;  %4092 = vmatpush.msrb.mxu3 %v4045_v55 }
0x1004   :  { %3746 = vmatpush.msra.mxu0 %v3669_v17  ;;  %4093 = vmatpush.msrb.mxu3 %v4044_v45 }
0x1006   :  { %3747 = vmatpush.msra.mxu0 %v3668_v63 }
0x1008   :  { %3748 = vmatpush.msra.mxu0 %v3667_v33 }
0x100a   :  { %3749 = vmatpush.msra.mxu0 %v3666_v7 }
0x100c   :  { %3950 = vmatpush.msrb.mxu0 %v3924_v19 }
0x100e   :  { %3951 = vmatpush.msrb.mxu0 %v3923_v14 }
0x1010   :  { %3952 = vmatpush.msrb.mxu0 %v3922_v35 }
0x1042   :  { %v3451_v6 = vpop.f32.mrf.mxu3 }
0x1043   :  { %3776 = vmatmul.f32.vlgmr.msrb.gmra.mxu2 %v3451_v6 }
0x104a   :  { %v3454_v12 = vpop.f32.mrf.mxu3 }
0x104b   :  { %3779 = vmatmul.f32.gmra.mxu2 %v3454_v12 }
0x1053   :  { %v3348_v31 = vpop.f32.mrf.mxu2 }
0x1054   :  { %3750 = vmatmul.f32.vlgmr.msra.gmra.mxu0 %v3348_v31  ;;  %v3921_v31 = vld [vmem:[%s6385_s2] sm:$0xff] }
0x1055   :  { %3953 = vmatpush.msrb.mxu0 %v3921_v31 }
0x105b   :  { %v3457_v23 = vpop.f32.mrf.mxu3 }
0x105c   :  { %v3351_v26 = vpop.f32.mrf.mxu2  ;;  %3782 = vmatmul.f32.gmra.mxu2 %v3457_v23 }
0x105d   :  { %3753 = vmatmul.f32.gmra.mxu0 %v3351_v26 }
0x1064   :  { %v3354_v18 = vpop.f32.mrf.mxu2 }
0x1065   :  { %3756 = vmatmul.f32.gmra.mxu0 %v3354_v18 }
0x106c   :  { %v3554_v58 = vpop.f32.mrf.mxu2 }
0x106d   :  { %3802 = vmatmul.f32.vlgmr.msra.gmra.mxu1 %v3554_v58 }
0x1071   :  { %v3657_v22 = vpop.f32.mrf.mxu3 }
0x1072   :  { %3828 = vmatmul.f32.vlgmr.msra.gmra.mxu3 %v3657_v22 }
0x1079   :  { %v3557_v62 = vpop.f32.mrf.mxu2 }
0x107a   :  { %v3660_v36 = vpop.f32.mrf.mxu3  ;;  %3805 = vmatmul.f32.gmra.mxu1 %v3557_v62  ;;  %v3982_v62 = vld [vmem:[%s6386_s10 + $0x78] sm:$0xff] }
0x107b   :  { %3831 = vmatmul.f32.gmra.mxu3 %v3660_v36  ;;  %v3981_v36 = vld [vmem:[%s6386_s10 + $0x70] sm:$0xff]  ;;  %3987 = vmatpush.msra.mxu2 %v3982_v62 }
0x107d   :  { %3988 = vmatpush.msra.mxu2 %v3981_v36 }
0x1082   :  { %v3560_v47 = vpop.f32.mrf.mxu2  ;;  %v3663_v52 = vpop.f32.mrf.mxu3 }
0x1083   :  { %3808 = vmatmul.f32.gmra.mxu1 %v3560_v47  ;;  %3834 = vmatmul.f32.gmra.mxu3 %v3663_v52  ;;  %v3980_v52 = vld [vmem:[%s6386_s10 + $0x68] sm:$0xff] }
0x1084   :  { %3989 = vmatpush.msra.mxu2 %v3980_v52 }
0x108b   :  { %4333 = vmatmul.msk.f32.vlgmr.msrb.gmra.mxu3 %vm1566_vm6, %v5455_v16 }
0x10c6   :  { %v3777_v57 = vpop.f32.mrf.mxu2 }
0x10ce   :  { %v3780_v7 = vpop.f32.mrf.mxu2 }
0x10d1   :  { %v3751_v1 = vpop.f32.mrf.mxu0 }
0x10d2   :  { %v3752_v54 = vadd.f32 %v4416_v37, %v3751_v1 }
0x10d4   :  { %v3778_v25 = vadd.f32 %v3777_v57, %v3752_v54  ;;  %v3979_v57 = vld [vmem:[%s6386_s10 + $0x60] sm:$0xff] }
0x10d5   :  { %3990 = vmatpush.msra.mxu2 %v3979_v57  ;;  %v4051_v57 = vld [vmem:[%s6391_s18 + $0x18] sm:$0xff] }
0x10d6   :  { %4067 = vmatpush.msrb.mxu1 %v4051_v57 }
0x10da   :  { %v3754_v49 = vpop.f32.mrf.mxu0 }
0x10db   :  { %v3755_v63 = vadd.f32 %v4416_v37, %v3754_v49 }
0x10dd   :  { %v3781_v21 = vadd.f32 %v3780_v7, %v3755_v63 }
0x10df   :  { %v3783_v2 = vpop.f32.mrf.mxu2 }
0x10e2   :  { %v3757_v16 = vpop.f32.mrf.mxu0 }
0x10e3   :  { %v3758_v29 = vadd.f32 %v4416_v37, %v3757_v16 }
0x10e5   :  { %v3784_v61 = vadd.f32 %v3783_v2, %v3758_v29  ;;  %v3974_v2 = vld [vmem:[%s6386_s10 + $0x38] sm:$0xff] }
0x10ea   :  { %v3803_v51 = vpop.f32.mrf.mxu1 }
0x10eb   :  { %v3804_v17 = vadd.f32 %v3803_v51, %v3778_v25 }
0x10f5   :  { %v3829_v20 = vpop.f32.mrf.mxu3 }
0x10f6   :  { %v3830_v44 = vadd.f32 %v3829_v20, %v3804_v17  ;;  %v3978_v17 = vld [vmem:[%s6386_s10 + $0x58] sm:$0xff]  ;;  %v4417_v20 = vld [vmem:[%s6387_s7] ss:$0 sm:$0xff] }
0x10f7   :  { %v3806_v48 = vpop.f32.mrf.mxu1  ;;  %3991 = vmatpush.msra.mxu2 %v3978_v17  ;;  %v4111_v17 = vld [vmem:[%s4946_s13 + $0x38] sm:$0xff] }
0x10f8   :  { %v3838_v33 = vadd.f32 %v3830_v44, %v5910_v3  ;;  %v3807_v56 = vadd.f32 %v3806_v48, %v3781_v21  ;;  %v3977_v48 = vld [vmem:[%s6386_s10 + $0x50] sm:$0xff]  ;;  %v3976_v21 = vld [vmem:[%s6386_s10 + $0x48] sm:$0xff]  ;;  %4128 = vmatpush.msra.mxu0 %v4111_v17 }
0x10f9   :  { %3992 = vmatpush.msra.mxu2 %v3977_v48 }
0x10fa   :  { %v3843_v32 = vsel %vm1566_vm6, %v3838_v33, 0.0 }
0x10fb   :  { %3844 = vadd.xlane.f32.xlu2 %v3843_v32  ;;  %3993 = vmatpush.msra.mxu2 %v3976_v21 }
0x10fe   :  { %v3832_v5 = vpop.f32.mrf.mxu3 }
0x10ff   :  { %v3833_v46 = vadd.f32 %v3832_v5, %v3807_v56  ;;  %v3975_v5 = vld [vmem:[%s6386_s10 + $0x40] sm:$0xff] }
0x1100   :  { %v3809_v27 = vpop.f32.mrf.mxu1  ;;  %3994 = vmatpush.msra.mxu2 %v3975_v5 }
0x1101   :  { %v3839_v11 = vadd.f32 %v3833_v46, %v5922_v28  ;;  %v3810_v39 = vadd.f32 %v3809_v27, %v3784_v61 }
0x1102   :  { %3995 = vmatpush.msra.mxu2 %v3974_v2 }
0x1103   :  { %v3846_v38 = vsel %vm1566_vm6, %v3839_v11, 0.0 }
0x1104   :  { %3847 = vadd.xlane.f32.xlu0 %v3846_v38  ;;  %v3973_v38 = vld [vmem:[%s6386_s10 + $0x30] sm:$0xff] }
0x1105   :  { %3996 = vmatpush.msra.mxu2 %v3973_v38  ;;  %v4107_v38 = vld [vmem:[%s4946_s13 + $0x18] sm:$0xff] }
0x1106   :  { %v3835_v3 = vpop.f32.mrf.mxu3 }
0x1107   :  { %v3836_v41 = vadd.f32 %v3835_v3, %v3810_v39 }
0x1109   :  { %v3840_v8 = vadd.f32 %v3836_v41, %v5942_v34 }
0x110b   :  { %v3849_v40 = vsel %vm1568_vm7, %v3840_v8, 0.0 }
0x110c   :  { %3850 = vadd.xlane.f32.xlu1 %v3849_v40 }
0x116e   :  { %v3845_v9 = vpop.xlane.xlu2 %3844 }
0x116f   :  { %v3852_v6 = vmul.f32 %v3845_v9, %v5802_v4 }
0x1171   :  { %v3855_v24 = vsub.f32 %v3838_v33, %v3852_v6  ;;  %v4418_v33 = vld [vmem:[%s6388_s11] ss:$0 sm:$0xff] }
0x1172   :  { %v3971_v6 = vld [vmem:[%s6386_s10 + $0x20] sm:$0xff] }
0x1173   :  { %v3858_v28 = vmul.f32 %v3855_v24, %v3855_v24 }
0x1175   :  { %v3861_v50 = vsel %vm1566_vm6, %v3858_v28, 0.0 }
0x1176   :  { %3862 = vadd.xlane.f32.xlu2 %v3861_v50  ;;  %v3970_v50 = vld [vmem:[%s6386_s10 + $0x18] sm:$0xff] }
0x1177   :  { %v3848_v10 = vpop.xlane.xlu0 %3847 }
0x1178   :  { %v3853_v42 = vmul.f32 %v3848_v10, %v5802_v4 }
0x117a   :  { %v6261_v53 = vsub.f32 %v3839_v11, %v3853_v42 }
0x117c   :  { %v3859_v34 = vmul.f32 %v6261_v53, %v6261_v53 }
0x117e   :  { %v3864_v30 = vsel %vm1566_vm6, %v3859_v34, 0.0 }
0x117f   :  { %v3851_v59 = vpop.xlane.xlu1 %3850  ;;  %3865 = vadd.xlane.f32.xlu0 %v3864_v30 }
0x1180   :  { %v3854_v60 = vmul.f32 %v3851_v59, %v5802_v4  ;;  %v3969_v59 = vld [vmem:[%s6386_s10 + $0x10] sm:$0xff] }
0x1182   :  { %v6267_v12 = vsub.f32 %v3840_v8, %v3854_v60  ;;  %v3972_v8 = vld [vmem:[%s6386_s10 + $0x28] sm:$0xff] }
0x1183   :  { %3997 = vmatpush.msra.mxu2 %v3972_v8  ;;  %v3968_v60 = vld [vmem:[%s6386_s10 + $0x8] sm:$0xff]  ;;  %v4423_v8 = vld [vmem:[%s6394_s26] ss:$0 sm:$0xff] }
0x1184   :  { %v3860_v0 = vmul.f32 %v6267_v12, %v6267_v12 }
0x1185   :  { %3998 = vmatpush.msra.mxu2 %v3971_v6 }
0x1186   :  { %v3867_v13 = vsel %vm1568_vm7, %v3860_v0, 0.0  ;;  %v3967_v0 = vld [vmem:[%s6386_s10] sm:$0xff] }
0x1187   :  { %3868 = vadd.xlane.f32.xlu1 %v3867_v13  ;;  %3999 = vmatpush.msra.mxu2 %v3970_v50  ;;  %v4419_v13 = vld [vmem:[%s6389_s15] ss:$0 sm:$0xff]  ;;  %v4424_v50 = vld [vmem:[#allocation2] ss:$0 sm:$0xff] }
0x1189   :  { %4000 = vmatpush.msra.mxu2 %v3969_v59 }
0x118b   :  { %4001 = vmatpush.msra.mxu2 %v3968_v60 }
0x118d   :  { %4002 = vmatpush.msra.mxu2 %v3967_v0 }
0x11e9   :  { %v3863_v23 = vpop.xlane.xlu2 %3862 }
0x11ea   :  { %v3870_v26 = vmul.f32 %v3863_v23, %v5802_v4 }
0x11ec   :  { %v3873_v43 = vadd.f32 1e-05, %v3870_v26 }
0x11ee   :  { %4599 = vrsqrt.f32 %v3873_v43  ;;  %vm3882_vm9 = vweird.f32 %v3873_v43 }
0x11f2   :  { %v3866_v15 = vpop.xlane.xlu0 %3865 }
0x11f3   :  { %v3871_v18 = vmul.f32 %v3866_v15, %v5802_v4 }
0x11f4   :  { %v4600_v55 = vpop.eup %4599 }
0x11f5   :  { %v3877_v45 = vmul.f32 %v4600_v55, %v3873_v43  ;;  %v3874_v58 = vadd.f32 1e-05, %v3871_v18  ;;  %vm3883_vm4 = vweird.f32 %v4600_v55 }
0x11f6   :  { %vm3884_vm12 = vmor %vm3882_vm9, %vm3883_vm4 }
0x11f7   :  { %v3878_v22 = vmul.f32 %v4600_v55, %v3877_v45  ;;  %4601 = vrsqrt.f32 %v3874_v58  ;;  %vm3892_vm10 = vweird.f32 %v3874_v58  ;;  %v4420_v45 = vld [vmem:[%s6390_s16] ss:$0 sm:$0xff] }
0x11f9   :  { %v3879_v47 = vmul.f32 0.5, %v3878_v22 }
0x11fa   :  { %v3869_v1 = vpop.xlane.xlu1 %3868 }
0x11fb   :  { %v3880_v37 = vsub.f32 1.5, %v3879_v47  ;;  %v3872_v54 = vmul.f32 %v3869_v1, %v5802_v4 }
0x11fd   :  { %v4602_v51 = vpop.eup %4601  ;;  %v3881_v49 = vmul.f32 %v4600_v55, %v3880_v37  ;;  %v3875_v25 = vadd.f32 1e-05, %v3872_v54 }
0x11fe   :  { %v3887_v44 = vmul.f32 %v4602_v51, %v3874_v58  ;;  %vm3893_vm8 = vweird.f32 %v4602_v51 }
0x11ff   :  { %v3885_v63 = vsel %vm3884_vm12, %v4600_v55, %v3881_v49  ;;  %4603 = vrsqrt.f32 %v3875_v25  ;;  %vm3894_vm11 = vmor %vm3892_vm10, %vm3893_vm8  ;;  %vm3902_vm14 = vweird.f32 %v3875_v25  ;;  %v4049_v49 = vld [vmem:[%s6391_s18 + $0x8] sm:$0xff] }
0x1200   :  { %v3906_v7 = vmul.f32 %v3885_v63, %v3855_v24  ;;  %v3888_v32 = vmul.f32 %v4602_v51, %v3887_v44  ;;  %v4109_v44 = vld [vmem:[%s4946_s13 + $0x28] sm:$0xff] }
0x1202   :  { %v3912_v16 = vmul.f32 %v4417_v20, %v3906_v7  ;;  %v3889_v56 = vmul.f32 0.5, %v3888_v32 }
0x1204   :  { %v3918_v29 = vadd.f32 %v4418_v33, %v3912_v16  ;;  %v3890_v46 = vsub.f32 1.5, %v3889_v56 }
0x1205   :  { %v4604_v11 = vpop.eup %4603 }
0x1206   :  { %v3891_v27 = vmul.f32 %v4602_v51, %v3890_v46  ;;  %v3897_v61 = vmul.f32 %v4604_v11, %v3875_v25  ;;  %4329 = vmatmul.msk.f32.vlgmr.msrb.gmra.mxu0 %vm1566_vm6, %v3918_v29  ;;  %vm3903_vm13 = vweird.f32 %v4604_v11  ;;  %v4048_v25 = vld [vmem:[%s6391_s18] sm:$0xff] }
0x1207   :  { %vm3904_vm15 = vmor %vm3902_vm14, %vm3903_vm13  ;;  %v4421_v46 = vld [vmem:[%s6392_s23] ss:$0 sm:$0xff] }
0x1208   :  { %v3895_v39 = vsel %vm3894_vm11, %v4602_v51, %v3891_v27  ;;  %v3898_v3 = vmul.f32 %v4604_v11, %v3897_v61  ;;  %v4050_v51 = vld [vmem:[%s6391_s18 + $0x10] sm:$0xff] }
0x1209   :  { %v3907_v41 = vmul.f32 %v3895_v39, %v6261_v53  ;;  %4068 = vmatpush.msrb.mxu1 %v4050_v51  ;;  %v4106_v39 = vld [vmem:[%s4946_s13 + $0x10] sm:$0xff] }
0x120a   :  { %v3899_v40 = vmul.f32 0.5, %v3898_v3  ;;  %v4105_v3 = vld [vmem:[%s4946_s13 + $0x8] sm:$0xff] }
0x120b   :  { %v3913_v9 = vmul.f32 %v4417_v20, %v3907_v41  ;;  %4069 = vmatpush.msrb.mxu1 %v4049_v49  ;;  %v4104_v41 = vld [vmem:[%s4946_s13] sm:$0xff] }
0x120c   :  { %v3900_v24 = vsub.f32 1.5, %v3899_v40  ;;  %v4095_v40 = vpop.f32.mrf.mxu3 }
0x120d   :  { %v3919_v28 = vadd.f32 %v4418_v33, %v3913_v9  ;;  %4070 = vmatpush.msrb.mxu1 %v4048_v25 }
0x120e   :  { %v3901_v10 = vmul.f32 %v4604_v11, %v3900_v24 }
0x120f   :  { %4330 = vmatmul.msk.f32.gmra.mxu0 %vm1566_vm6, %v3919_v28 }
0x1210   :  { %v3905_v42 = vsel %vm3904_vm15, %v4604_v11, %v3901_v10  ;;  %v4422_v11 = vld [vmem:[%s6393_s22] ss:$0 sm:$0xff] }
0x1211   :  { %v3908_v53 = vmul.f32 %v3905_v42, %v6267_v12 }
0x1213   :  { %v3914_v34 = vmul.f32 %v4417_v20, %v3908_v53  ;;  %v4110_v20 = vld [vmem:[%s4946_s13 + $0x30] sm:$0xff] }
0x1214   :  { %4129 = vmatpush.msra.mxu0 %v4110_v20 }
0x1215   :  { %v3920_v30 = vadd.f32 %v4418_v33, %v3914_v34  ;;  %v4108_v33 = vld [vmem:[%s4946_s13 + $0x20] sm:$0xff] }
0x1216   :  { %4130 = vmatpush.msra.mxu0 %v4109_v44 }
0x1217   :  { %4331 = vmatmul.msk.f32.gmra.mxu0 %vm1566_vm6, %v3920_v30 }
0x1218   :  { %4131 = vmatpush.msra.mxu0 %v4108_v33 }
0x121a   :  { %4132 = vmatpush.msra.mxu0 %v4107_v38 }
0x121c   :  { %4133 = vmatpush.msra.mxu0 %v4106_v39 }
0x121e   :  { %4134 = vmatpush.msra.mxu0 %v4105_v3 }
0x1220   :  { %4135 = vmatpush.msra.mxu0 %v4104_v41 }
0x1283   :  { %v3955_v19 = vpop.f32.mrf.mxu0 }
0x1284   :  { %v3956_v14 = vadd.f32 %v4419_v13, %v3955_v19 }
0x1286   :  { %v3964_v35 = vmax.f32 %v3956_v14, 0.0 }
0x1288   :  { %4003 = vmatmul.f32.vlgmr.msra.gmra.mxu2 %v3964_v35 }
0x128c   :  { %v3958_v31 = vpop.f32.mrf.mxu0 }
0x128d   :  { %v3959_v23 = vadd.f32 %v4419_v13, %v3958_v31 }
0x128f   :  { %v3965_v26 = vmax.f32 %v3959_v23, 0.0 }
0x1291   :  { %4005 = vmatmul.f32.gmra.mxu2 %v3965_v26 }
0x1294   :  { %v3961_v12 = vpop.f32.mrf.mxu0 }
0x1295   :  { %v3962_v43 = vadd.f32 %v4419_v13, %v3961_v12 }
0x1297   :  { %v3966_v15 = vmax.f32 %v3962_v43, 0.0 }
0x1299   :  { %4007 = vmatmul.f32.gmra.mxu2 %v3966_v15 }
0x130b   :  { %v4004_v18 = vpop.f32.mrf.mxu2 }
0x1314   :  { %v4006_v55 = vpop.f32.mrf.mxu2 }
0x131c   :  { %v4008_v58 = vpop.f32.mrf.mxu2 }
0x131d   :  { %v4009_v22 = vadd.f32 %v4420_v45, %v4008_v58 }
0x131f   :  { %v4011_v62 = vadd.f32 %v4009_v22, %v3920_v30 }
0x1321   :  { %v4014_v36 = vsel %vm1568_vm7, %v4011_v62, 0.0 }
0x1322   :  { %4015 = vadd.xlane.f32.xlu2 %v4014_v36 }
0x1395   :  { %v4016_v47 = vpop.xlane.xlu2 %4015 }
0x1396   :  { %v4017_v52 = vmul.f32 %v4016_v47, %v5802_v4 }
0x1398   :  { %v4018_v1 = vsub.f32 %v4011_v62, %v4017_v52 }
0x139a   :  { %v4019_v37 = vmul.f32 %v4018_v1, %v4018_v1 }
0x139c   :  { %v4020_v54 = vsel %vm1568_vm7, %v4019_v37, 0.0 }
0x139d   :  { %4021 = vadd.xlane.f32.xlu0 %v4020_v54 }
0x1410   :  { %v4022_v63 = vpop.xlane.xlu0 %4021 }
0x1411   :  { %v4023_v48 = vmul.f32 %v4022_v63, %v5802_v4 }
0x1413   :  { %v4024_v7 = vadd.f32 1e-05, %v4023_v48 }
0x1415   :  { %4605 = vrsqrt.f32 %v4024_v7  ;;  %vm4031_vm0 = vweird.f32 %v4024_v7 }
0x141b   :  { %v4606_v32 = vpop.eup %4605 }
0x141c   :  { %v4026_v21 = vmul.f32 %v4606_v32, %v4024_v7  ;;  %vm4032_vm7 = vweird.f32 %v4606_v32 }
0x141d   :  { %vm4033_vm1 = vmor %vm4031_vm0, %vm4032_vm7 }
0x141e   :  { %v4027_v16 = vmul.f32 %v4606_v32, %v4026_v21 }
0x1420   :  { %v4028_v56 = vmul.f32 0.5, %v4027_v16 }
0x1422   :  { %v4029_v5 = vsub.f32 1.5, %v4028_v56 }
0x1424   :  { %v4030_v29 = vmul.f32 %v4606_v32, %v4029_v5 }
0x1426   :  { %v4034_v4 = vsel %vm4033_vm1, %v4606_v32, %v4030_v29 }
0x1427   :  { %v4035_v2 = vmul.f32 %v4034_v4, %v4018_v1 }
0x1429   :  { %v4039_v27 = vmul.f32 %v4421_v46, %v4035_v2 }
0x142b   :  { %v4043_v61 = vadd.f32 %v4422_v11, %v4039_v27 }
0x142d   :  { %4332 = vmatmul.msk.f32.vlgmr.msrb.gmra.mxu1 %vm1566_vm6, %v4043_v61  ;;  %vm4140_vm6 = vcmask 11264  }
0x14aa   :  { %v4072_v9 = vpop.f32.mrf.mxu1 }
0x14ab   :  { %v4096_v6 = vadd.f32 %v4095_v40, %v4072_v9 }
0x14ad   :  { %v4102_v24 = vadd.f32 %v4423_v8, %v4096_v6 }
0x14af   :  { %v4103_v28 = vmax.f32 %v4102_v24, 0.0 }
0x14b1   :  { %4334 = vmatmul.msk.f32.vlgmr.msra.gmra.mxu0 %vm4116_vm2, %v4103_v28 }
0x152e   :  { %v4137_v10 = vpop.f32.mrf.mxu0 }
0x152f   :  { %v4138_v42 = vadd.f32 %v4424_v50, %v4137_v10 }
0x1531   :  { %4141 = vst.msk [vmem:[%s4954_s4] sm:$0xf] %vm4140_vm6, %v4138_v42 }
0x1532   :  { %4150 = vsyncpa [#allocation3], 1 }

</bundles_post_ra>
